<compile_context>
chip_gen: v5e
topology: v5e:2x2
jax: 0.10.0
libtpu: 0.0.40
codegen_flags: <defaults>
</compile_context>

<pallas_src>
import jax
import jax.numpy as jnp
from jax import lax
from jax.experimental import pallas as pl
from jax.experimental.pallas import tpu as pltpu


def _leaky_relu(v, slope=0.01):
    return jnp.where(v >= 0, v, slope * v)


def _round_up(a, m):
    return ((a + m - 1) // m) * m


def _default_pack(no):
    """Smallest power-of-two row-pack factor giving a lane-dense (>=128-lane) output store."""
    p = 1
    while no * p < 128 and p < 32:
        p *= 2
    return p


def pack_params(params, pack, compute_dtype):
    """Block-diagonal kron(I_P, W) weights + lane-tiled biases for the row-packed layout.

    With x reshaped (B, Ni) -> (B/P, P*Ni) (free row-major reshape), x_p @ kron(I_P, W) + tile(b, P)
    is exactly the per-row x @ W + b, but every load / matmul / store is 128-lane dense.
    Done once per parameter set (cache the result in production).
    """
    eye = jnp.eye(pack, dtype=jnp.float32)
    packed = {}
    for li in range(1, 5):
        w = params[f"w{li}"].astype(jnp.float32)
        b = params[f"b{li}"].astype(jnp.float32)
        packed[f"w{li}"] = jnp.kron(eye, w).astype(compute_dtype)
        packed[f"b{li}"] = jnp.tile(b, (1, pack))          # stays f32 (added to the f32 accumulator)
    return packed


def _make_mlp_kernel(chunk_rows, n_chunks, compute_dtype, unroll):
    """Fused 4-layer MLP kernel over one (tile, P*Ni) packed block."""

    def forward(u, w1, b1, w2, b2, w3, b3, w4, b4):
        h = jnp.dot(u.astype(compute_dtype), w1, preferred_element_type=jnp.float32)
        h = _leaky_relu(h + b1)
        h = jnp.dot(h.astype(compute_dtype), w2, preferred_element_type=jnp.float32)
        h = jnp.tanh(h + b2)
        h = jnp.dot(h.astype(compute_dtype), w3, preferred_element_type=jnp.float32)
        h = _leaky_relu(h + b3)
        h = jnp.dot(h.astype(compute_dtype), w4, preferred_element_type=jnp.float32)
        return jnp.tanh(h + b4)

    def kernel(x_ref, w1_ref, b1_ref, w2_ref, b2_ref, w3_ref, b3_ref,
               w4_ref, b4_ref, o_ref):
        # Hoist weight/bias loads out of the (unrolled) chunk loop: JAX does not CSE them,
        # so re-loading per chunk would add redundant vld / broadcast filler.
        w1, w2, w3, w4 = w1_ref[...], w2_ref[...], w3_ref[...], w4_ref[...]
        b1, b2, b3, b4 = b1_ref[...], b2_ref[...], b3_ref[...], b4_ref[...]

        if n_chunks == 1:
            o_ref[...] = forward(x_ref[...], w1, b1, w2, b2, w3, b3, w4, b4
                                 ).astype(o_ref.dtype)
        else:
            def chunk_body(c, carry):
                r0 = pl.multiple_of(c * chunk_rows, chunk_rows)
                u = x_ref[pl.ds(r0, chunk_rows), :]
                o_ref[pl.ds(r0, chunk_rows), :] = forward(
                    u, w1, b1, w2, b2, w3, b3, w4, b4).astype(o_ref.dtype)
                return carry

            lax.fori_loop(0, n_chunks, chunk_body, 0, unroll=unroll)

    return kernel


def neural_network_forward(x, params, *, pack=None, tile_rows=256, chunk_rows=16,
                           compute_dtype=jnp.bfloat16, num_parallel=2):
    """Fused forward pass of the 4-layer MLP.

    x:       (B, Ni); stays in its HBM dtype (matmul inputs cast in-kernel, no wrapper cast pass).
    params:  dict w1..w4 of shape (in, out) (PyTorch weights transposed: y = x @ W + b), b1..b4 (1, out).
    pack:    rows packed into the 128-lane axis (block-diagonal weights); default chosen so the
             output store is lane-dense.  pack=1 disables packing.
    tile_rows / chunk_rows: packed rows per grid step / per in-kernel chunk.
    compute_dtype: MXU input dtype (bf16 default; accumulation, bias adds, activations stay f32).
    num_parallel: cap the tile so the grid has >= this many steps (2 keeps both v7x TensorCores
             busy; set 1 on single-TC v5e/v6e for maximal tiles).
    """
    B, Ni = x.shape
    No = params["w4"].shape[1]
    out_dtype = x.dtype

    if pack is None:
        pack = _default_pack(No)
    pack = max(1, int(pack))

    # Pad only up to a multiple of the pack factor (no pad when B % pack == 0).  Ragged grid
    # tiles are handled by Pallas masked writes, so no pad/slice to a multiple of the tile.
    b_pad = _round_up(B, pack)
    if b_pad != B:
        x = jnp.pad(x, ((0, b_pad - B), (0, 0)))
    bp = b_pad // pack                       # packed batch rows
    ni_p, no_p = Ni * pack, No * pack

    # Free row-major reshape: (b_pad, Ni) -> (bp, pack*Ni).  No data movement.
    xp = x.reshape(bp, ni_p)

    pp = pack_params(params, pack, compute_dtype)

    # ---- tiling (in packed rows) ------------------------------------------------------------
    if bp <= 8:
        tile = bp                            # single full block (block dim == array dim)
    else:
        tile = min(tile_rows, _round_up(bp, 8))
        if num_parallel > 1:
            tile = min(tile, _round_up(pl.cdiv(bp, num_parallel), 8))
        tile = max(8, _round_up(tile, 8))
    chunk = max(1, min(chunk_rows, tile))
    if tile > chunk:
        chunk = _round_up(chunk, 8)
        tile = _round_up(tile, chunk)        # chunk always divides tile (no gcd footgun)
    else:
        chunk = tile
    n_chunks = tile // chunk
    unroll = min(4, n_chunks)                # bounded unroll: LLO overlap without imem blowup
    grid_steps = pl.cdiv(bp, tile)

    def full_spec(arr):
        # Tiny, grid-invariant operands: whole array resident in VMEM.
        return pl.BlockSpec(arr.shape, lambda i: (0, 0))

    in_specs = [
        pl.BlockSpec((tile, ni_p), lambda i: (i, 0)),
        full_spec(pp["w1"]), full_spec(pp["b1"]),
        full_spec(pp["w2"]), full_spec(pp["b2"]),
        full_spec(pp["w3"]), full_spec(pp["b3"]),
        full_spec(pp["w4"]), full_spec(pp["b4"]),
    ]
    out_spec = pl.BlockSpec((tile, no_p), lambda i: (i, 0))

    # ---- VMEM budget / cost hints -------------------------------------------------------------
    x_itemsize = jnp.dtype(x.dtype).itemsize
    out_itemsize = jnp.dtype(out_dtype).itemsize
    param_bytes = sum(int(a.size) * a.dtype.itemsize for a in pp.values())
    dims_p = [ni_p] + [pp[f"w{i}"].shape[1] for i in range(1, 5)]
    max_w = max(dims_p[1:])
    vmem_bytes = (2 * tile * ni_p * x_itemsize          # double-buffered x tile
                  + 2 * tile * no_p * out_itemsize      # double-buffered out tile
                  + 2 * param_bytes                     # resident params (2-deep buffering)
                  + 4 * chunk * max_w * 4)              # in-flight f32 activations
    vmem_limit = int(min(64 << 20, 2 * vmem_bytes + (8 << 20)))

    flops = 2 * bp * sum(dims_p[i] * dims_p[i + 1] for i in range(4))
    transcendentals = bp * (dims_p[2] + dims_p[4])      # tanh layers
    bytes_accessed = xp.size * x_itemsize + bp * no_p * out_itemsize + param_bytes

    kernel = _make_mlp_kernel(chunk, n_chunks, compute_dtype, unroll)

    out_p = pl.pallas_call(
        kernel,
        out_shape=jax.ShapeDtypeStruct((bp, no_p), out_dtype),
        grid_spec=pltpu.PrefetchScalarGridSpec(
            num_scalar_prefetch=0,
            grid=(grid_steps,),
            in_specs=in_specs,
            out_specs=out_spec,
        ),
        compiler_params=pltpu.CompilerParams(
            dimension_semantics=("parallel",),
            vmem_limit_bytes=vmem_limit),
        cost_estimate=pl.CostEstimate(
            flops=int(flops),
            transcendentals=int(transcendentals),
            bytes_accessed=int(bytes_accessed)),
    )(xp,
      pp["w1"], pp["b1"], pp["w2"], pp["b2"],
      pp["w3"], pp["b3"], pp["w4"], pp["b4"])

    # Free row-major reshape back; slice only if the pack pad was needed.
    out = out_p.reshape(b_pad, No)
    return out[:B] if b_pad != B else out


def init_params(key, N):
    """Deterministic init mimicking nn.Linear's U(-1/sqrt(fan_in), 1/sqrt(fan_in))."""
    params = {}
    keys = jax.random.split(key, 8)
    layer_dims = [(N[0], N[1]), (N[1], N[2]), (N[2], N[3]), (N[3], N[4])]
    for li, (fan_in, fan_out) in enumerate(layer_dims, start=1):
        bound = 1.0 / jnp.sqrt(jnp.float32(fan_in))
        params[f"w{li}"] = jax.random.uniform(keys[2 * (li - 1)], (fan_in, fan_out),
                                              jnp.float32, -bound, bound)
        params[f"b{li}"] = jax.random.uniform(keys[2 * (li - 1) + 1], (1, fan_out),
                                              jnp.float32, -bound, bound)
    return params


def reference_forward(x, params):
    u = _leaky_relu(x @ params["w1"] + params["b1"])
    u = jnp.tanh(u @ params["w2"] + params["b2"])
    u = _leaky_relu(u @ params["w3"] + params["b3"])
    u = jnp.tanh(u @ params["w4"] + params["b4"])
    return u


if __name__ == "__main__":
    # N = [Ni, Nh1, Nh2, Nh3, No]
    N = [16, 32, 64, 32, 8]
    batch = 200   # not a multiple of the pack factor (16) nor the tile -> exercises ragged paths

    key = jax.random.PRNGKey(0)
    kx, kp = jax.random.split(key)
    x = jax.random.normal(kx, (batch, N[0]), jnp.float32)
    params = init_params(kp, N)

    ref = reference_forward(x, params)

    # f32 MXU-input path (MXU default precision may still use bf16 passes on some generations,
    # hence the modest tolerance).
    out_f32 = jax.block_until_ready(
        neural_network_forward(x, params, compute_dtype=jnp.float32))
    assert out_f32.shape == (batch, N[4])
    assert jnp.allclose(out_f32, ref, atol=2e-3, rtol=2e-3), "f32 mismatch vs reference"

    # Default path: bf16 MXU inputs, f32 accumulation + f32 activations.
    out_bf16 = jax.block_until_ready(neural_network_forward(x, params))
    assert out_bf16.shape == (batch, N[4])
    assert jnp.allclose(out_bf16, ref, atol=5e-2, rtol=5e-2), "bf16 mismatch vs reference"

    print("KERNEL_OK")
</pallas_src>

<mosaic_0001>
module attributes {stable_mosaic.version = 11 : i64} {
  func.func @kernel(%arg0: i32, %arg1: memref<8x256xf32, #tpu.memory_space<vmem>>, %arg2: memref<256x512xf32, #tpu.memory_space<vmem>>, %arg3: memref<1x512xf32, #tpu.memory_space<vmem>>, %arg4: memref<512x1024xf32, #tpu.memory_space<vmem>>, %arg5: memref<1x1024xf32, #tpu.memory_space<vmem>>, %arg6: memref<1024x512xf32, #tpu.memory_space<vmem>>, %arg7: memref<1x512xf32, #tpu.memory_space<vmem>>, %arg8: memref<512x128xf32, #tpu.memory_space<vmem>>, %arg9: memref<1x128xf32, #tpu.memory_space<vmem>>, %arg10: memref<8x128xf32, #tpu.memory_space<vmem>>) attributes {dimension_semantics = [#tpu.dimension_semantics<parallel>], iteration_bounds = array<i64: 2>, scalar_prefetch = 0 : i64, scratch_operands = 0 : i64, tpu.core_type = #tpu.core_type<tc>, window_params = [{transform_indices = @transform_0, window_bounds = array<i64: 8, 256>}, {pipeline_mode = #tpu.pipeline_mode<synchronous>, transform_indices = @transform_1, window_bounds = array<i64: 256, 512>}, {pipeline_mode = #tpu.pipeline_mode<synchronous>, transform_indices = @transform_2, window_bounds = array<i64: 1, 512>}, {pipeline_mode = #tpu.pipeline_mode<synchronous>, transform_indices = @transform_3, window_bounds = array<i64: 512, 1024>}, {pipeline_mode = #tpu.pipeline_mode<synchronous>, transform_indices = @transform_4, window_bounds = array<i64: 1, 1024>}, {pipeline_mode = #tpu.pipeline_mode<synchronous>, transform_indices = @transform_5, window_bounds = array<i64: 1024, 512>}, {pipeline_mode = #tpu.pipeline_mode<synchronous>, transform_indices = @transform_6, window_bounds = array<i64: 1, 512>}, {pipeline_mode = #tpu.pipeline_mode<synchronous>, transform_indices = @transform_7, window_bounds = array<i64: 512, 128>}, {pipeline_mode = #tpu.pipeline_mode<synchronous>, transform_indices = @transform_8, window_bounds = array<i64: 1, 128>}, {transform_indices = @transform_9, window_bounds = array<i64: 8, 128>}]} {
    %c0 = arith.constant 0 : index
    %c0_0 = arith.constant 0 : index
    %0 = vector.load %arg2[%c0, %c0_0] : memref<256x512xf32, #tpu.memory_space<vmem>>, vector<256x512xf32>
    %c0_1 = arith.constant 0 : index
    %c0_2 = arith.constant 0 : index
    %1 = vector.load %arg4[%c0_1, %c0_2] : memref<512x1024xf32, #tpu.memory_space<vmem>>, vector<512x1024xf32>
    %c0_3 = arith.constant 0 : index
    %c0_4 = arith.constant 0 : index
    %2 = vector.load %arg6[%c0_3, %c0_4] : memref<1024x512xf32, #tpu.memory_space<vmem>>, vector<1024x512xf32>
    %c0_5 = arith.constant 0 : index
    %c0_6 = arith.constant 0 : index
    %3 = vector.load %arg8[%c0_5, %c0_6] : memref<512x128xf32, #tpu.memory_space<vmem>>, vector<512x128xf32>
    %c0_7 = arith.constant 0 : index
    %c0_8 = arith.constant 0 : index
    %4 = vector.load %arg3[%c0_7, %c0_8] : memref<1x512xf32, #tpu.memory_space<vmem>>, vector<1x512xf32>
    %c0_9 = arith.constant 0 : index
    %c0_10 = arith.constant 0 : index
    %5 = vector.load %arg5[%c0_9, %c0_10] : memref<1x1024xf32, #tpu.memory_space<vmem>>, vector<1x1024xf32>
    %c0_11 = arith.constant 0 : index
    %c0_12 = arith.constant 0 : index
    %6 = vector.load %arg7[%c0_11, %c0_12] : memref<1x512xf32, #tpu.memory_space<vmem>>, vector<1x512xf32>
    %c0_13 = arith.constant 0 : index
    %c0_14 = arith.constant 0 : index
    %7 = vector.load %arg9[%c0_13, %c0_14] : memref<1x128xf32, #tpu.memory_space<vmem>>, vector<1x128xf32>
    %c0_15 = arith.constant 0 : index
    %c0_16 = arith.constant 0 : index
    %8 = vector.load %arg1[%c0_15, %c0_16] : memref<8x256xf32, #tpu.memory_space<vmem>>, vector<8x256xf32>
    %cst = arith.constant dense<0.000000e+00> : vector<8x512xf32>
    %9 = tpu.matmul %8, %0, %cst {dimension_numbers = #tpu.dot_dimension_numbers<[1], [0], [0], [1], [0, 0, 1, 1], [], []>} : vector<8x256xf32>, vector<256x512xf32>, vector<8x512xf32> -> vector<8x512xf32>
    %10 = vector.broadcast %4 : vector<1x512xf32> to vector<8x512xf32>
    %11 = arith.addf %9, %10 : vector<8x512xf32>
    %cst_17 = arith.constant 0.000000e+00 : f32
    %12 = vector.broadcast %cst_17 : f32 to vector<8x512xf32>
    %13 = arith.cmpf oge, %11, %12 : vector<8x512xf32>
    %cst_18 = arith.constant 0.00999999977 : f32
    %14 = vector.broadcast %cst_18 : f32 to vector<8x512xf32>
    %15 = arith.mulf %14, %11 : vector<8x512xf32>
    %16 = arith.select %13, %11, %15 : vector<8x512xi1>, vector<8x512xf32>
    %cst_19 = arith.constant dense<0.000000e+00> : vector<8x1024xf32>
    %17 = tpu.matmul %16, %1, %cst_19 {dimension_numbers = #tpu.dot_dimension_numbers<[1], [0], [0], [1], [0, 0, 1, 1], [], []>} : vector<8x512xf32>, vector<512x1024xf32>, vector<8x1024xf32> -> vector<8x1024xf32>
    %18 = vector.broadcast %5 : vector<1x1024xf32> to vector<8x1024xf32>
    %19 = arith.addf %17, %18 : vector<8x1024xf32>
    %20 = math.tanh %19 : vector<8x1024xf32>
    %cst_20 = arith.constant dense<0.000000e+00> : vector<8x512xf32>
    %21 = tpu.matmul %20, %2, %cst_20 {dimension_numbers = #tpu.dot_dimension_numbers<[1], [0], [0], [1], [0, 0, 1, 1], [], []>} : vector<8x1024xf32>, vector<1024x512xf32>, vector<8x512xf32> -> vector<8x512xf32>
    %22 = vector.broadcast %6 : vector<1x512xf32> to vector<8x512xf32>
    %23 = arith.addf %21, %22 : vector<8x512xf32>
    %cst_21 = arith.constant 0.000000e+00 : f32
    %24 = vector.broadcast %cst_21 : f32 to vector<8x512xf32>
    %25 = arith.cmpf oge, %23, %24 : vector<8x512xf32>
    %cst_22 = arith.constant 0.00999999977 : f32
    %26 = vector.broadcast %cst_22 : f32 to vector<8x512xf32>
    %27 = arith.mulf %26, %23 : vector<8x512xf32>
    %28 = arith.select %25, %23, %27 : vector<8x512xi1>, vector<8x512xf32>
    %cst_23 = arith.constant dense<0.000000e+00> : vector<8x128xf32>
    %29 = tpu.matmul %28, %3, %cst_23 {dimension_numbers = #tpu.dot_dimension_numbers<[1], [0], [0], [1], [0, 0, 1, 1], [], []>} : vector<8x512xf32>, vector<512x128xf32>, vector<8x128xf32> -> vector<8x128xf32>
    %30 = vector.broadcast %7 : vector<1x128xf32> to vector<8x128xf32>
    %31 = arith.addf %29, %30 : vector<8x128xf32>
    %32 = math.tanh %31 : vector<8x128xf32>
    %c0_24 = arith.constant 0 : index
    %c0_25 = arith.constant 0 : index
    %33 = vector.load %arg10[%c0_24, %c0_25] : memref<8x128xf32, #tpu.memory_space<vmem>>, vector<8x128xf32>
    tpu.vector_store %arg10[%c0_24, %c0_25], %32 {strides = array<i32>} : memref<8x128xf32, #tpu.memory_space<vmem>>, vector<8x128xf32>,
    return
  }
  func.func @transform_0(%arg0: i32) -> (i32, i32) {
    %c0_i32 = arith.constant 0 : i32
    %c0_i32_0 = arith.constant 0 : i32
    return %arg0, %c0_i32 : i32, i32
  }
  func.func @transform_1(%arg0: i32) -> (i32, i32) {
    %c0_i32 = arith.constant 0 : i32
    %c0_i32_0 = arith.constant 0 : i32
    %c0_i32_1 = arith.constant 0 : i32
    return %c0_i32, %c0_i32_0 : i32, i32
  }
  func.func @transform_2(%arg0: i32) -> (i32, i32) {
    %c0_i32 = arith.constant 0 : i32
    %c0_i32_0 = arith.constant 0 : i32
    %c0_i32_1 = arith.constant 0 : i32
    return %c0_i32, %c0_i32_0 : i32, i32
  }
  func.func @transform_3(%arg0: i32) -> (i32, i32) {
    %c0_i32 = arith.constant 0 : i32
    %c0_i32_0 = arith.constant 0 : i32
    %c0_i32_1 = arith.constant 0 : i32
    return %c0_i32, %c0_i32_0 : i32, i32
  }
  func.func @transform_4(%arg0: i32) -> (i32, i32) {
    %c0_i32 = arith.constant 0 : i32
    %c0_i32_0 = arith.constant 0 : i32
    %c0_i32_1 = arith.constant 0 : i32
    return %c0_i32, %c0_i32_0 : i32, i32
  }
  func.func @transform_5(%arg0: i32) -> (i32, i32) {
    %c0_i32 = arith.constant 0 : i32
    %c0_i32_0 = arith.constant 0 : i32
    %c0_i32_1 = arith.constant 0 : i32
    return %c0_i32, %c0_i32_0 : i32, i32
  }
  func.func @transform_6(%arg0: i32) -> (i32, i32) {
    %c0_i32 = arith.constant 0 : i32
    %c0_i32_0 = arith.constant 0 : i32
    %c0_i32_1 = arith.constant 0 : i32
    return %c0_i32, %c0_i32_0 : i32, i32
  }
  func.func @transform_7(%arg0: i32) -> (i32, i32) {
    %c0_i32 = arith.constant 0 : i32
    %c0_i32_0 = arith.constant 0 : i32
    %c0_i32_1 = arith.constant 0 : i32
    return %c0_i32, %c0_i32_0 : i32, i32
  }
  func.func @transform_8(%arg0: i32) -> (i32, i32) {
    %c0_i32 = arith.constant 0 : i32
    %c0_i32_0 = arith.constant 0 : i32
    %c0_i32_1 = arith.constant 0 : i32
    return %c0_i32, %c0_i32_0 : i32, i32
  }
  func.func @transform_9(%arg0: i32) -> (i32, i32) {
    %c0_i32 = arith.constant 0 : i32
    %c0_i32_0 = arith.constant 0 : i32
    return %arg0, %c0_i32 : i32, i32
  }
}

</mosaic_0001>

<bundles_post_ra>
// kernel: tpu_custom_call.1
= control target key start
LH: loop header
LB: loop body
LE: loop exit
PB: predicated region body
PF: predicated region fallthrough
CT: control target
= control target key end

     0   :  { %s4376_s0 = inlined_call_operand.hbm [shape: f32[13,256], index: 0, kind: input, shape index: {}]   ;;  %s4377_s1 = inlined_call_operand.hbm [shape: f32[256,512], index: 1, kind: input, shape index: {}]   ;;  %s4378_s2 = inlined_call_operand.hbm [shape: f32[1,512], index: 2, kind: input, shape index: {}]   ;;  %s4379_s3 = inlined_call_operand.hbm [shape: f32[512,1024], index: 3, kind: input, shape index: {}]   ;;  %s4380_s4 = inlined_call_operand.hbm [shape: f32[1,1024], index: 4, kind: input, shape index: {}]   ;;  %s4381_s5 = inlined_call_operand.hbm [shape: f32[1024,512], index: 5, kind: input, shape index: {}]   ;;  %s4382_s6 = inlined_call_operand.hbm [shape: f32[1,512], index: 6, kind: input, shape index: {}]   ;;  %s4383_s7 = inlined_call_operand.hbm [shape: f32[512,128], index: 7, kind: input, shape index: {}]   ;;  %s4384_s8 = inlined_call_operand.hbm [shape: f32[1,128], index: 8, kind: input, shape index: {}]   ;;  %s4385_s9 = inlined_call_operand.hbm [shape: f32[13,128], index: 9, kind: output, shape index: {}]  }
   0x1   :  { %4386 = sst [smem:[#allocation24_spill]] %s4377_s1 }
   0x2   :  { %4387 = sst [smem:[#allocation25_spill]] %s4378_s2 }
   0x3   :  { %4388 = sst [smem:[#allocation26_spill]] %s4379_s3 }
   0x4   :  { %4389 = sst [smem:[#allocation27_spill]] %s4380_s4 }
   0x5   :  { %14 = vsyncpa [#allocation3], 0 }
   0x6   :  { %16 = vsyncpa [#allocation3 + $0x1], 0 }
   0x7   :  { %17 = vsyncpa [#allocation6], 0 }
   0x8   :  { %18 = vsyncpa [#allocation9], 0 }
   0x9   :  { %19 = vsyncpa [#allocation12], 0 }
   0xa   :  { %20 = vsyncpa [#allocation15], 0 }
   0xb   :  { %21 = vsyncpa [#allocation4], 0 }
   0xc   :  { %23 = vsyncpa [#allocation4 + $0x1], 0  ;;  %s4052_s30 = smov 0   ;;  %s4054_s10 = smov 0  }
   0xd   :  { %s4056_s11 = smov 0   ;;  %s4058_s12 = smov 0  }
   0xe LB: > { %s4390_s1 = sld [smem:[#allocation24_spill]]  ;;  %s4076_s16 = sadd.s32 4294967295, %s3986_s12   ;;  %s3986_s12 = sphi %s4058_s12, %s4405_s12   ;;  %s3982_s11 = sphi %s4056_s11, %s4404_s11   ;;  %s3978_s10 = sphi %s4054_s10, %s4403_s10   ;;  %s3974_s30 = sphi %s4052_s30, %s4402_s30  }
   0xf   : > { %p3452_p0 = scmp.ge.s32.totalorder %s3986_s12, 1  ;;  %p50_p1 = scmp.eq.s32.totalorder %s4076_s16, 0 }
  0x10   : > { %p254_p2 = scmp.lt.s32.totalorder %s3986_s12, 3  ;;  %s3988_s18 = smov [#allocation5]  }
  0x11   : > { %s267_s19 = sshll.u32 %s3988_s18, 4  ;;  %s4392_s3 = sld [smem:[#allocation26_spill]]  ;;  %s268_s19 = int_to_ptr.vmem [resolvable:$true] %s267_s19 }
  0x12   : > { %p4081_p3 = pnand %p3452_p0, %p254_p2  ;;  %s3989_s24 = smov [#allocation8]  }
  0x13   : > { %s293_s25 = sshll.u32 %s3989_s24, 4  ;;  %s3990_s26 = smov 512   ;;  %s294_s25 = int_to_ptr.vmem [resolvable:$true] %s293_s25 }
  0x14   : > { %s265_s15 = sshll.u32 %s4390_s1, 4  ;;  %p3517_p4 = pneg %p4081_p3  ;;  %s266_s15 = int_to_ptr.hbm [resolvable:$true] %s265_s15 }
  0x15   : > { %s3991_s27 = smov 32   ;;  %s3992_s28 = smov 1024  }
  0x16   : > { %p4093_p6 = pnand %p3517_p4, %p50_p1  ;;  %s3993_s29 = smov 64  }
  0x17   : > { %s291_s22 = sshll.u32 %s4392_s3, 4  ;;  %s317_s18 = sshll.u32 %s4381_s5, 4  ;;  %s292_s22 = int_to_ptr.hbm [resolvable:$true] %s291_s22  ;;  %s318_s18 = int_to_ptr.hbm [resolvable:$true] %s317_s18 }
  0x18   : > { %3520 = dma.hbm_to_vmem [thread:$0]  (!%p4093_p6), %s266_s15, 16384, %s268_s19, [#allocation6], %s3990_s26, %s3990_s26, %s3991_s27  }
  0x19   : > { %3526 = dma.hbm_to_vmem [thread:$0]  (!%p4093_p6), %s292_s22, 65536, %s294_s25, [#allocation9], %s3992_s28, %s3992_s28, %s3993_s29  }
  0x1a   : > { %s3994_s20 = smov [#allocation11]   ;;  %s343_s3 = sshll.u32 %s4383_s7, 4  ;;  %s344_s3 = int_to_ptr.hbm [resolvable:$true] %s343_s3 }
  0x1b   : > { %s319_s21 = sshll.u32 %s3994_s20, 4  ;;  %s3995_s15 = smov [#allocation14]   ;;  %s320_s21 = int_to_ptr.vmem [resolvable:$true] %s319_s21 }
  0x1c   : > { %3532 = dma.hbm_to_vmem [thread:$0]  (!%p4093_p6), %s318_s18, 65536, %s320_s21, [#allocation12], %s3990_s26, %s3990_s26, %s3991_s27  }
  0x1d   : > { %s345_s19 = sshll.u32 %s3995_s15, 4  ;;  %s3996_s22 = smov 128   ;;  %s346_s19 = int_to_ptr.vmem [resolvable:$true] %s345_s19 }
  0x1e   : > { %s3997_s25 = smov 8   ;;  %s4394_s2 = sld [smem:[#allocation25_spill]] }
  0x1f   : > { %3538 = dma.hbm_to_vmem [thread:$0]  (!%p4093_p6), %s344_s3, 8192, %s346_s19, [#allocation15], %s3996_s22, %s3996_s22, %s3997_s25  }
  0x20   : > { %s3998_s14 = smov [#allocation7]   ;;  %s4395_s4 = sld [smem:[#allocation27_spill]] }
  0x21   : > { %s282_s1 = sshll.u32 %s3998_s14, 4  ;;  %s3999_s18 = smov [#allocation10]   ;;  %s283_s1 = int_to_ptr.vmem [resolvable:$true] %s282_s1 }
  0x22   : > { %s308_s3 = sshll.u32 %s3999_s18, 4  ;;  %s332_s15 = sshll.u32 %s4382_s6, 4  ;;  %s309_s3 = int_to_ptr.vmem [resolvable:$true] %s308_s3  ;;  %s333_s15 = int_to_ptr.hbm [resolvable:$true] %s332_s15 }
  0x23   : > { %s358_s25 = sshll.u32 %s4384_s8, 4  ;;  %s4000_s28 = smov [#allocation13]   ;;  %s359_s25 = int_to_ptr.hbm [resolvable:$true] %s358_s25 }
  0x24   : > { %s280_s13 = sshll.u32 %s4394_s2, 4  ;;  %s334_s29 = sshll.u32 %s4000_s28, 4  ;;  %s281_s13 = int_to_ptr.hbm [resolvable:$true] %s280_s13  ;;  %s335_s29 = int_to_ptr.vmem [resolvable:$true] %s334_s29 }
  0x25   : > { %3523 = dma.hbm_to_vmem [thread:$0]  (!%p4093_p6), %s281_s13, 64, %s283_s1, [#allocation6]  }
  0x26   : > { %s306_s27 = sshll.u32 %s4395_s4, 4  ;;  %s4001_s13 = smov [#allocation16]   ;;  %s307_s27 = int_to_ptr.hbm [resolvable:$true] %s306_s27 }
  0x27   : > { %3529 = dma.hbm_to_vmem [thread:$0]  (!%p4093_p6), %s307_s27, 128, %s309_s3, [#allocation9]  }
  0x28   : > { %3535 = dma.hbm_to_vmem [thread:$0]  (!%p4093_p6), %s333_s15, 64, %s335_s29, [#allocation12]  }
  0x29   : > { %s360_s14 = sshll.u32 %s4001_s13, 4  ;;  %s3451_s1 = sadd.s32 4294967294, %s3986_s12   ;;  %s361_s14 = int_to_ptr.vmem [resolvable:$true] %s360_s14 }
  0x2a   : > { %3541 = dma.hbm_to_vmem [thread:$0]  (!%p4093_p6), %s359_s25, 16, %s361_s14, [#allocation15]  }
  0x2b   : > { %s4133_s20 = sadd.s32 1, %s3986_s12   ;;  %s36_s27 = sadd.s32 1, %s3982_s11 }
  0x2c   : > { %s33_s26 = ssub.s32 %s3986_s12, %s4133_s20  ;;  %p43_p8 = scmp.ne.s32.totalorder %s3982_s11, %s3978_s10 }
  0x2d   : > { %p34_p7 = scmp.eq.s32.totalorder %s33_s26, 0  ;;  %p44_p9 = scmp.eq.s32.totalorder %s3986_s12, 0 }
  0x2e   : > { %p49_p10 = scmp.ne.s32.totalorder %s3978_s10, %s3974_s30  ;;  %p241_p13 = scmp.eq.s32.totalorder %s4076_s16, 1 }
  0x2f   : > { %s4144_s18 = scalar_select %p34_p7, %s3982_s11, %s36_s27  }
  0x30   : > { %p4146_p11 = por %p44_p9, %p43_p8  ;;  %p4152_p12 = por %p50_p1, %p49_p10 }
  0x31   : > { %p247_p0 = scmp.eq.s32.totalorder %s3451_s1, 1  ;;  %p3558_p2 = scmp.lt.s32.totalorder %s3986_s12, 2 }
  0x32   : > { %s371_s21 = sand.u32 1, %s3982_s11   ;;  %p4159_p4 = por %p241_p13, %p43_p8 }
  0x33   : > { %p4163_p6 = por %p247_p0, %p49_p10  ;;  %s3462_s19 = sshll.u32 %s371_s21, 4 }
  0x34   : > { %s3480_s22 = sshll.u32 %s3986_s12, 4  ;;  %s375_s13 = scalar_lea.vmem [#allocation2], %s3462_s19 }
  0x35   : > { %s380_s29 = scalar_lea.hbm %s4376_s0, %s3480_s22  ;;  %s384_s14 = sshll.u32 %s375_s13, 4  ;;  %s385_s14 = int_to_ptr.vmem [resolvable:$true] %s384_s14 }
  0x36   : > { %s382_s26 = sshll.u32 %s380_s29, 4  ;;  %p4173_p7 = pnand %p3558_p2, %p4146_p11  ;;  %s383_s26 = int_to_ptr.hbm [resolvable:$true] %s382_s26 }
  0x37   : > { %s372_s27 = scalar_lea.sflag [#allocation3], %s371_s21  ;;  %s3874_s2 = sshra.s32 %s383_s26, 4  ;;  %s3875_s2 = int_to_ptr.hbm [resolvable:$true] %s3874_s2 }
  0x38   : > { %s3876_s4 = scalar_lea.hbm %s3875_s2, 16  ;;  %p3878_p9 = pneg %p4173_p7 }
  0x39   : > { %p3877_p8 = scmp.ne.s32.totalorder %s3875_s2, %s3876_s4  ;;  %s3881_s25 = scalar_lea.hbm %s4376_s0, 32 }
  0x3a   : > { %p3882_p11 = scmp.lt.s32.totalorder %s3875_s2, %s4376_s0  ;;  %p3883_p0 = scmp.lt.s32.totalorder %s3881_s25, %s3876_s4 }
  0x3b   : > { %p3879_p10 = pnand %p3878_p9, %p3877_p8 }
  0x3c   : > { %p3884_p2 = por %p3883_p0, %p3882_p11 }
  0x3d   : > { %p3880_p13 = pneg %p3879_p10 }
  0x3f   : > { %p3885_p5 = pnand %p3884_p2, %p3880_p13 }
  0x41   : > { %3888 = shalt.err (!%p3885_p5)
}
  0x42   : > { %3545 = dma.hbm_to_vmem [thread:$0]  (!%p4173_p7), %s383_s26, 256, %s385_s14, %s372_s27  }
  0x43   : > { %393 = sbr.rel (%p4081_p3) target bundleno = 1079 (0x437), region = 56  ;;  %s4190_s21 = sand.u32 (!%p4081_p3), 1, %s3978_s10  }
  0x44   : > { %s3466_s29 = sshll.u32 (!%p4081_p3), %s4190_s21, 4  ;;  %s396_s13 = scalar_lea.sflag (!%p4081_p3), [#allocation3], %s4190_s21 }
  0x45   : > { %s4194_s19 = scalar_lea.vmem (!%p4081_p3), [#allocation2], %s3466_s29 }
  0x48   : > { %3949 = dma.done.wait (%p4152_p12), %s396_s13, 256  }
  0x49   : > { %3951 = vsyncadd (%p4152_p12), %s396_s13, 4294967040 }
  0x4a   : > { %3953 = dma.done.wait (%p50_p1), [#allocation6], 16448  }
  0x4b   : > { %3955 = vsyncadd (%p50_p1), [#allocation6], 4294950848 }
  0x4c   : > { %3957 = dma.done.wait (%p50_p1), [#allocation9], 65664  }
  0x4d   : > { %3959 = vsyncadd (%p50_p1), [#allocation9], 4294901632 }
  0x4e   : > { %3961 = dma.done.wait (%p50_p1), [#allocation12], 65600  }
  0x4f   : > { %3963 = vsyncadd (%p50_p1), [#allocation12], 4294901696 }
  0x50   : > { %3965 = dma.done.wait (%p50_p1), [#allocation15], 8208  }
  0x51   : > { %3967 = vsyncadd (%p50_p1), [#allocation15], 4294959088  ;;  %v535_v0 = vld [vmem:[#allocation5 + $0x1e0] sm:$0xff]  ;;  %v536_v1 = vld [vmem:[#allocation5 + $0x1e8] sm:$0xff]  ;;  %s3475_s2 = sshll.u32 %s4190_s21, 3  ;;  %s3477_s4 = sshll.u32 %s4076_s16, 3 }
  0x52   : > { %v531_v2 = vld [vmem:[#allocation5 + $0x1c0] sm:$0xff]  ;;  %1706 = vmatpush.msra.mxu0 %v535_v0  ;;  %1746 = vmatpush.msra.mxu2 %v536_v1  ;;  %v532_v4 = vld [vmem:[#allocation5 + $0x1c8] sm:$0xff]  ;;  %v537_v63 = vld [vmem:[#allocation5 + $0x1f0] sm:$0xff]  ;;  %s3300_s14 = scalar_lea.hbm %s4385_s9, %s3477_s4  ;;  %s474_s26 = scalar_lea.vmem [#allocation17], %s3475_s2 }
  0x53   : > { %v599_v3 = vld [vmem:[#allocation5 + $0x3e0] sm:$0xff]  ;;  %v600_v5 = vld [vmem:[#allocation5 + $0x3e8] sm:$0xff]  ;;  %v538_v0 = vld [vmem:[#allocation5 + $0x1f8] sm:$0xff]  ;;  %s3302_s1 = sshll.u32 %s474_s26, 4  ;;  %s3304_s27 = sshll.u32 %s3300_s14, 4  ;;  %s3303_s1 = int_to_ptr.vmem [resolvable:$true] %s3302_s1  ;;  %s3305_s27 = int_to_ptr.hbm [resolvable:$true] %s3304_s27 }
  0x54   : > { %1726 = vmatpush.msra.mxu1 %v599_v3  ;;  %1766 = vmatpush.msra.mxu3 %v600_v5  ;;  %v527_v6 = vld [vmem:[#allocation5 + $0x1a0] sm:$0xff]  ;;  %v528_v8 = vld [vmem:[#allocation5 + $0x1a8] sm:$0xff]  ;;  %v601_v5 = vld [vmem:[#allocation5 + $0x3f0] sm:$0xff]  ;;  %s3290_s22 = scalar_lea.sflag [#allocation4], %s4190_s21  ;;  %s3918_s25 = sshra.s32 %s3305_s27, 4  ;;  %s3919_s25 = int_to_ptr.hbm [resolvable:$true] %s3918_s25 }
  0x55   : > { %v595_v7 = vld [vmem:[#allocation5 + $0x3c0] sm:$0xff]  ;;  %1707 = vmatpush.msra.mxu0 %v531_v2  ;;  %1747 = vmatpush.msra.mxu2 %v532_v4  ;;  %v596_v9 = vld [vmem:[#allocation5 + $0x3c8] sm:$0xff]  ;;  %v533_v4 = vld [vmem:[#allocation5 + $0x1d0] sm:$0xff]  ;;  %s3920_s28 = scalar_lea.hbm %s3919_s25, 8  ;;  %s3924_s29 = scalar_lea.hbm %s4385_s9, 16 }
  0x56   : > { %v591_v10 = vld [vmem:[#allocation5 + $0x3a0] sm:$0xff]  ;;  %1727 = vmatpush.msra.mxu1 %v595_v7  ;;  %1767 = vmatpush.msra.mxu3 %v596_v9  ;;  %v524_v12 = vld [vmem:[#allocation5 + $0x188] sm:$0xff]  ;;  %v602_v7 = vld [vmem:[#allocation5 + $0x3f8] sm:$0xff]  ;;  %p3921_p1 = scmp.ne.s32.totalorder %s3919_s25, %s3920_s28  ;;  %p3925_p12 = scmp.lt.s32.totalorder %s3919_s25, %s4385_s9 }
  0x57   : > { %v523_v11 = vld [vmem:[#allocation5 + $0x180] sm:$0xff]  ;;  %v592_v13 = vld [vmem:[#allocation5 + $0x3a8] sm:$0xff]  ;;  %1708 = vmatpush.msra.mxu0 %v527_v6  ;;  %1748 = vmatpush.msra.mxu2 %v528_v8  ;;  %v534_v6 = vld [vmem:[#allocation5 + $0x1d8] sm:$0xff]  ;;  %p3926_p7 = scmp.lt.s32.totalorder %s3924_s29, %s3920_s28 }
  0x58   : > { %v587_v14 = vld [vmem:[#allocation5 + $0x380] sm:$0xff]  ;;  %v588_v15 = vld [vmem:[#allocation5 + $0x388] sm:$0xff]  ;;  %1728 = vmatpush.msra.mxu1 %v591_v10  ;;  %1768 = vmatpush.msra.mxu3 %v592_v13  ;;  %v529_v8 = vld [vmem:[#allocation5 + $0x1b0] sm:$0xff]  ;;  %p3922_p3 = pnand %p3921_p1, %p4159_p4 }
  0x59   : > { %v519_v16 = vld [vmem:[#allocation5 + $0x160] sm:$0xff]  ;;  %v520_v17 = vld [vmem:[#allocation5 + $0x168] sm:$0xff]  ;;  %1709 = vmatpush.msra.mxu0 %v523_v11  ;;  %1749 = vmatpush.msra.mxu2 %v524_v12  ;;  %v597_v9 = vld [vmem:[#allocation5 + $0x3d0] sm:$0xff]  ;;  %p3927_p8 = por %p3926_p7, %p3925_p12 }
  0x5a   : > { %v583_v18 = vld [vmem:[#allocation5 + $0x360] sm:$0xff]  ;;  %v584_v19 = vld [vmem:[#allocation5 + $0x368] sm:$0xff]  ;;  %1729 = vmatpush.msra.mxu1 %v587_v14  ;;  %1769 = vmatpush.msra.mxu3 %v588_v15  ;;  %v530_v10 = vld [vmem:[#allocation5 + $0x1b8] sm:$0xff]  ;;  %p3923_p5 = pneg %p3922_p3 }
  0x5b   : > { %v515_v20 = vld [vmem:[#allocation5 + $0x140] sm:$0xff]  ;;  %v516_v21 = vld [vmem:[#allocation5 + $0x148] sm:$0xff]  ;;  %1710 = vmatpush.msra.mxu0 %v519_v16  ;;  %1750 = vmatpush.msra.mxu2 %v520_v17  ;;  %v598_v11 = vld [vmem:[#allocation5 + $0x3d8] sm:$0xff] }
  0x5c   : > { %v579_v22 = vld [vmem:[#allocation5 + $0x340] sm:$0xff]  ;;  %v580_v23 = vld [vmem:[#allocation5 + $0x348] sm:$0xff]  ;;  %1730 = vmatpush.msra.mxu1 %v583_v18  ;;  %1770 = vmatpush.msra.mxu3 %v584_v19  ;;  %v525_v12 = vld [vmem:[#allocation5 + $0x190] sm:$0xff]  ;;  %p3928_p9 = pnand %p3927_p8, %p3923_p5 }
  0x5d   : > { %v511_v24 = vld [vmem:[#allocation5 + $0x120] sm:$0xff]  ;;  %v512_v25 = vld [vmem:[#allocation5 + $0x128] sm:$0xff]  ;;  %1711 = vmatpush.msra.mxu0 %v515_v20  ;;  %1751 = vmatpush.msra.mxu2 %v516_v21  ;;  %v593_v13 = vld [vmem:[#allocation5 + $0x3b0] sm:$0xff] }
  0x5e   : > { %v575_v26 = vld [vmem:[#allocation5 + $0x320] sm:$0xff]  ;;  %v576_v27 = vld [vmem:[#allocation5 + $0x328] sm:$0xff]  ;;  %1731 = vmatpush.msra.mxu1 %v579_v22  ;;  %1771 = vmatpush.msra.mxu3 %v580_v23  ;;  %v526_v14 = vld [vmem:[#allocation5 + $0x198] sm:$0xff] }
  0x5f   : > { %v507_v28 = vld [vmem:[#allocation5 + $0x100] sm:$0xff]  ;;  %v508_v29 = vld [vmem:[#allocation5 + $0x108] sm:$0xff]  ;;  %1712 = vmatpush.msra.mxu0 %v511_v24  ;;  %1752 = vmatpush.msra.mxu2 %v512_v25  ;;  %v594_v15 = vld [vmem:[#allocation5 + $0x3b8] sm:$0xff] }
  0x60   : > { %v571_v30 = vld [vmem:[#allocation5 + $0x300] sm:$0xff]  ;;  %v572_v31 = vld [vmem:[#allocation5 + $0x308] sm:$0xff]  ;;  %1732 = vmatpush.msra.mxu1 %v575_v26  ;;  %1772 = vmatpush.msra.mxu3 %v576_v27  ;;  %v521_v16 = vld [vmem:[#allocation5 + $0x170] sm:$0xff] }
  0x61   : > { %v503_v32 = vld [vmem:[#allocation5 + $0xe0] sm:$0xff]  ;;  %v504_v33 = vld [vmem:[#allocation5 + $0xe8] sm:$0xff]  ;;  %1713 = vmatpush.msra.mxu0 %v507_v28  ;;  %1753 = vmatpush.msra.mxu2 %v508_v29  ;;  %v589_v17 = vld [vmem:[#allocation5 + $0x390] sm:$0xff] }
  0x62   : > { %v567_v34 = vld [vmem:[#allocation5 + $0x2e0] sm:$0xff]  ;;  %v568_v35 = vld [vmem:[#allocation5 + $0x2e8] sm:$0xff]  ;;  %1733 = vmatpush.msra.mxu1 %v571_v30  ;;  %1773 = vmatpush.msra.mxu3 %v572_v31  ;;  %v522_v18 = vld [vmem:[#allocation5 + $0x178] sm:$0xff] }
  0x63   : > { %v499_v36 = vld [vmem:[#allocation5 + $0xc0] sm:$0xff]  ;;  %v500_v37 = vld [vmem:[#allocation5 + $0xc8] sm:$0xff]  ;;  %1714 = vmatpush.msra.mxu0 %v503_v32  ;;  %1754 = vmatpush.msra.mxu2 %v504_v33  ;;  %v590_v19 = vld [vmem:[#allocation5 + $0x398] sm:$0xff] }
  0x64   : > { %v563_v38 = vld [vmem:[#allocation5 + $0x2c0] sm:$0xff]  ;;  %v564_v39 = vld [vmem:[#allocation5 + $0x2c8] sm:$0xff]  ;;  %1734 = vmatpush.msra.mxu1 %v567_v34  ;;  %1774 = vmatpush.msra.mxu3 %v568_v35  ;;  %v517_v20 = vld [vmem:[#allocation5 + $0x150] sm:$0xff] }
  0x65   : > { %v495_v40 = vld [vmem:[#allocation5 + $0xa0] sm:$0xff]  ;;  %v496_v41 = vld [vmem:[#allocation5 + $0xa8] sm:$0xff]  ;;  %1715 = vmatpush.msra.mxu0 %v499_v36  ;;  %1755 = vmatpush.msra.mxu2 %v500_v37  ;;  %v585_v21 = vld [vmem:[#allocation5 + $0x370] sm:$0xff] }
  0x66   : > { %v559_v42 = vld [vmem:[#allocation5 + $0x2a0] sm:$0xff]  ;;  %v560_v43 = vld [vmem:[#allocation5 + $0x2a8] sm:$0xff]  ;;  %1735 = vmatpush.msra.mxu1 %v563_v38  ;;  %1775 = vmatpush.msra.mxu3 %v564_v39  ;;  %v518_v22 = vld [vmem:[#allocation5 + $0x158] sm:$0xff] }
  0x67   : > { %v491_v44 = vld [vmem:[#allocation5 + $0x80] sm:$0xff]  ;;  %v492_v45 = vld [vmem:[#allocation5 + $0x88] sm:$0xff]  ;;  %1716 = vmatpush.msra.mxu0 %v495_v40  ;;  %1756 = vmatpush.msra.mxu2 %v496_v41  ;;  %v586_v23 = vld [vmem:[#allocation5 + $0x378] sm:$0xff] }
  0x68   : > { %v555_v46 = vld [vmem:[#allocation5 + $0x280] sm:$0xff]  ;;  %v556_v47 = vld [vmem:[#allocation5 + $0x288] sm:$0xff]  ;;  %1736 = vmatpush.msra.mxu1 %v559_v42  ;;  %1776 = vmatpush.msra.mxu3 %v560_v43  ;;  %v513_v24 = vld [vmem:[#allocation5 + $0x130] sm:$0xff] }
  0x69   : > { %v487_v48 = vld [vmem:[#allocation5 + $0x60] sm:$0xff]  ;;  %v488_v49 = vld [vmem:[#allocation5 + $0x68] sm:$0xff]  ;;  %1717 = vmatpush.msra.mxu0 %v491_v44  ;;  %1757 = vmatpush.msra.mxu2 %v492_v45  ;;  %v581_v25 = vld [vmem:[#allocation5 + $0x350] sm:$0xff] }
  0x6a   : > { %v551_v50 = vld [vmem:[#allocation5 + $0x260] sm:$0xff]  ;;  %v552_v51 = vld [vmem:[#allocation5 + $0x268] sm:$0xff]  ;;  %1737 = vmatpush.msra.mxu1 %v555_v46  ;;  %1777 = vmatpush.msra.mxu3 %v556_v47  ;;  %v514_v26 = vld [vmem:[#allocation5 + $0x138] sm:$0xff] }
  0x6b   : > { %v483_v52 = vld [vmem:[#allocation5 + $0x40] sm:$0xff]  ;;  %v484_v53 = vld [vmem:[#allocation5 + $0x48] sm:$0xff]  ;;  %1718 = vmatpush.msra.mxu0 %v487_v48  ;;  %1758 = vmatpush.msra.mxu2 %v488_v49  ;;  %v582_v27 = vld [vmem:[#allocation5 + $0x358] sm:$0xff] }
  0x6c   : > { %v547_v54 = vld [vmem:[#allocation5 + $0x240] sm:$0xff]  ;;  %v548_v55 = vld [vmem:[#allocation5 + $0x248] sm:$0xff]  ;;  %1738 = vmatpush.msra.mxu1 %v551_v50  ;;  %1778 = vmatpush.msra.mxu3 %v552_v51  ;;  %v509_v28 = vld [vmem:[#allocation5 + $0x110] sm:$0xff] }
  0x6d   : > { %v479_v56 = vld [vmem:[#allocation5 + $0x20] sm:$0xff]  ;;  %v480_v57 = vld [vmem:[#allocation5 + $0x28] sm:$0xff]  ;;  %1719 = vmatpush.msra.mxu0 %v483_v52  ;;  %1759 = vmatpush.msra.mxu2 %v484_v53  ;;  %v577_v29 = vld [vmem:[#allocation5 + $0x330] sm:$0xff] }
  0x6e   : > { %v543_v58 = vld [vmem:[#allocation5 + $0x220] sm:$0xff]  ;;  %v544_v59 = vld [vmem:[#allocation5 + $0x228] sm:$0xff]  ;;  %1739 = vmatpush.msra.mxu1 %v547_v54  ;;  %1779 = vmatpush.msra.mxu3 %v548_v55  ;;  %v510_v30 = vld [vmem:[#allocation5 + $0x118] sm:$0xff] }
  0x6f   : > { %v475_v60 = vld [vmem:[#allocation5] sm:$0xff]  ;;  %v476_v61 = vld [vmem:[#allocation5 + $0x8] sm:$0xff]  ;;  %1720 = vmatpush.msra.mxu0 %v479_v56  ;;  %1760 = vmatpush.msra.mxu2 %v480_v57  ;;  %v578_v31 = vld [vmem:[#allocation5 + $0x338] sm:$0xff] }
  0x70   : > { %v4217_v62 = vld [vmem:[%s4194_s19] sm:$0xff]  ;;  %1740 = vmatpush.msra.mxu1 %v543_v58  ;;  %1780 = vmatpush.msra.mxu3 %v544_v59  ;;  %v540_v2 = vld [vmem:[#allocation5 + $0x208] sm:$0xff]  ;;  %v506_v34 = vld [vmem:[#allocation5 + $0xf8] sm:$0xff] }
  0x71   : > { %1721 = vmatpush.msra.mxu0 %v475_v60  ;;  %1761 = vmatpush.msra.mxu2 %v476_v61  ;;  %v539_v1 = vld [vmem:[#allocation5 + $0x200] sm:$0xff]  ;;  %v4222_v3 = vld [vmem:[%s4194_s19 + $0x8] sm:$0xff]  ;;  %v505_v32 = vld [vmem:[#allocation5 + $0xf0] sm:$0xff] }
  0x72   : > { %1722 = vmatmul.f32.vlgmr.msra.gmra.mxu0 %v4217_v62  ;;  %1762 = vmatmul.f32.vlgmr.msra.gmra.mxu2 %v4217_v62  ;;  %v573_v33 = vld [vmem:[#allocation5 + $0x310] sm:$0xff]  ;;  %v574_v35 = vld [vmem:[#allocation5 + $0x318] sm:$0xff] }
  0x73   : > { %1786 = vmatpush.msrb.mxu0 %v537_v63  ;;  %1826 = vmatpush.msrb.mxu2 %v538_v0  ;;  %v501_v36 = vld [vmem:[#allocation5 + $0xd0] sm:$0xff]  ;;  %v502_v38 = vld [vmem:[#allocation5 + $0xd8] sm:$0xff] }
  0x74   : > { %1741 = vmatpush.msra.mxu1 %v539_v1  ;;  %1781 = vmatpush.msra.mxu3 %v540_v2  ;;  %v569_v37 = vld [vmem:[#allocation5 + $0x2f0] sm:$0xff]  ;;  %v570_v39 = vld [vmem:[#allocation5 + $0x2f8] sm:$0xff] }
  0x75   : > { %1742 = vmatmul.f32.vlgmr.msra.gmra.mxu1 %v4222_v3  ;;  %1782 = vmatmul.f32.vlgmr.msra.gmra.mxu3 %v4222_v3  ;;  %v497_v40 = vld [vmem:[#allocation5 + $0xb0] sm:$0xff]  ;;  %v498_v42 = vld [vmem:[#allocation5 + $0xb8] sm:$0xff] }
  0x76   : > { %1787 = vmatpush.msrb.mxu0 %v533_v4  ;;  %1806 = vmatpush.msrb.mxu1 %v601_v5  ;;  %v565_v41 = vld [vmem:[#allocation5 + $0x2d0] sm:$0xff]  ;;  %v566_v43 = vld [vmem:[#allocation5 + $0x2d8] sm:$0xff]  ;;  %v723_v4 = vld [vmem:[#allocation8 + $0x3c0] sm:$0xff] }
  0x77   : > { %1827 = vmatpush.msrb.mxu2 %v534_v6  ;;  %1846 = vmatpush.msrb.mxu3 %v602_v7  ;;  %v493_v44 = vld [vmem:[#allocation5 + $0x90] sm:$0xff]  ;;  %v494_v46 = vld [vmem:[#allocation5 + $0x98] sm:$0xff]  ;;  %v851_v5 = vld [vmem:[#allocation8 + $0x7c0] sm:$0xff] }
  0x78   : > { %1788 = vmatpush.msrb.mxu0 %v529_v8  ;;  %1807 = vmatpush.msrb.mxu1 %v597_v9  ;;  %v561_v45 = vld [vmem:[#allocation5 + $0x2b0] sm:$0xff]  ;;  %v562_v47 = vld [vmem:[#allocation5 + $0x2b8] sm:$0xff]  ;;  %v979_v6 = vld [vmem:[#allocation8 + $0xbc0] sm:$0xff] }
  0x79   : > { %1828 = vmatpush.msrb.mxu2 %v530_v10  ;;  %1847 = vmatpush.msrb.mxu3 %v598_v11  ;;  %v489_v48 = vld [vmem:[#allocation5 + $0x70] sm:$0xff]  ;;  %v490_v50 = vld [vmem:[#allocation5 + $0x78] sm:$0xff]  ;;  %v715_v7 = vld [vmem:[#allocation8 + $0x380] sm:$0xff] }
  0x7a   : > { %1789 = vmatpush.msrb.mxu0 %v525_v12  ;;  %1808 = vmatpush.msrb.mxu1 %v593_v13  ;;  %v557_v49 = vld [vmem:[#allocation5 + $0x290] sm:$0xff]  ;;  %v558_v51 = vld [vmem:[#allocation5 + $0x298] sm:$0xff]  ;;  %v843_v8 = vld [vmem:[#allocation8 + $0x780] sm:$0xff] }
  0x7b   : > { %1829 = vmatpush.msrb.mxu2 %v526_v14  ;;  %1848 = vmatpush.msrb.mxu3 %v594_v15  ;;  %v485_v52 = vld [vmem:[#allocation5 + $0x50] sm:$0xff]  ;;  %v486_v54 = vld [vmem:[#allocation5 + $0x58] sm:$0xff]  ;;  %v971_v9 = vld [vmem:[#allocation8 + $0xb80] sm:$0xff] }
  0x7c   : > { %1790 = vmatpush.msrb.mxu0 %v521_v16  ;;  %1809 = vmatpush.msrb.mxu1 %v589_v17  ;;  %v553_v53 = vld [vmem:[#allocation5 + $0x270] sm:$0xff]  ;;  %v554_v55 = vld [vmem:[#allocation5 + $0x278] sm:$0xff]  ;;  %v707_v10 = vld [vmem:[#allocation8 + $0x340] sm:$0xff] }
  0x7d   : > { %1830 = vmatpush.msrb.mxu2 %v522_v18  ;;  %1849 = vmatpush.msrb.mxu3 %v590_v19  ;;  %v481_v56 = vld [vmem:[#allocation5 + $0x30] sm:$0xff]  ;;  %v482_v58 = vld [vmem:[#allocation5 + $0x38] sm:$0xff]  ;;  %v835_v11 = vld [vmem:[#allocation8 + $0x740] sm:$0xff] }
  0x7e   : > { %1791 = vmatpush.msrb.mxu0 %v517_v20  ;;  %1810 = vmatpush.msrb.mxu1 %v585_v21  ;;  %v549_v57 = vld [vmem:[#allocation5 + $0x250] sm:$0xff]  ;;  %v550_v59 = vld [vmem:[#allocation5 + $0x258] sm:$0xff]  ;;  %v699_v12 = vld [vmem:[#allocation8 + $0x300] sm:$0xff] }
  0x7f   : > { %1831 = vmatpush.msrb.mxu2 %v518_v22  ;;  %1850 = vmatpush.msrb.mxu3 %v586_v23  ;;  %v477_v60 = vld [vmem:[#allocation5 + $0x10] sm:$0xff]  ;;  %v478_v63 = vld [vmem:[#allocation5 + $0x18] sm:$0xff]  ;;  %v827_v13 = vld [vmem:[#allocation8 + $0x700] sm:$0xff] }
  0x80   : > { %1792 = vmatpush.msrb.mxu0 %v513_v24  ;;  %1811 = vmatpush.msrb.mxu1 %v581_v25  ;;  %v545_v61 = vld [vmem:[#allocation5 + $0x230] sm:$0xff]  ;;  %v546_v0 = vld [vmem:[#allocation5 + $0x238] sm:$0xff]  ;;  %v1107_v14 = vld [vmem:[#allocation8 + $0xfc0] sm:$0xff] }
  0x81   : > { %1832 = vmatpush.msrb.mxu2 %v514_v26  ;;  %1851 = vmatpush.msrb.mxu3 %v582_v27  ;;  %v541_v1 = vld [vmem:[#allocation5 + $0x210] sm:$0xff]  ;;  %v542_v2 = vld [vmem:[#allocation5 + $0x218] sm:$0xff]  ;;  %v955_v15 = vld [vmem:[#allocation8 + $0xb00] sm:$0xff] }
  0x82   : > { %1793 = vmatpush.msrb.mxu0 %v509_v28  ;;  %1812 = vmatpush.msrb.mxu1 %v577_v29  ;;  %v691_v16 = vld [vmem:[#allocation8 + $0x2c0] sm:$0xff] }
  0x83   : > { %1833 = vmatpush.msrb.mxu2 %v510_v30  ;;  %1852 = vmatpush.msrb.mxu3 %v578_v31  ;;  %v1099_v17 = vld [vmem:[#allocation8 + $0xf80] sm:$0xff] }
  0x84   : > { %1794 = vmatpush.msrb.mxu0 %v505_v32  ;;  %1813 = vmatpush.msrb.mxu1 %v573_v33  ;;  %v947_v18 = vld [vmem:[#allocation8 + $0xac0] sm:$0xff] }
  0x85   : > { %1834 = vmatpush.msrb.mxu2 %v506_v34  ;;  %1853 = vmatpush.msrb.mxu3 %v574_v35  ;;  %v683_v19 = vld [vmem:[#allocation8 + $0x280] sm:$0xff] }
  0x86   : > { %1795 = vmatpush.msrb.mxu0 %v501_v36  ;;  %1814 = vmatpush.msrb.mxu1 %v569_v37  ;;  %v811_v20 = vld [vmem:[#allocation8 + $0x680] sm:$0xff] }
  0x87   : > { %1835 = vmatpush.msrb.mxu2 %v502_v38  ;;  %1854 = vmatpush.msrb.mxu3 %v570_v39  ;;  %v1091_v21 = vld [vmem:[#allocation8 + $0xf40] sm:$0xff] }
  0x88   : > { %1796 = vmatpush.msrb.mxu0 %v497_v40  ;;  %1815 = vmatpush.msrb.mxu1 %v565_v41  ;;  %v939_v22 = vld [vmem:[#allocation8 + $0xa80] sm:$0xff] }
  0x89   : > { %1836 = vmatpush.msrb.mxu2 %v498_v42  ;;  %1855 = vmatpush.msrb.mxu3 %v566_v43  ;;  %v675_v23 = vld [vmem:[#allocation8 + $0x240] sm:$0xff] }
  0x8a   : > { %1797 = vmatpush.msrb.mxu0 %v493_v44  ;;  %1816 = vmatpush.msrb.mxu1 %v561_v45  ;;  %v803_v24 = vld [vmem:[#allocation8 + $0x640] sm:$0xff] }
  0x8b   : > { %1837 = vmatpush.msrb.mxu2 %v494_v46  ;;  %1856 = vmatpush.msrb.mxu3 %v562_v47  ;;  %v1083_v25 = vld [vmem:[#allocation8 + $0xf00] sm:$0xff] }
  0x8c   : > { %1798 = vmatpush.msrb.mxu0 %v489_v48  ;;  %1817 = vmatpush.msrb.mxu1 %v557_v49  ;;  %v931_v26 = vld [vmem:[#allocation8 + $0xa40] sm:$0xff] }
  0x8d   : > { %1838 = vmatpush.msrb.mxu2 %v490_v50  ;;  %1857 = vmatpush.msrb.mxu3 %v558_v51  ;;  %v667_v27 = vld [vmem:[#allocation8 + $0x200] sm:$0xff] }
  0x8e   : > { %1799 = vmatpush.msrb.mxu0 %v485_v52  ;;  %1818 = vmatpush.msrb.mxu1 %v553_v53  ;;  %v795_v28 = vld [vmem:[#allocation8 + $0x600] sm:$0xff] }
  0x8f   : > { %1839 = vmatpush.msrb.mxu2 %v486_v54  ;;  %1858 = vmatpush.msrb.mxu3 %v554_v55  ;;  %v1075_v29 = vld [vmem:[#allocation8 + $0xec0] sm:$0xff]  ;;  %v724_v55 = vld [vmem:[#allocation8 + $0x3c8] sm:$0xff] }
  0x90   : > { %1800 = vmatpush.msrb.mxu0 %v481_v56  ;;  %1819 = vmatpush.msrb.mxu1 %v549_v57  ;;  %v923_v30 = vld [vmem:[#allocation8 + $0xa00] sm:$0xff]  ;;  %v852_v56 = vld [vmem:[#allocation8 + $0x7c8] sm:$0xff] }
  0x91   : > { %1840 = vmatpush.msrb.mxu2 %v482_v58  ;;  %1859 = vmatpush.msrb.mxu3 %v550_v59  ;;  %v659_v31 = vld [vmem:[#allocation8 + $0x1c0] sm:$0xff]  ;;  %v716_v57 = vld [vmem:[#allocation8 + $0x388] sm:$0xff] }
  0x92   : > { %1801 = vmatpush.msrb.mxu0 %v477_v60  ;;  %1820 = vmatpush.msrb.mxu1 %v545_v61  ;;  %v787_v32 = vld [vmem:[#allocation8 + $0x5c0] sm:$0xff]  ;;  %v844_v58 = vld [vmem:[#allocation8 + $0x788] sm:$0xff] }
  0x93   : > { %1841 = vmatpush.msrb.mxu2 %v478_v63  ;;  %1860 = vmatpush.msrb.mxu3 %v546_v0  ;;  %v1067_v33 = vld [vmem:[#allocation8 + $0xe80] sm:$0xff]  ;;  %v708_v59 = vld [vmem:[#allocation8 + $0x348] sm:$0xff] }
  0x94   : > { %1802 = vmatmul.f32.vlgmr.msrb.gmra.mxu0 %v4217_v62  ;;  %1842 = vmatmul.f32.vlgmr.msrb.gmra.mxu2 %v4217_v62  ;;  %v963_v62 = vld [vmem:[#allocation8 + $0xb40] sm:$0xff]  ;;  %v836_v60 = vld [vmem:[#allocation8 + $0x748] sm:$0xff] }
  0x95   : > { %1821 = vmatpush.msrb.mxu1 %v541_v1  ;;  %1861 = vmatpush.msrb.mxu3 %v542_v2  ;;  %v915_v34 = vld [vmem:[#allocation8 + $0x9c0] sm:$0xff]  ;;  %v700_v61 = vld [vmem:[#allocation8 + $0x308] sm:$0xff] }
  0x96   : > { %1822 = vmatmul.f32.vlgmr.msrb.gmra.mxu1 %v4222_v3  ;;  %1862 = vmatmul.f32.vlgmr.msrb.gmra.mxu3 %v4222_v3  ;;  %v819_v3 = vld [vmem:[#allocation8 + $0x6c0] sm:$0xff]  ;;  %v828_v63 = vld [vmem:[#allocation8 + $0x708] sm:$0xff] }
  0x97   : > { %1895 = vmatpush.msra.mxu0 %v723_v4  ;;  %1915 = vmatpush.msra.mxu1 %v851_v5  ;;  %v651_v35 = vld [vmem:[#allocation8 + $0x180] sm:$0xff]  ;;  %v692_v0 = vld [vmem:[#allocation8 + $0x2c8] sm:$0xff] }
  0x98   : > { %1935 = vmatpush.msra.mxu2 %v979_v6  ;;  %1955 = vmatpush.msra.mxu3 %v1107_v14  ;;  %v779_v36 = vld [vmem:[#allocation8 + $0x580] sm:$0xff]  ;;  %v820_v1 = vld [vmem:[#allocation8 + $0x6c8] sm:$0xff] }
  0x99   : > { %1896 = vmatpush.msra.mxu0 %v715_v7  ;;  %1916 = vmatpush.msra.mxu1 %v843_v8  ;;  %v1059_v37 = vld [vmem:[#allocation8 + $0xe40] sm:$0xff]  ;;  %v684_v2 = vld [vmem:[#allocation8 + $0x288] sm:$0xff] }
  0x9a   : > { %1936 = vmatpush.msra.mxu2 %v971_v9  ;;  %1956 = vmatpush.msra.mxu3 %v1099_v17  ;;  %v907_v38 = vld [vmem:[#allocation8 + $0x980] sm:$0xff]  ;;  %v812_v4 = vld [vmem:[#allocation8 + $0x688] sm:$0xff] }
  0x9b   : > { %1897 = vmatpush.msra.mxu0 %v707_v10  ;;  %1917 = vmatpush.msra.mxu1 %v835_v11  ;;  %v643_v39 = vld [vmem:[#allocation8 + $0x140] sm:$0xff]  ;;  %v676_v5 = vld [vmem:[#allocation8 + $0x248] sm:$0xff] }
  0x9c   : > { %1937 = vmatpush.msra.mxu2 %v963_v62  ;;  %1957 = vmatpush.msra.mxu3 %v1091_v21  ;;  %v771_v40 = vld [vmem:[#allocation8 + $0x540] sm:$0xff]  ;;  %v804_v6 = vld [vmem:[#allocation8 + $0x648] sm:$0xff] }
  0x9d   : > { %1898 = vmatpush.msra.mxu0 %v699_v12  ;;  %1918 = vmatpush.msra.mxu1 %v827_v13  ;;  %v1051_v41 = vld [vmem:[#allocation8 + $0xe00] sm:$0xff]  ;;  %v668_v7 = vld [vmem:[#allocation8 + $0x208] sm:$0xff] }
  0x9e   : > { %1938 = vmatpush.msra.mxu2 %v955_v15  ;;  %1958 = vmatpush.msra.mxu3 %v1083_v25  ;;  %v899_v42 = vld [vmem:[#allocation8 + $0x940] sm:$0xff]  ;;  %v796_v8 = vld [vmem:[#allocation8 + $0x608] sm:$0xff] }
  0x9f   : > { %1899 = vmatpush.msra.mxu0 %v691_v16  ;;  %1919 = vmatpush.msra.mxu1 %v819_v3  ;;  %v635_v43 = vld [vmem:[#allocation8 + $0x100] sm:$0xff]  ;;  %v660_v9 = vld [vmem:[#allocation8 + $0x1c8] sm:$0xff] }
  0xa0   : > { %1939 = vmatpush.msra.mxu2 %v947_v18  ;;  %1959 = vmatpush.msra.mxu3 %v1075_v29  ;;  %v763_v44 = vld [vmem:[#allocation8 + $0x500] sm:$0xff]  ;;  %v788_v10 = vld [vmem:[#allocation8 + $0x5c8] sm:$0xff] }
  0xa1   : > { %1900 = vmatpush.msra.mxu0 %v683_v19  ;;  %1920 = vmatpush.msra.mxu1 %v811_v20  ;;  %v1043_v45 = vld [vmem:[#allocation8 + $0xdc0] sm:$0xff]  ;;  %v652_v11 = vld [vmem:[#allocation8 + $0x188] sm:$0xff] }
  0xa2   : > { %1940 = vmatpush.msra.mxu2 %v939_v22  ;;  %1960 = vmatpush.msra.mxu3 %v1067_v33  ;;  %v891_v46 = vld [vmem:[#allocation8 + $0x900] sm:$0xff]  ;;  %v644_v62 = vld [vmem:[#allocation8 + $0x148] sm:$0xff] }
  0xa3   : > { %1901 = vmatpush.msra.mxu0 %v675_v23  ;;  %1921 = vmatpush.msra.mxu1 %v803_v24  ;;  %v627_v47 = vld [vmem:[#allocation8 + $0xc0] sm:$0xff]  ;;  %v636_v12 = vld [vmem:[#allocation8 + $0x108] sm:$0xff] }
  0xa4   : > { %1941 = vmatpush.msra.mxu2 %v931_v26  ;;  %1961 = vmatpush.msra.mxu3 %v1059_v37  ;;  %v755_v48 = vld [vmem:[#allocation8 + $0x4c0] sm:$0xff]  ;;  %v628_v15 = vld [vmem:[#allocation8 + $0xc8] sm:$0xff] }
  0xa5   : > { %1902 = vmatpush.msra.mxu0 %v667_v27  ;;  %1922 = vmatpush.msra.mxu1 %v795_v28  ;;  %v619_v49 = vld [vmem:[#allocation8 + $0x80] sm:$0xff]  ;;  %v780_v16 = vld [vmem:[#allocation8 + $0x588] sm:$0xff] }
  0xa6   : > { %1942 = vmatpush.msra.mxu2 %v923_v30  ;;  %1962 = vmatpush.msra.mxu3 %v1051_v41  ;;  %v747_v50 = vld [vmem:[#allocation8 + $0x480] sm:$0xff]  ;;  %v620_v18 = vld [vmem:[#allocation8 + $0x88] sm:$0xff] }
  0xa7   : > { %1903 = vmatpush.msra.mxu0 %v659_v31  ;;  %1923 = vmatpush.msra.mxu1 %v787_v32  ;;  %v611_v51 = vld [vmem:[#allocation8 + $0x40] sm:$0xff]  ;;  %v772_v19 = vld [vmem:[#allocation8 + $0x548] sm:$0xff] }
  0xa8   : > { %1943 = vmatpush.msra.mxu2 %v915_v34  ;;  %1963 = vmatpush.msra.mxu3 %v1043_v45  ;;  %v739_v52 = vld [vmem:[#allocation8 + $0x440] sm:$0xff]  ;;  %v612_v22 = vld [vmem:[#allocation8 + $0x48] sm:$0xff] }
  0xa9   : > { %1904 = vmatpush.msra.mxu0 %v651_v35  ;;  %1924 = vmatpush.msra.mxu1 %v779_v36  ;;  %v603_v53 = vld [vmem:[#allocation8] sm:$0xff]  ;;  %v764_v23 = vld [vmem:[#allocation8 + $0x508] sm:$0xff] }
  0xaa   : > { %1944 = vmatpush.msra.mxu2 %v907_v38  ;;  %v731_v54 = vld [vmem:[#allocation8 + $0x400] sm:$0xff]  ;;  %v604_v26 = vld [vmem:[#allocation8 + $0x8] sm:$0xff] }
  0xab   : > { %1905 = vmatpush.msra.mxu0 %v643_v39  ;;  %1925 = vmatpush.msra.mxu1 %v771_v40  ;;  %v883_v13 = vld [vmem:[#allocation8 + $0x8c0] sm:$0xff]  ;;  %v756_v27 = vld [vmem:[#allocation8 + $0x4c8] sm:$0xff] }
  0xac   : > { %1945 = vmatpush.msra.mxu2 %v899_v42  ;;  %v1035_v14 = vld [vmem:[#allocation8 + $0xd80] sm:$0xff]  ;;  %v980_v28 = vld [vmem:[#allocation8 + $0xbc8] sm:$0xff] }
  0xad   : > { %1906 = vmatpush.msra.mxu0 %v635_v43  ;;  %1926 = vmatpush.msra.mxu1 %v763_v44  ;;  %v875_v3 = vld [vmem:[#allocation8 + $0x880] sm:$0xff]  ;;  %v748_v30 = vld [vmem:[#allocation8 + $0x488] sm:$0xff] }
  0xae   : > { %1946 = vmatpush.msra.mxu2 %v891_v46  ;;  %1964 = vmatpush.msra.mxu3 %v1035_v14  ;;  %v1027_v17 = vld [vmem:[#allocation8 + $0xd40] sm:$0xff]  ;;  %v972_v31 = vld [vmem:[#allocation8 + $0xb88] sm:$0xff] }
  0xaf   : > { %1907 = vmatpush.msra.mxu0 %v627_v47  ;;  %1927 = vmatpush.msra.mxu1 %v755_v48  ;;  %v867_v20 = vld [vmem:[#allocation8 + $0x840] sm:$0xff]  ;;  %v740_v33 = vld [vmem:[#allocation8 + $0x448] sm:$0xff] }
  0xb0   : > { %1947 = vmatpush.msra.mxu2 %v883_v13  ;;  %1965 = vmatpush.msra.mxu3 %v1027_v17  ;;  %v1019_v21 = vld [vmem:[#allocation8 + $0xd00] sm:$0xff]  ;;  %v964_v34 = vld [vmem:[#allocation8 + $0xb48] sm:$0xff]  ;;  %v717_v13 = vld [vmem:[#allocation8 + $0x390] sm:$0xff] }
  0xb1   : > { %1908 = vmatpush.msra.mxu0 %v619_v49  ;;  %1928 = vmatpush.msra.mxu1 %v747_v50  ;;  %v859_v24 = vld [vmem:[#allocation8 + $0x800] sm:$0xff]  ;;  %v732_v36 = vld [vmem:[#allocation8 + $0x408] sm:$0xff]  ;;  %v4230_v49 = vld [vmem:[#allocation7] sm:$0xf] }
  0xb2   : > { %1948 = vmatpush.msra.mxu2 %v875_v3  ;;  %1966 = vmatpush.msra.mxu3 %v1019_v21  ;;  %v1011_v25 = vld [vmem:[#allocation8 + $0xcc0] sm:$0xff]  ;;  %v956_v37 = vld [vmem:[#allocation8 + $0xb08] sm:$0xff]  ;;  %v701_v17 = vld [vmem:[#allocation8 + $0x310] sm:$0xff] }
  0xb3   : > { %1909 = vmatpush.msra.mxu0 %v611_v51  ;;  %1929 = vmatpush.msra.mxu1 %v739_v52  ;;  %v1003_v29 = vld [vmem:[#allocation8 + $0xc80] sm:$0xff]  ;;  %v1108_v38 = vld [vmem:[#allocation8 + $0xfc8] sm:$0xff]  ;;  %v693_v21 = vld [vmem:[#allocation8 + $0x2d0] sm:$0xff] }
  0xb4   : > { %1949 = vmatpush.msra.mxu2 %v867_v20  ;;  %1967 = vmatpush.msra.mxu3 %v1011_v25  ;;  %v995_v32 = vld [vmem:[#allocation8 + $0xc40] sm:$0xff]  ;;  %v948_v39 = vld [vmem:[#allocation8 + $0xac8] sm:$0xff]  ;;  %v837_v25 = vld [vmem:[#allocation8 + $0x750] sm:$0xff] }
  0xb5   : > { %1910 = vmatpush.msra.mxu0 %v603_v53  ;;  %1930 = vmatpush.msra.mxu1 %v731_v54  ;;  %v987_v35 = vld [vmem:[#allocation8 + $0xc00] sm:$0xff]  ;;  %v1100_v40 = vld [vmem:[#allocation8 + $0xf88] sm:$0xff]  ;;  %v1698_v53 = vperm.slane %v4230_v49, 0 }
  0xb6   : > { %1950 = vmatpush.msra.mxu2 %v859_v24  ;;  %1968 = vmatpush.msra.mxu3 %v1003_v29  ;;  %v1092_v41 = vld [vmem:[#allocation8 + $0xf48] sm:$0xff]  ;;  %v685_v24 = vld [vmem:[#allocation8 + $0x290] sm:$0xff] }
  0xb7   : > { %1975 = vmatpush.msrb.mxu0 %v724_v55  ;;  %1995 = vmatpush.msrb.mxu1 %v852_v56  ;;  %v940_v42 = vld [vmem:[#allocation8 + $0xa88] sm:$0xff]  ;;  %v821_v29 = vld [vmem:[#allocation8 + $0x6d0] sm:$0xff] }
  0xb8   : > { %2015 = vmatpush.msrb.mxu2 %v980_v28  ;;  %1969 = vmatpush.msra.mxu3 %v995_v32  ;;  %v1084_v43 = vld [vmem:[#allocation8 + $0xf08] sm:$0xff]  ;;  %v669_v28 = vld [vmem:[#allocation8 + $0x210] sm:$0xff] }
  0xb9   : > { %1976 = vmatpush.msrb.mxu0 %v716_v57  ;;  %1996 = vmatpush.msrb.mxu1 %v844_v58  ;;  %v932_v44 = vld [vmem:[#allocation8 + $0xa48] sm:$0xff]  ;;  %v653_v32 = vld [vmem:[#allocation8 + $0x190] sm:$0xff] }
  0xba   : > { %2016 = vmatpush.msrb.mxu2 %v972_v31  ;;  %1970 = vmatpush.msra.mxu3 %v987_v35  ;;  %v1076_v45 = vld [vmem:[#allocation8 + $0xec8] sm:$0xff]  ;;  %v813_v31 = vld [vmem:[#allocation8 + $0x690] sm:$0xff] }
  0xbb   : > { %1977 = vmatpush.msrb.mxu0 %v708_v59  ;;  %1997 = vmatpush.msrb.mxu1 %v836_v60  ;;  %v924_v46 = vld [vmem:[#allocation8 + $0xa08] sm:$0xff]  ;;  %v797_v35 = vld [vmem:[#allocation8 + $0x610] sm:$0xff] }
  0xbc   : > { %2017 = vmatpush.msrb.mxu2 %v964_v34  ;;  %2035 = vmatpush.msrb.mxu3 %v1108_v38  ;;  %v1068_v47 = vld [vmem:[#allocation8 + $0xe88] sm:$0xff]  ;;  %v645_v34 = vld [vmem:[#allocation8 + $0x150] sm:$0xff]  ;;  %v1700_v38 = vperm.slane %v4230_v49, 2 }
  0xbd   : > { %1978 = vmatpush.msrb.mxu0 %v700_v61  ;;  %1998 = vmatpush.msrb.mxu1 %v828_v63  ;;  %v916_v48 = vld [vmem:[#allocation8 + $0x9c8] sm:$0xff]  ;;  %v1699_v63 = vperm.slane %v4230_v49, 1 }
  0xbe   : > { %2018 = vmatpush.msrb.mxu2 %v956_v37  ;;  %2036 = vmatpush.msrb.mxu3 %v1100_v40  ;;  %v1060_v50 = vld [vmem:[#allocation8 + $0xe48] sm:$0xff]  ;;  %v789_v37 = vld [vmem:[#allocation8 + $0x5d0] sm:$0xff] }
  0xbf   : > { %1979 = vmatpush.msrb.mxu0 %v692_v0  ;;  %1999 = vmatpush.msrb.mxu1 %v820_v1  ;;  %v908_v51 = vld [vmem:[#allocation8 + $0x988] sm:$0xff]  ;;  %v781_v40 = vld [vmem:[#allocation8 + $0x590] sm:$0xff] }
  0xc0   : > { %2019 = vmatpush.msrb.mxu2 %v948_v39  ;;  %2037 = vmatpush.msrb.mxu3 %v1092_v41  ;;  %v1052_v52 = vld [vmem:[#allocation8 + $0xe08] sm:$0xff]  ;;  %v629_v39 = vld [vmem:[#allocation8 + $0xd0] sm:$0xff] }
  0xc1   : > { %1980 = vmatpush.msrb.mxu0 %v684_v2  ;;  %2000 = vmatpush.msrb.mxu1 %v812_v4  ;;  %v900_v54 = vld [vmem:[#allocation8 + $0x948] sm:$0xff]  ;;  %v621_v41 = vld [vmem:[#allocation8 + $0x90] sm:$0xff] }
  0xc2   : > { %2020 = vmatpush.msrb.mxu2 %v940_v42  ;;  %2038 = vmatpush.msrb.mxu3 %v1084_v43  ;;  %v1044_v55 = vld [vmem:[#allocation8 + $0xdc8] sm:$0xff]  ;;  %v773_v42 = vld [vmem:[#allocation8 + $0x550] sm:$0xff] }
  0xc3   : > { %1981 = vmatpush.msrb.mxu0 %v676_v5  ;;  %2001 = vmatpush.msrb.mxu1 %v804_v6  ;;  %v892_v56 = vld [vmem:[#allocation8 + $0x908] sm:$0xff] }
  0xc4   : > { %2021 = vmatpush.msrb.mxu2 %v932_v44  ;;  %2039 = vmatpush.msrb.mxu3 %v1076_v45  ;;  %v884_v59 = vld [vmem:[#allocation8 + $0x8c8] sm:$0xff]  ;;  %v613_v45 = vld [vmem:[#allocation8 + $0x50] sm:$0xff] }
  0xc5   : > { %1982 = vmatpush.msrb.mxu0 %v668_v7  ;;  %2002 = vmatpush.msrb.mxu1 %v796_v8  ;;  %v1036_v60 = vld [vmem:[#allocation8 + $0xd88] sm:$0xff] }
  0xc6   : > { %2022 = vmatpush.msrb.mxu2 %v924_v46  ;;  %2040 = vmatpush.msrb.mxu3 %v1068_v47  ;;  %v876_v1 = vld [vmem:[#allocation8 + $0x888] sm:$0xff]  ;;  %v765_v46 = vld [vmem:[#allocation8 + $0x510] sm:$0xff] }
  0xc7   : > { %1983 = vmatpush.msrb.mxu0 %v660_v9  ;;  %2003 = vmatpush.msrb.mxu1 %v788_v10  ;;  %v1028_v2 = vld [vmem:[#allocation8 + $0xd48] sm:$0xff]  ;;  %v725_v9 = vld [vmem:[#allocation8 + $0x3d0] sm:$0xff] }
  0xc8   : > { %2023 = vmatpush.msrb.mxu2 %v916_v48  ;;  %2041 = vmatpush.msrb.mxu3 %v1060_v50  ;;  %v868_v6 = vld [vmem:[#allocation8 + $0x848] sm:$0xff]  ;;  %v1701_v50 = vperm.slane %v4230_v49, 3  ;;  %v973_v49 = vld [vmem:[#allocation8 + $0xb90] sm:$0xff] }
  0xc9   : > { %1984 = vmatpush.msrb.mxu0 %v652_v11  ;;  %2004 = vmatpush.msrb.mxu1 %v780_v16  ;;  %v1020_v7 = vld [vmem:[#allocation8 + $0xd08] sm:$0xff] }
  0xca   : > { %2024 = vmatpush.msrb.mxu2 %v908_v51  ;;  %2042 = vmatpush.msrb.mxu3 %v1052_v52  ;;  %v860_v11 = vld [vmem:[#allocation8 + $0x808] sm:$0xff]  ;;  %v605_v51 = vld [vmem:[#allocation8 + $0x10] sm:$0xff] }
  0xcb   : > { %1985 = vmatpush.msrb.mxu0 %v644_v62  ;;  %2005 = vmatpush.msrb.mxu1 %v772_v19  ;;  %v1012_v62 = vld [vmem:[#allocation8 + $0xcc8] sm:$0xff]  ;;  %v757_v52 = vld [vmem:[#allocation8 + $0x4d0] sm:$0xff] }
  0xcc   : > { %2025 = vmatpush.msrb.mxu2 %v900_v54  ;;  %2043 = vmatpush.msrb.mxu3 %v1044_v55  ;;  %v1004_v16 = vld [vmem:[#allocation8 + $0xc88] sm:$0xff]  ;;  %v726_v54 = vld [vmem:[#allocation8 + $0x3d8] sm:$0xff] }
  0xcd   : > { %1986 = vmatpush.msrb.mxu0 %v636_v12  ;;  %2006 = vmatpush.msrb.mxu1 %v764_v23  ;;  %v996_v19 = vld [vmem:[#allocation8 + $0xc48] sm:$0xff] }
  0xce   : > { %2026 = vmatpush.msrb.mxu2 %v892_v56  ;;  %2044 = vmatpush.msrb.mxu3 %v1036_v60  ;;  %v988_v23 = vld [vmem:[#allocation8 + $0xc08] sm:$0xff]  ;;  %v981_v56 = vld [vmem:[#allocation8 + $0xbd0] sm:$0xff]  ;;  %v718_v60 = vld [vmem:[#allocation8 + $0x398] sm:$0xff] }
  0xcf   : > { %1987 = vmatpush.msrb.mxu0 %v628_v15  ;;  %2007 = vmatpush.msrb.mxu1 %v756_v27  ;;  %v709_v15 = vld [vmem:[#allocation8 + $0x350] sm:$0xff] }
  0xd0   : > { %2027 = vmatpush.msrb.mxu2 %v884_v59  ;;  %2045 = vmatpush.msrb.mxu3 %v1028_v2  ;;  %v829_v27 = vld [vmem:[#allocation8 + $0x710] sm:$0xff] }
  0xd1   : > { %1988 = vmatpush.msrb.mxu0 %v620_v18  ;;  %2008 = vmatpush.msrb.mxu1 %v748_v30  ;;  %v853_v18 = vld [vmem:[#allocation8 + $0x7d0] sm:$0xff] }
  0xd2   : > { %2028 = vmatpush.msrb.mxu2 %v876_v1  ;;  %2046 = vmatpush.msrb.mxu3 %v1020_v7  ;;  %v661_v30 = vld [vmem:[#allocation8 + $0x1d0] sm:$0xff]  ;;  %v710_v1 = vld [vmem:[#allocation8 + $0x358] sm:$0xff] }
  0xd3   : > { %1989 = vmatpush.msrb.mxu0 %v612_v22  ;;  %2009 = vmatpush.msrb.mxu1 %v740_v33  ;;  %v845_v22 = vld [vmem:[#allocation8 + $0x790] sm:$0xff] }
  0xd4   : > { %2029 = vmatpush.msrb.mxu2 %v868_v6  ;;  %2047 = vmatpush.msrb.mxu3 %v1012_v62  ;;  %v805_v33 = vld [vmem:[#allocation8 + $0x650] sm:$0xff] }
  0xd5   : > { %1990 = vmatpush.msrb.mxu0 %v604_v26  ;;  %2010 = vmatpush.msrb.mxu1 %v732_v36  ;;  %v677_v26 = vld [vmem:[#allocation8 + $0x250] sm:$0xff] }
  0xd6   : > { %2030 = vmatpush.msrb.mxu2 %v860_v11  ;;  %2048 = vmatpush.msrb.mxu3 %v1004_v16  ;;  %v637_v36 = vld [vmem:[#allocation8 + $0x110] sm:$0xff]  ;;  %v854_v11 = vld [vmem:[#allocation8 + $0x7d8] sm:$0xff] }
  0xd7   : > { %v965_v2 = vld [vmem:[#allocation8 + $0xb50] sm:$0xff] }
  0xd8   : > { %2049 = vmatpush.msrb.mxu3 %v996_v19  ;;  %v957_v6 = vld [vmem:[#allocation8 + $0xb10] sm:$0xff] }
  0xd9   : > { %v1109_v7 = vld [vmem:[#allocation8 + $0xfd0] sm:$0xff] }
  0xda   : > { %2050 = vmatpush.msrb.mxu3 %v988_v23  ;;  %v1101_v62 = vld [vmem:[#allocation8 + $0xf90] sm:$0xff] }
  0xdb   : > { %v941_v16 = vld [vmem:[#allocation8 + $0xa90] sm:$0xff] }
  0xdc   : > { %v933_v19 = vld [vmem:[#allocation8 + $0xa50] sm:$0xff] }
  0xdd   : > { %v925_v23 = vld [vmem:[#allocation8 + $0xa10] sm:$0xff] }
  0xef   : > { %v1723_v57 = vpop.f32.mrf.mxu0 }
  0xf0   : > { %v1724_v58 = vadd.f32 %v1723_v57, %v1698_v53  ;;  %v749_v57 = vld [vmem:[#allocation8 + $0x490] sm:$0xff] }
  0xf2   : > { %v1743_v61 = vpop.f32.mrf.mxu1 }
  0xf3   : > { %v1744_v0 = vadd.f32 %v1743_v61, %v1724_v58 }
  0xf5   : > { %vm1866_vm0 = vcmp.ge.f32.partialorder %v1744_v0, 0.0  ;;  %v1870_v4 = vmul.f32 0.01, %v1744_v0  ;;  %v1763_v5 = vpop.f32.mrf.mxu2 }
  0xf6   : > { %v1764_v8 = vadd.f32 %v1763_v5, %v1699_v63  ;;  %v741_v63 = vld [vmem:[#allocation8 + $0x450] sm:$0xff] }
  0xf7   : > { %v4234_v10 = vsel %vm1866_vm0, %v1744_v0, %v1870_v4  ;;  %v733_v4 = vld [vmem:[#allocation8 + $0x410] sm:$0xff] }
  0xf8   : > { %v1783_v12 = vpop.f32.mrf.mxu3  ;;  %1911 = vmatmul.f32.vlgmr.msra.gmra.mxu0 %v4234_v10 }
  0xf9   : > { %v1784_v14 = vadd.f32 %v1783_v12, %v1764_v8  ;;  %2055 = vmatpush.msra.mxu0 %v725_v9  ;;  %v702_v9 = vld [vmem:[#allocation8 + $0x318] sm:$0xff]  ;;  %v949_v12 = vld [vmem:[#allocation8 + $0xad0] sm:$0xff] }
  0xfb   : > { %vm1867_vm1 = vcmp.ge.f32.partialorder %v1784_v14, 0.0  ;;  %v1871_v3 = vmul.f32 0.01, %v1784_v14  ;;  %2056 = vmatpush.msra.mxu0 %v717_v13  ;;  %v694_v13 = vld [vmem:[#allocation8 + $0x2d8] sm:$0xff] }
  0xfd   : > { %v4237_v20 = vsel %vm1867_vm1, %v1784_v14, %v1871_v3  ;;  %2057 = vmatpush.msra.mxu0 %v709_v15  ;;  %v846_v14 = vld [vmem:[#allocation8 + $0x798] sm:$0xff]  ;;  %v1093_v15 = vld [vmem:[#allocation8 + $0xf50] sm:$0xff] }
  0xfe   : > { %1931 = vmatmul.f32.vlgmr.msra.gmra.mxu1 %v4237_v20  ;;  %v686_v3 = vld [vmem:[#allocation8 + $0x298] sm:$0xff] }
  0xff   : > { %2058 = vmatpush.msra.mxu0 %v701_v17  ;;  %2075 = vmatpush.msra.mxu1 %v853_v18  ;;  %v838_v17 = vld [vmem:[#allocation8 + $0x758] sm:$0xff]  ;;  %v1085_v18 = vld [vmem:[#allocation8 + $0xf10] sm:$0xff] }
 0x100   : > { %1991 = vmatmul.f32.vlgmr.msrb.gmra.mxu0 %v4234_v10 }
 0x101   : > { %2059 = vmatpush.msra.mxu0 %v693_v21  ;;  %2076 = vmatpush.msra.mxu1 %v845_v22  ;;  %v678_v21 = vld [vmem:[#allocation8 + $0x258] sm:$0xff] }
 0x102   : > { %v830_v22 = vld [vmem:[#allocation8 + $0x718] sm:$0xff] }
 0x103   : > { %2060 = vmatpush.msra.mxu0 %v685_v24  ;;  %2077 = vmatpush.msra.mxu1 %v837_v25  ;;  %v1077_v24 = vld [vmem:[#allocation8 + $0xed0] sm:$0xff]  ;;  %v670_v25 = vld [vmem:[#allocation8 + $0x218] sm:$0xff] }
 0x105   : > { %2061 = vmatpush.msra.mxu0 %v677_v26  ;;  %2078 = vmatpush.msra.mxu1 %v829_v27  ;;  %v822_v26 = vld [vmem:[#allocation8 + $0x6d8] sm:$0xff]  ;;  %v917_v27 = vld [vmem:[#allocation8 + $0x9d0] sm:$0xff] }
 0x106   : > { %2011 = vmatmul.f32.vlgmr.msrb.gmra.mxu1 %v4237_v20 }
 0x107   : > { %2062 = vmatpush.msra.mxu0 %v669_v28  ;;  %2079 = vmatpush.msra.mxu1 %v821_v29  ;;  %v1069_v28 = vld [vmem:[#allocation8 + $0xe90] sm:$0xff]  ;;  %v662_v29 = vld [vmem:[#allocation8 + $0x1d8] sm:$0xff] }
 0x109   : > { %2063 = vmatpush.msra.mxu0 %v661_v30  ;;  %2080 = vmatpush.msra.mxu1 %v813_v31  ;;  %v814_v30 = vld [vmem:[#allocation8 + $0x698] sm:$0xff]  ;;  %v909_v31 = vld [vmem:[#allocation8 + $0x990] sm:$0xff] }
 0x10b   : > { %2064 = vmatpush.msra.mxu0 %v653_v32  ;;  %2081 = vmatpush.msra.mxu1 %v805_v33  ;;  %v1061_v32 = vld [vmem:[#allocation8 + $0xe50] sm:$0xff]  ;;  %v654_v33 = vld [vmem:[#allocation8 + $0x198] sm:$0xff] }
 0x10d   : > { %2065 = vmatpush.msra.mxu0 %v645_v34  ;;  %2082 = vmatpush.msra.mxu1 %v797_v35  ;;  %v806_v34 = vld [vmem:[#allocation8 + $0x658] sm:$0xff]  ;;  %v901_v35 = vld [vmem:[#allocation8 + $0x950] sm:$0xff] }
 0x10f   : > { %2066 = vmatpush.msra.mxu0 %v637_v36  ;;  %2083 = vmatpush.msra.mxu1 %v789_v37  ;;  %v1053_v36 = vld [vmem:[#allocation8 + $0xe10] sm:$0xff]  ;;  %v646_v37 = vld [vmem:[#allocation8 + $0x158] sm:$0xff] }
 0x111   : > { %v1803_v43 = vpop.f32.mrf.mxu0  ;;  %2067 = vmatpush.msra.mxu0 %v629_v39  ;;  %2084 = vmatpush.msra.mxu1 %v781_v40  ;;  %v893_v39 = vld [vmem:[#allocation8 + $0x910] sm:$0xff] }
 0x112   : > { %v1804_v44 = vadd.f32 %v1803_v43, %v1700_v38  ;;  %v798_v38 = vld [vmem:[#allocation8 + $0x618] sm:$0xff]  ;;  %v1045_v40 = vld [vmem:[#allocation8 + $0xdd0] sm:$0xff] }
 0x113   : > { %v1823_v47 = vpop.f32.mrf.mxu1  ;;  %2068 = vmatpush.msra.mxu0 %v621_v41  ;;  %2085 = vmatpush.msra.mxu1 %v773_v42  ;;  %v638_v41 = vld [vmem:[#allocation8 + $0x118] sm:$0xff]  ;;  %v885_v43 = vld [vmem:[#allocation8 + $0x8d0] sm:$0xff] }
 0x114   : > { %v1824_v48 = vadd.f32 %v1823_v47, %v1804_v44  ;;  %v790_v42 = vld [vmem:[#allocation8 + $0x5d8] sm:$0xff]  ;;  %v1037_v44 = vld [vmem:[#allocation8 + $0xd90] sm:$0xff] }
 0x115   : > { %2069 = vmatpush.msra.mxu0 %v613_v45  ;;  %2086 = vmatpush.msra.mxu1 %v765_v46  ;;  %v630_v45 = vld [vmem:[#allocation8 + $0xd8] sm:$0xff]  ;;  %v877_v47 = vld [vmem:[#allocation8 + $0x890] sm:$0xff] }
 0x116   : > { %vm1868_vm2 = vcmp.ge.f32.partialorder %v1824_v48, 0.0  ;;  %v1872_v53 = vmul.f32 0.01, %v1824_v48  ;;  %v782_v46 = vld [vmem:[#allocation8 + $0x598] sm:$0xff] }
 0x117   : > { %v1843_v55 = vpop.f32.mrf.mxu2  ;;  %2070 = vmatpush.msra.mxu0 %v605_v51  ;;  %2087 = vmatpush.msra.mxu1 %v757_v52  ;;  %v774_v51 = vld [vmem:[#allocation8 + $0x558] sm:$0xff]  ;;  %v869_v52 = vld [vmem:[#allocation8 + $0x850] sm:$0xff] }
 0x118   : > { %v4244_v58 = vsel %vm1868_vm2, %v1824_v48, %v1872_v53  ;;  %v1844_v59 = vadd.f32 %v1843_v55, %v1701_v50  ;;  %2071 = vmatmul.f32.vlgmr.msra.gmra.mxu0 %v4234_v10  ;;  %v1029_v48 = vld [vmem:[#allocation8 + $0xd50] sm:$0xff]  ;;  %v622_v50 = vld [vmem:[#allocation8 + $0x98] sm:$0xff] }
 0x119   : > { %v1863_v61 = vpop.f32.mrf.mxu3  ;;  %1951 = vmatmul.f32.vlgmr.msra.gmra.mxu2 %v4244_v58  ;;  %2135 = vmatpush.msrb.mxu0 %v726_v54  ;;  %v1021_v53 = vld [vmem:[#allocation8 + $0xd10] sm:$0xff]  ;;  %v614_v54 = vld [vmem:[#allocation8 + $0x58] sm:$0xff] }
 0x11a   : > { %v1864_v0 = vadd.f32 %v1863_v61, %v1844_v59  ;;  %2095 = vmatpush.msra.mxu2 %v981_v56  ;;  %2088 = vmatpush.msra.mxu1 %v749_v57  ;;  %v766_v55 = vld [vmem:[#allocation8 + $0x518] sm:$0xff]  ;;  %v861_v56 = vld [vmem:[#allocation8 + $0x810] sm:$0xff] }
 0x11b   : > { %2136 = vmatpush.msrb.mxu0 %v718_v60  ;;  %v1013_v57 = vld [vmem:[#allocation8 + $0xcd0] sm:$0xff]  ;;  %v606_v59 = vld [vmem:[#allocation8 + $0x18] sm:$0xff] }
 0x11c   : > { %vm1869_vm3 = vcmp.ge.f32.partialorder %v1864_v0, 0.0  ;;  %v1873_v5 = vmul.f32 0.01, %v1864_v0  ;;  %2096 = vmatpush.msra.mxu2 %v973_v49  ;;  %2089 = vmatpush.msra.mxu1 %v741_v63  ;;  %v758_v60 = vld [vmem:[#allocation8 + $0x4d8] sm:$0xff]  ;;  %v727_v49 = vld [vmem:[#allocation8 + $0x3e0] sm:$0xff]  ;;  %v1005_v63 = vld [vmem:[#allocation8 + $0xc90] sm:$0xff] }
 0x11d   : > { %2137 = vmatpush.msrb.mxu0 %v710_v1  ;;  %v982_v61 = vld [vmem:[#allocation8 + $0xbd8] sm:$0xff] }
 0x11e   : > { %v4248_v8 = vsel %vm1869_vm3, %v1864_v0, %v1873_v5  ;;  %2097 = vmatpush.msra.mxu2 %v965_v2  ;;  %2090 = vmatpush.msra.mxu1 %v733_v4  ;;  %v750_v0 = vld [vmem:[#allocation8 + $0x498] sm:$0xff]  ;;  %v719_v2 = vld [vmem:[#allocation8 + $0x3a0] sm:$0xff]  ;;  %v997_v4 = vld [vmem:[#allocation8 + $0xc50] sm:$0xff] }
 0x11f   : > { %1971 = vmatmul.f32.vlgmr.msra.gmra.mxu3 %v4248_v8  ;;  %2091 = vmatmul.f32.vlgmr.msra.gmra.mxu1 %v4237_v20  ;;  %v974_v1 = vld [vmem:[#allocation8 + $0xb98] sm:$0xff] }
 0x120   : > { %2098 = vmatpush.msra.mxu2 %v957_v6  ;;  %2115 = vmatpush.msra.mxu3 %v1109_v7  ;;  %v742_v5 = vld [vmem:[#allocation8 + $0x458] sm:$0xff]  ;;  %v711_v7 = vld [vmem:[#allocation8 + $0x360] sm:$0xff] }
 0x121   : > { %2138 = vmatpush.msrb.mxu0 %v702_v9  ;;  %2155 = vmatpush.msrb.mxu1 %v854_v11  ;;  %v966_v6 = vld [vmem:[#allocation8 + $0xb58] sm:$0xff]  ;;  %v989_v9 = vld [vmem:[#allocation8 + $0xc10] sm:$0xff] }
 0x122   : > { %2031 = vmatmul.f32.vlgmr.msrb.gmra.mxu2 %v4244_v58  ;;  %2116 = vmatpush.msra.mxu3 %v1101_v62  ;;  %v734_v11 = vld [vmem:[#allocation8 + $0x418] sm:$0xff] }
 0x123   : > { %2099 = vmatpush.msra.mxu2 %v949_v12  ;;  %2139 = vmatpush.msrb.mxu0 %v694_v13  ;;  %v958_v62 = vld [vmem:[#allocation8 + $0xb18] sm:$0xff]  ;;  %v703_v13 = vld [vmem:[#allocation8 + $0x320] sm:$0xff] }
 0x124   : > { %2156 = vmatpush.msrb.mxu1 %v846_v14  ;;  %2117 = vmatpush.msra.mxu3 %v1093_v15  ;;  %v1110_v12 = vld [vmem:[#allocation8 + $0xfd8] sm:$0xff]  ;;  %v855_v14 = vld [vmem:[#allocation8 + $0x7e0] sm:$0xff] }
 0x125   : > { %2100 = vmatpush.msra.mxu2 %v941_v16  ;;  %2140 = vmatpush.msrb.mxu0 %v686_v3  ;;  %v950_v15 = vld [vmem:[#allocation8 + $0xad8] sm:$0xff]  ;;  %v695_v3 = vld [vmem:[#allocation8 + $0x2e0] sm:$0xff] }
 0x126   : > { %2157 = vmatpush.msrb.mxu1 %v838_v17  ;;  %2118 = vmatpush.msra.mxu3 %v1085_v18  ;;  %v1102_v16 = vld [vmem:[#allocation8 + $0xf98] sm:$0xff]  ;;  %v847_v17 = vld [vmem:[#allocation8 + $0x7a0] sm:$0xff] }
 0x127   : > { %2101 = vmatpush.msra.mxu2 %v933_v19  ;;  %2141 = vmatpush.msrb.mxu0 %v678_v21  ;;  %v942_v18 = vld [vmem:[#allocation8 + $0xa98] sm:$0xff]  ;;  %v687_v21 = vld [vmem:[#allocation8 + $0x2a0] sm:$0xff] }
 0x128   : > { %2158 = vmatpush.msrb.mxu1 %v830_v22  ;;  %2051 = vmatmul.f32.vlgmr.msrb.gmra.mxu3 %v4248_v8  ;;  %v1094_v19 = vld [vmem:[#allocation8 + $0xf58] sm:$0xff]  ;;  %v839_v22 = vld [vmem:[#allocation8 + $0x760] sm:$0xff] }
 0x129   : > { %2102 = vmatpush.msra.mxu2 %v925_v23  ;;  %2119 = vmatpush.msra.mxu3 %v1077_v24  ;;  %v934_v23 = vld [vmem:[#allocation8 + $0xa58] sm:$0xff] }
 0x12a   : > { %2142 = vmatpush.msrb.mxu0 %v670_v25  ;;  %2159 = vmatpush.msrb.mxu1 %v822_v26  ;;  %v1086_v24 = vld [vmem:[#allocation8 + $0xf18] sm:$0xff]  ;;  %v679_v25 = vld [vmem:[#allocation8 + $0x260] sm:$0xff] }
 0x12b   : > { %2103 = vmatpush.msra.mxu2 %v917_v27  ;;  %2120 = vmatpush.msra.mxu3 %v1069_v28  ;;  %v831_v26 = vld [vmem:[#allocation8 + $0x720] sm:$0xff]  ;;  %v926_v27 = vld [vmem:[#allocation8 + $0xa18] sm:$0xff] }
 0x12c   : > { %2143 = vmatpush.msrb.mxu0 %v662_v29  ;;  %2160 = vmatpush.msrb.mxu1 %v814_v30  ;;  %v1078_v28 = vld [vmem:[#allocation8 + $0xed8] sm:$0xff]  ;;  %v671_v29 = vld [vmem:[#allocation8 + $0x220] sm:$0xff] }
 0x12d   : > { %2104 = vmatpush.msra.mxu2 %v909_v31  ;;  %2121 = vmatpush.msra.mxu3 %v1061_v32  ;;  %v823_v30 = vld [vmem:[#allocation8 + $0x6e0] sm:$0xff]  ;;  %v918_v31 = vld [vmem:[#allocation8 + $0x9d8] sm:$0xff] }
 0x12e   : > { %2144 = vmatpush.msrb.mxu0 %v654_v33  ;;  %2161 = vmatpush.msrb.mxu1 %v806_v34  ;;  %v1070_v32 = vld [vmem:[#allocation8 + $0xe98] sm:$0xff]  ;;  %v663_v33 = vld [vmem:[#allocation8 + $0x1e0] sm:$0xff] }
 0x12f   : > { %2105 = vmatpush.msra.mxu2 %v901_v35  ;;  %2122 = vmatpush.msra.mxu3 %v1053_v36  ;;  %v815_v34 = vld [vmem:[#allocation8 + $0x6a0] sm:$0xff]  ;;  %v910_v35 = vld [vmem:[#allocation8 + $0x998] sm:$0xff] }
 0x130   : > { %2145 = vmatpush.msrb.mxu0 %v646_v37  ;;  %2162 = vmatpush.msrb.mxu1 %v798_v38  ;;  %v1062_v36 = vld [vmem:[#allocation8 + $0xe58] sm:$0xff]  ;;  %v655_v37 = vld [vmem:[#allocation8 + $0x1a0] sm:$0xff] }
 0x131   : > { %2106 = vmatpush.msra.mxu2 %v893_v39  ;;  %2123 = vmatpush.msra.mxu3 %v1045_v40  ;;  %v807_v38 = vld [vmem:[#allocation8 + $0x660] sm:$0xff]  ;;  %v902_v39 = vld [vmem:[#allocation8 + $0x958] sm:$0xff] }
 0x132   : > { %2146 = vmatpush.msrb.mxu0 %v638_v41  ;;  %2163 = vmatpush.msrb.mxu1 %v790_v42  ;;  %v1054_v40 = vld [vmem:[#allocation8 + $0xe18] sm:$0xff]  ;;  %v647_v41 = vld [vmem:[#allocation8 + $0x160] sm:$0xff] }
 0x133   : > { %2107 = vmatpush.msra.mxu2 %v885_v43  ;;  %2124 = vmatpush.msra.mxu3 %v1037_v44  ;;  %v799_v42 = vld [vmem:[#allocation8 + $0x620] sm:$0xff]  ;;  %v894_v43 = vld [vmem:[#allocation8 + $0x918] sm:$0xff] }
 0x134   : > { %2147 = vmatpush.msrb.mxu0 %v630_v45  ;;  %2164 = vmatpush.msrb.mxu1 %v782_v46  ;;  %v1046_v44 = vld [vmem:[#allocation8 + $0xdd8] sm:$0xff]  ;;  %v639_v45 = vld [vmem:[#allocation8 + $0x120] sm:$0xff] }
 0x135   : > { %2108 = vmatpush.msra.mxu2 %v877_v47  ;;  %2125 = vmatpush.msra.mxu3 %v1029_v48  ;;  %v791_v46 = vld [vmem:[#allocation8 + $0x5e0] sm:$0xff]  ;;  %v886_v47 = vld [vmem:[#allocation8 + $0x8d8] sm:$0xff] }
 0x136   : > { %2148 = vmatpush.msrb.mxu0 %v622_v50  ;;  %2165 = vmatpush.msrb.mxu1 %v774_v51  ;;  %v1038_v48 = vld [vmem:[#allocation8 + $0xd98] sm:$0xff]  ;;  %v631_v50 = vld [vmem:[#allocation8 + $0xe0] sm:$0xff] }
 0x137   : > { %2109 = vmatpush.msra.mxu2 %v869_v52  ;;  %2126 = vmatpush.msra.mxu3 %v1021_v53  ;;  %v783_v51 = vld [vmem:[#allocation8 + $0x5a0] sm:$0xff]  ;;  %v878_v52 = vld [vmem:[#allocation8 + $0x898] sm:$0xff] }
 0x138   : > { %2149 = vmatpush.msrb.mxu0 %v614_v54  ;;  %2166 = vmatpush.msrb.mxu1 %v766_v55  ;;  %v1030_v53 = vld [vmem:[#allocation8 + $0xd58] sm:$0xff]  ;;  %v623_v54 = vld [vmem:[#allocation8 + $0xa0] sm:$0xff] }
 0x139   : > { %2110 = vmatpush.msra.mxu2 %v861_v56  ;;  %2127 = vmatpush.msra.mxu3 %v1013_v57  ;;  %v775_v55 = vld [vmem:[#allocation8 + $0x560] sm:$0xff]  ;;  %v870_v56 = vld [vmem:[#allocation8 + $0x858] sm:$0xff] }
 0x13a   : > { %2150 = vmatpush.msrb.mxu0 %v606_v59  ;;  %2167 = vmatpush.msrb.mxu1 %v758_v60  ;;  %v1022_v57 = vld [vmem:[#allocation8 + $0xd18] sm:$0xff]  ;;  %v615_v59 = vld [vmem:[#allocation8 + $0x60] sm:$0xff] }
 0x13b   : > { %2111 = vmatmul.f32.vlgmr.msra.gmra.mxu2 %v4244_v58  ;;  %2151 = vmatmul.f32.vlgmr.msrb.gmra.mxu0 %v4234_v10  ;;  %v767_v60 = vld [vmem:[#allocation8 + $0x520] sm:$0xff] }
 0x13c   : > { %2175 = vmatpush.msrb.mxu2 %v982_v61  ;;  %2215 = vmatpush.msra.mxu0 %v727_v49  ;;  %v862_v61 = vld [vmem:[#allocation8 + $0x818] sm:$0xff] }
 0x13d   : > { %2128 = vmatpush.msra.mxu3 %v1005_v63  ;;  %2168 = vmatpush.msrb.mxu1 %v750_v0  ;;  %v1014_v49 = vld [vmem:[#allocation8 + $0xcd8] sm:$0xff]  ;;  %v607_v63 = vld [vmem:[#allocation8 + $0x20] sm:$0xff] }
 0x13e   : > { %2176 = vmatpush.msrb.mxu2 %v974_v1  ;;  %2216 = vmatpush.msra.mxu0 %v719_v2  ;;  %v759_v0 = vld [vmem:[#allocation8 + $0x4e0] sm:$0xff]  ;;  %v728_v2 = vld [vmem:[#allocation8 + $0x3e8] sm:$0xff] }
 0x13f   : > { %2129 = vmatpush.msra.mxu3 %v997_v4  ;;  %2169 = vmatpush.msrb.mxu1 %v742_v5  ;;  %v983_v1 = vld [vmem:[#allocation8 + $0xbe0] sm:$0xff]  ;;  %v1006_v4 = vld [vmem:[#allocation8 + $0xc98] sm:$0xff] }
 0x140   : > { %2177 = vmatpush.msrb.mxu2 %v966_v6  ;;  %2217 = vmatpush.msra.mxu0 %v711_v7  ;;  %v751_v5 = vld [vmem:[#allocation8 + $0x4a0] sm:$0xff]  ;;  %v720_v7 = vld [vmem:[#allocation8 + $0x3a8] sm:$0xff] }
 0x141   : > { %2130 = vmatpush.msra.mxu3 %v989_v9  ;;  %2170 = vmatpush.msrb.mxu1 %v734_v11  ;;  %v975_v6 = vld [vmem:[#allocation8 + $0xba0] sm:$0xff]  ;;  %v998_v9 = vld [vmem:[#allocation8 + $0xc58] sm:$0xff] }
 0x142   : > { %2131 = vmatmul.f32.vlgmr.msra.gmra.mxu3 %v4248_v8  ;;  %2171 = vmatmul.f32.vlgmr.msrb.gmra.mxu1 %v4237_v20  ;;  %v743_v11 = vld [vmem:[#allocation8 + $0x460] sm:$0xff] }
 0x143   : > { %2178 = vmatpush.msrb.mxu2 %v958_v62  ;;  %2195 = vmatpush.msrb.mxu3 %v1110_v12  ;;  %v967_v62 = vld [vmem:[#allocation8 + $0xb60] sm:$0xff]  ;;  %v712_v12 = vld [vmem:[#allocation8 + $0x368] sm:$0xff] }
 0x144   : > { %2218 = vmatpush.msra.mxu0 %v703_v13  ;;  %2235 = vmatpush.msra.mxu1 %v855_v14  ;;  %v990_v13 = vld [vmem:[#allocation8 + $0xc18] sm:$0xff]  ;;  %v735_v14 = vld [vmem:[#allocation8 + $0x420] sm:$0xff] }
 0x145   : > { %2179 = vmatpush.msrb.mxu2 %v950_v15  ;;  %2196 = vmatpush.msrb.mxu3 %v1102_v16  ;;  %v959_v15 = vld [vmem:[#allocation8 + $0xb20] sm:$0xff] }
 0x146   : > { %2219 = vmatpush.msra.mxu0 %v695_v3  ;;  %2236 = vmatpush.msra.mxu1 %v847_v17  ;;  %v1111_v16 = vld [vmem:[#allocation8 + $0xfe0] sm:$0xff]  ;;  %v704_v3 = vld [vmem:[#allocation8 + $0x328] sm:$0xff] }
 0x147   : > { %2180 = vmatpush.msrb.mxu2 %v942_v18  ;;  %2197 = vmatpush.msrb.mxu3 %v1094_v19  ;;  %v856_v17 = vld [vmem:[#allocation8 + $0x7e8] sm:$0xff]  ;;  %v951_v18 = vld [vmem:[#allocation8 + $0xae0] sm:$0xff] }
 0x148   : > { %2220 = vmatpush.msra.mxu0 %v687_v21  ;;  %2237 = vmatpush.msra.mxu1 %v839_v22  ;;  %v1103_v19 = vld [vmem:[#allocation8 + $0xfa0] sm:$0xff]  ;;  %v696_v21 = vld [vmem:[#allocation8 + $0x2e8] sm:$0xff] }
 0x149   : > { %2181 = vmatpush.msrb.mxu2 %v934_v23  ;;  %2198 = vmatpush.msrb.mxu3 %v1086_v24  ;;  %v848_v22 = vld [vmem:[#allocation8 + $0x7a8] sm:$0xff]  ;;  %v943_v23 = vld [vmem:[#allocation8 + $0xaa0] sm:$0xff] }
 0x14a   : > { %2221 = vmatpush.msra.mxu0 %v679_v25  ;;  %2238 = vmatpush.msra.mxu1 %v831_v26  ;;  %v1095_v24 = vld [vmem:[#allocation8 + $0xf60] sm:$0xff]  ;;  %v688_v25 = vld [vmem:[#allocation8 + $0x2a8] sm:$0xff] }
 0x14b   : > { %2182 = vmatpush.msrb.mxu2 %v926_v27  ;;  %2199 = vmatpush.msrb.mxu3 %v1078_v28  ;;  %v840_v26 = vld [vmem:[#allocation8 + $0x768] sm:$0xff]  ;;  %v935_v27 = vld [vmem:[#allocation8 + $0xa60] sm:$0xff] }
 0x14c   : > { %2222 = vmatpush.msra.mxu0 %v671_v29  ;;  %2239 = vmatpush.msra.mxu1 %v823_v30  ;;  %v1087_v28 = vld [vmem:[#allocation8 + $0xf20] sm:$0xff]  ;;  %v680_v29 = vld [vmem:[#allocation8 + $0x268] sm:$0xff] }
 0x14d   : > { %2183 = vmatpush.msrb.mxu2 %v918_v31  ;;  %2200 = vmatpush.msrb.mxu3 %v1070_v32  ;;  %v832_v30 = vld [vmem:[#allocation8 + $0x728] sm:$0xff]  ;;  %v927_v31 = vld [vmem:[#allocation8 + $0xa20] sm:$0xff] }
 0x14e   : > { %2223 = vmatpush.msra.mxu0 %v663_v33  ;;  %2240 = vmatpush.msra.mxu1 %v815_v34  ;;  %v1079_v32 = vld [vmem:[#allocation8 + $0xee0] sm:$0xff]  ;;  %v672_v33 = vld [vmem:[#allocation8 + $0x228] sm:$0xff] }
 0x14f   : > { %2184 = vmatpush.msrb.mxu2 %v910_v35  ;;  %2201 = vmatpush.msrb.mxu3 %v1062_v36  ;;  %v824_v34 = vld [vmem:[#allocation8 + $0x6e8] sm:$0xff]  ;;  %v919_v35 = vld [vmem:[#allocation8 + $0x9e0] sm:$0xff] }
 0x150   : > { %2224 = vmatpush.msra.mxu0 %v655_v37  ;;  %2241 = vmatpush.msra.mxu1 %v807_v38  ;;  %v1071_v36 = vld [vmem:[#allocation8 + $0xea0] sm:$0xff]  ;;  %v664_v37 = vld [vmem:[#allocation8 + $0x1e8] sm:$0xff] }
 0x151   : > { %2185 = vmatpush.msrb.mxu2 %v902_v39  ;;  %2202 = vmatpush.msrb.mxu3 %v1054_v40  ;;  %v816_v38 = vld [vmem:[#allocation8 + $0x6a8] sm:$0xff]  ;;  %v911_v39 = vld [vmem:[#allocation8 + $0x9a0] sm:$0xff] }
 0x152   : > { %2225 = vmatpush.msra.mxu0 %v647_v41  ;;  %2242 = vmatpush.msra.mxu1 %v799_v42  ;;  %v1063_v40 = vld [vmem:[#allocation8 + $0xe60] sm:$0xff]  ;;  %v656_v41 = vld [vmem:[#allocation8 + $0x1a8] sm:$0xff] }
 0x153   : > { %2186 = vmatpush.msrb.mxu2 %v894_v43  ;;  %2203 = vmatpush.msrb.mxu3 %v1046_v44  ;;  %v808_v42 = vld [vmem:[#allocation8 + $0x668] sm:$0xff]  ;;  %v903_v43 = vld [vmem:[#allocation8 + $0x960] sm:$0xff] }
 0x154   : > { %2226 = vmatpush.msra.mxu0 %v639_v45  ;;  %2243 = vmatpush.msra.mxu1 %v791_v46  ;;  %v1055_v44 = vld [vmem:[#allocation8 + $0xe20] sm:$0xff]  ;;  %v648_v45 = vld [vmem:[#allocation8 + $0x168] sm:$0xff] }
 0x155   : > { %2187 = vmatpush.msrb.mxu2 %v886_v47  ;;  %2204 = vmatpush.msrb.mxu3 %v1038_v48  ;;  %v800_v46 = vld [vmem:[#allocation8 + $0x628] sm:$0xff]  ;;  %v895_v47 = vld [vmem:[#allocation8 + $0x920] sm:$0xff] }
 0x156   : > { %2227 = vmatpush.msra.mxu0 %v631_v50  ;;  %2244 = vmatpush.msra.mxu1 %v783_v51  ;;  %v1047_v48 = vld [vmem:[#allocation8 + $0xde0] sm:$0xff]  ;;  %v640_v50 = vld [vmem:[#allocation8 + $0x128] sm:$0xff] }
 0x157   : > { %2188 = vmatpush.msrb.mxu2 %v878_v52  ;;  %2205 = vmatpush.msrb.mxu3 %v1030_v53  ;;  %v792_v51 = vld [vmem:[#allocation8 + $0x5e8] sm:$0xff]  ;;  %v887_v52 = vld [vmem:[#allocation8 + $0x8e0] sm:$0xff] }
 0x158   : > { %2228 = vmatpush.msra.mxu0 %v623_v54  ;;  %2245 = vmatpush.msra.mxu1 %v775_v55  ;;  %v1039_v53 = vld [vmem:[#allocation8 + $0xda0] sm:$0xff]  ;;  %v632_v54 = vld [vmem:[#allocation8 + $0xe8] sm:$0xff] }
 0x159   : > { %2189 = vmatpush.msrb.mxu2 %v870_v56  ;;  %2206 = vmatpush.msrb.mxu3 %v1022_v57  ;;  %v784_v55 = vld [vmem:[#allocation8 + $0x5a8] sm:$0xff]  ;;  %v879_v56 = vld [vmem:[#allocation8 + $0x8a0] sm:$0xff] }
 0x15a   : > { %2229 = vmatpush.msra.mxu0 %v615_v59  ;;  %2246 = vmatpush.msra.mxu1 %v767_v60  ;;  %v1031_v57 = vld [vmem:[#allocation8 + $0xd60] sm:$0xff]  ;;  %v624_v59 = vld [vmem:[#allocation8 + $0xa8] sm:$0xff] }
 0x15b   : > { %2190 = vmatpush.msrb.mxu2 %v862_v61  ;;  %2207 = vmatpush.msrb.mxu3 %v1014_v49  ;;  %v776_v60 = vld [vmem:[#allocation8 + $0x568] sm:$0xff]  ;;  %v871_v61 = vld [vmem:[#allocation8 + $0x860] sm:$0xff] }
 0x15c   : > { %2230 = vmatpush.msra.mxu0 %v607_v63  ;;  %2247 = vmatpush.msra.mxu1 %v759_v0  ;;  %v1023_v49 = vld [vmem:[#allocation8 + $0xd20] sm:$0xff]  ;;  %v616_v63 = vld [vmem:[#allocation8 + $0x68] sm:$0xff] }
 0x15d   : > { %2191 = vmatmul.f32.vlgmr.msrb.gmra.mxu2 %v4244_v58  ;;  %2231 = vmatmul.f32.vlgmr.msra.gmra.mxu0 %v4234_v10  ;;  %v768_v0 = vld [vmem:[#allocation8 + $0x528] sm:$0xff] }
 0x15e   : > { %2255 = vmatpush.msra.mxu2 %v983_v1  ;;  %2295 = vmatpush.msrb.mxu0 %v728_v2  ;;  %v863_v1 = vld [vmem:[#allocation8 + $0x820] sm:$0xff] }
 0x15f   : > { %2208 = vmatpush.msrb.mxu3 %v1006_v4  ;;  %2248 = vmatpush.msra.mxu1 %v751_v5  ;;  %v1015_v2 = vld [vmem:[#allocation8 + $0xce0] sm:$0xff]  ;;  %v608_v4 = vld [vmem:[#allocation8 + $0x28] sm:$0xff] }
 0x160   : > { %2256 = vmatpush.msra.mxu2 %v975_v6  ;;  %2296 = vmatpush.msrb.mxu0 %v720_v7  ;;  %v760_v5 = vld [vmem:[#allocation8 + $0x4e8] sm:$0xff]  ;;  %v729_v7 = vld [vmem:[#allocation8 + $0x3f0] sm:$0xff] }
 0x161   : > { %2209 = vmatpush.msrb.mxu3 %v998_v9  ;;  %2249 = vmatpush.msra.mxu1 %v743_v11  ;;  %v984_v6 = vld [vmem:[#allocation8 + $0xbe8] sm:$0xff]  ;;  %v1007_v9 = vld [vmem:[#allocation8 + $0xca0] sm:$0xff] }
 0x162   : > { %2257 = vmatpush.msra.mxu2 %v967_v62  ;;  %2297 = vmatpush.msrb.mxu0 %v712_v12  ;;  %v752_v11 = vld [vmem:[#allocation8 + $0x4a8] sm:$0xff]  ;;  %v721_v12 = vld [vmem:[#allocation8 + $0x3b0] sm:$0xff] }
 0x163   : > { %2210 = vmatpush.msrb.mxu3 %v990_v13  ;;  %2250 = vmatpush.msra.mxu1 %v735_v14  ;;  %v976_v62 = vld [vmem:[#allocation8 + $0xba8] sm:$0xff]  ;;  %v999_v13 = vld [vmem:[#allocation8 + $0xc60] sm:$0xff] }
 0x164   : > { %2211 = vmatmul.f32.vlgmr.msrb.gmra.mxu3 %v4248_v8  ;;  %2251 = vmatmul.f32.vlgmr.msra.gmra.mxu1 %v4237_v20  ;;  %v744_v14 = vld [vmem:[#allocation8 + $0x468] sm:$0xff] }
 0x165   : > { %2258 = vmatpush.msra.mxu2 %v959_v15  ;;  %2275 = vmatpush.msra.mxu3 %v1111_v16  ;;  %v968_v15 = vld [vmem:[#allocation8 + $0xb68] sm:$0xff]  ;;  %v713_v16 = vld [vmem:[#allocation8 + $0x370] sm:$0xff] }
 0x166   : > { %2298 = vmatpush.msrb.mxu0 %v704_v3  ;;  %2315 = vmatpush.msrb.mxu1 %v856_v17  ;;  %v991_v3 = vld [vmem:[#allocation8 + $0xc20] sm:$0xff]  ;;  %v736_v17 = vld [vmem:[#allocation8 + $0x428] sm:$0xff] }
 0x167   : > { %2259 = vmatpush.msra.mxu2 %v951_v18  ;;  %2276 = vmatpush.msra.mxu3 %v1103_v19  ;;  %v960_v18 = vld [vmem:[#allocation8 + $0xb28] sm:$0xff] }
 0x168   : > { %2299 = vmatpush.msrb.mxu0 %v696_v21  ;;  %2316 = vmatpush.msrb.mxu1 %v848_v22  ;;  %v1112_v19 = vld [vmem:[#allocation8 + $0xfe8] sm:$0xff]  ;;  %v705_v21 = vld [vmem:[#allocation8 + $0x330] sm:$0xff] }
 0x169   : > { %2260 = vmatpush.msra.mxu2 %v943_v23  ;;  %2277 = vmatpush.msra.mxu3 %v1095_v24  ;;  %v857_v22 = vld [vmem:[#allocation8 + $0x7f0] sm:$0xff]  ;;  %v952_v23 = vld [vmem:[#allocation8 + $0xae8] sm:$0xff] }
 0x16a   : > { %2300 = vmatpush.msrb.mxu0 %v688_v25  ;;  %2317 = vmatpush.msrb.mxu1 %v840_v26  ;;  %v1104_v24 = vld [vmem:[#allocation8 + $0xfa8] sm:$0xff]  ;;  %v697_v25 = vld [vmem:[#allocation8 + $0x2f0] sm:$0xff] }
 0x16b   : > { %2261 = vmatpush.msra.mxu2 %v935_v27  ;;  %2278 = vmatpush.msra.mxu3 %v1087_v28  ;;  %v849_v26 = vld [vmem:[#allocation8 + $0x7b0] sm:$0xff]  ;;  %v944_v27 = vld [vmem:[#allocation8 + $0xaa8] sm:$0xff] }
 0x16c   : > { %2301 = vmatpush.msrb.mxu0 %v680_v29  ;;  %2318 = vmatpush.msrb.mxu1 %v832_v30  ;;  %v1096_v28 = vld [vmem:[#allocation8 + $0xf68] sm:$0xff]  ;;  %v689_v29 = vld [vmem:[#allocation8 + $0x2b0] sm:$0xff] }
 0x16d   : > { %2262 = vmatpush.msra.mxu2 %v927_v31  ;;  %2279 = vmatpush.msra.mxu3 %v1079_v32  ;;  %v841_v30 = vld [vmem:[#allocation8 + $0x770] sm:$0xff]  ;;  %v936_v31 = vld [vmem:[#allocation8 + $0xa68] sm:$0xff] }
 0x16e   : > { %2302 = vmatpush.msrb.mxu0 %v672_v33  ;;  %2319 = vmatpush.msrb.mxu1 %v824_v34  ;;  %v1088_v32 = vld [vmem:[#allocation8 + $0xf28] sm:$0xff]  ;;  %v681_v33 = vld [vmem:[#allocation8 + $0x270] sm:$0xff] }
 0x16f   : > { %2263 = vmatpush.msra.mxu2 %v919_v35  ;;  %2280 = vmatpush.msra.mxu3 %v1071_v36  ;;  %v833_v34 = vld [vmem:[#allocation8 + $0x730] sm:$0xff]  ;;  %v928_v35 = vld [vmem:[#allocation8 + $0xa28] sm:$0xff] }
 0x170   : > { %2303 = vmatpush.msrb.mxu0 %v664_v37  ;;  %2320 = vmatpush.msrb.mxu1 %v816_v38  ;;  %v1080_v36 = vld [vmem:[#allocation8 + $0xee8] sm:$0xff]  ;;  %v673_v37 = vld [vmem:[#allocation8 + $0x230] sm:$0xff] }
 0x171   : > { %2264 = vmatpush.msra.mxu2 %v911_v39  ;;  %2281 = vmatpush.msra.mxu3 %v1063_v40  ;;  %v825_v38 = vld [vmem:[#allocation8 + $0x6f0] sm:$0xff]  ;;  %v920_v39 = vld [vmem:[#allocation8 + $0x9e8] sm:$0xff] }
 0x172   : > { %2304 = vmatpush.msrb.mxu0 %v656_v41  ;;  %2321 = vmatpush.msrb.mxu1 %v808_v42  ;;  %v1072_v40 = vld [vmem:[#allocation8 + $0xea8] sm:$0xff]  ;;  %v665_v41 = vld [vmem:[#allocation8 + $0x1f0] sm:$0xff] }
 0x173   : > { %2265 = vmatpush.msra.mxu2 %v903_v43  ;;  %2282 = vmatpush.msra.mxu3 %v1055_v44  ;;  %v817_v42 = vld [vmem:[#allocation8 + $0x6b0] sm:$0xff]  ;;  %v912_v43 = vld [vmem:[#allocation8 + $0x9a8] sm:$0xff] }
 0x174   : > { %2305 = vmatpush.msrb.mxu0 %v648_v45  ;;  %2322 = vmatpush.msrb.mxu1 %v800_v46  ;;  %v1064_v44 = vld [vmem:[#allocation8 + $0xe68] sm:$0xff]  ;;  %v657_v45 = vld [vmem:[#allocation8 + $0x1b0] sm:$0xff] }
 0x175   : > { %2266 = vmatpush.msra.mxu2 %v895_v47  ;;  %2283 = vmatpush.msra.mxu3 %v1047_v48  ;;  %v809_v46 = vld [vmem:[#allocation8 + $0x670] sm:$0xff]  ;;  %v904_v47 = vld [vmem:[#allocation8 + $0x968] sm:$0xff] }
 0x176   : > { %2306 = vmatpush.msrb.mxu0 %v640_v50  ;;  %2323 = vmatpush.msrb.mxu1 %v792_v51  ;;  %v1056_v48 = vld [vmem:[#allocation8 + $0xe28] sm:$0xff]  ;;  %v649_v50 = vld [vmem:[#allocation8 + $0x170] sm:$0xff] }
 0x177   : > { %2267 = vmatpush.msra.mxu2 %v887_v52  ;;  %2284 = vmatpush.msra.mxu3 %v1039_v53  ;;  %v801_v51 = vld [vmem:[#allocation8 + $0x630] sm:$0xff]  ;;  %v896_v52 = vld [vmem:[#allocation8 + $0x928] sm:$0xff] }
 0x178   : > { %2307 = vmatpush.msrb.mxu0 %v632_v54  ;;  %2324 = vmatpush.msrb.mxu1 %v784_v55  ;;  %v1048_v53 = vld [vmem:[#allocation8 + $0xde8] sm:$0xff]  ;;  %v641_v54 = vld [vmem:[#allocation8 + $0x130] sm:$0xff] }
 0x179   : > { %2268 = vmatpush.msra.mxu2 %v879_v56  ;;  %2285 = vmatpush.msra.mxu3 %v1031_v57  ;;  %v793_v55 = vld [vmem:[#allocation8 + $0x5f0] sm:$0xff]  ;;  %v888_v56 = vld [vmem:[#allocation8 + $0x8e8] sm:$0xff] }
 0x17a   : > { %2308 = vmatpush.msrb.mxu0 %v624_v59  ;;  %2325 = vmatpush.msrb.mxu1 %v776_v60  ;;  %v1040_v57 = vld [vmem:[#allocation8 + $0xda8] sm:$0xff]  ;;  %v633_v59 = vld [vmem:[#allocation8 + $0xf0] sm:$0xff] }
 0x17b   : > { %2269 = vmatpush.msra.mxu2 %v871_v61  ;;  %2286 = vmatpush.msra.mxu3 %v1023_v49  ;;  %v785_v60 = vld [vmem:[#allocation8 + $0x5b0] sm:$0xff]  ;;  %v880_v61 = vld [vmem:[#allocation8 + $0x8a8] sm:$0xff] }
 0x17c   : > { %2309 = vmatpush.msrb.mxu0 %v616_v63  ;;  %2326 = vmatpush.msrb.mxu1 %v768_v0  ;;  %v1032_v49 = vld [vmem:[#allocation8 + $0xd68] sm:$0xff]  ;;  %v625_v63 = vld [vmem:[#allocation8 + $0xb0] sm:$0xff] }
 0x17d   : > { %2270 = vmatpush.msra.mxu2 %v863_v1  ;;  %2287 = vmatpush.msra.mxu3 %v1015_v2  ;;  %v777_v0 = vld [vmem:[#allocation8 + $0x570] sm:$0xff]  ;;  %v872_v1 = vld [vmem:[#allocation8 + $0x868] sm:$0xff] }
 0x17e   : > { %2310 = vmatpush.msrb.mxu0 %v608_v4  ;;  %2327 = vmatpush.msrb.mxu1 %v760_v5  ;;  %v1024_v2 = vld [vmem:[#allocation8 + $0xd28] sm:$0xff]  ;;  %v617_v4 = vld [vmem:[#allocation8 + $0x70] sm:$0xff] }
 0x17f   : > { %2271 = vmatmul.f32.vlgmr.msra.gmra.mxu2 %v4244_v58  ;;  %2311 = vmatmul.f32.vlgmr.msrb.gmra.mxu0 %v4234_v10  ;;  %v769_v5 = vld [vmem:[#allocation8 + $0x530] sm:$0xff] }
 0x180   : > { %2335 = vmatpush.msrb.mxu2 %v984_v6  ;;  %2375 = vmatpush.msra.mxu0 %v729_v7  ;;  %v864_v6 = vld [vmem:[#allocation8 + $0x828] sm:$0xff] }
 0x181   : > { %2288 = vmatpush.msra.mxu3 %v1007_v9  ;;  %2328 = vmatpush.msrb.mxu1 %v752_v11  ;;  %v1016_v7 = vld [vmem:[#allocation8 + $0xce8] sm:$0xff]  ;;  %v609_v9 = vld [vmem:[#allocation8 + $0x30] sm:$0xff] }
 0x182   : > { %2336 = vmatpush.msrb.mxu2 %v976_v62  ;;  %2376 = vmatpush.msra.mxu0 %v721_v12  ;;  %v761_v11 = vld [vmem:[#allocation8 + $0x4f0] sm:$0xff]  ;;  %v730_v12 = vld [vmem:[#allocation8 + $0x3f8] sm:$0xff] }
 0x183   : > { %2289 = vmatpush.msra.mxu3 %v999_v13  ;;  %2329 = vmatpush.msrb.mxu1 %v744_v14  ;;  %v985_v62 = vld [vmem:[#allocation8 + $0xbf0] sm:$0xff]  ;;  %v1008_v13 = vld [vmem:[#allocation8 + $0xca8] sm:$0xff] }
 0x184   : > { %2337 = vmatpush.msrb.mxu2 %v968_v15  ;;  %2377 = vmatpush.msra.mxu0 %v713_v16  ;;  %v753_v14 = vld [vmem:[#allocation8 + $0x4b0] sm:$0xff]  ;;  %v722_v16 = vld [vmem:[#allocation8 + $0x3b8] sm:$0xff] }
 0x185   : > { %2290 = vmatpush.msra.mxu3 %v991_v3  ;;  %2330 = vmatpush.msrb.mxu1 %v736_v17  ;;  %v977_v15 = vld [vmem:[#allocation8 + $0xbb0] sm:$0xff]  ;;  %v1000_v3 = vld [vmem:[#allocation8 + $0xc68] sm:$0xff] }
 0x186   : > { %2291 = vmatmul.f32.vlgmr.msra.gmra.mxu3 %v4248_v8  ;;  %2331 = vmatmul.f32.vlgmr.msrb.gmra.mxu1 %v4237_v20  ;;  %v745_v17 = vld [vmem:[#allocation8 + $0x470] sm:$0xff] }
 0x187   : > { %2338 = vmatpush.msrb.mxu2 %v960_v18  ;;  %2355 = vmatpush.msrb.mxu3 %v1112_v19  ;;  %v969_v18 = vld [vmem:[#allocation8 + $0xb70] sm:$0xff]  ;;  %v714_v19 = vld [vmem:[#allocation8 + $0x378] sm:$0xff] }
 0x188   : > { %2378 = vmatpush.msra.mxu0 %v705_v21  ;;  %2395 = vmatpush.msra.mxu1 %v857_v22  ;;  %v992_v21 = vld [vmem:[#allocation8 + $0xc28] sm:$0xff]  ;;  %v737_v22 = vld [vmem:[#allocation8 + $0x430] sm:$0xff] }
 0x189   : > { %2339 = vmatpush.msrb.mxu2 %v952_v23  ;;  %2356 = vmatpush.msrb.mxu3 %v1104_v24  ;;  %v961_v23 = vld [vmem:[#allocation8 + $0xb30] sm:$0xff] }
 0x18a   : > { %2379 = vmatpush.msra.mxu0 %v697_v25  ;;  %2396 = vmatpush.msra.mxu1 %v849_v26  ;;  %v1113_v24 = vld [vmem:[#allocation8 + $0xff0] sm:$0xff]  ;;  %v706_v25 = vld [vmem:[#allocation8 + $0x338] sm:$0xff] }
 0x18b   : > { %2340 = vmatpush.msrb.mxu2 %v944_v27  ;;  %2357 = vmatpush.msrb.mxu3 %v1096_v28  ;;  %v858_v26 = vld [vmem:[#allocation8 + $0x7f8] sm:$0xff]  ;;  %v953_v27 = vld [vmem:[#allocation8 + $0xaf0] sm:$0xff] }
 0x18c   : > { %2380 = vmatpush.msra.mxu0 %v689_v29  ;;  %2397 = vmatpush.msra.mxu1 %v841_v30  ;;  %v1105_v28 = vld [vmem:[#allocation8 + $0xfb0] sm:$0xff]  ;;  %v698_v29 = vld [vmem:[#allocation8 + $0x2f8] sm:$0xff] }
 0x18d   : > { %2341 = vmatpush.msrb.mxu2 %v936_v31  ;;  %2358 = vmatpush.msrb.mxu3 %v1088_v32  ;;  %v850_v30 = vld [vmem:[#allocation8 + $0x7b8] sm:$0xff]  ;;  %v945_v31 = vld [vmem:[#allocation8 + $0xab0] sm:$0xff] }
 0x18e   : > { %2381 = vmatpush.msra.mxu0 %v681_v33  ;;  %2398 = vmatpush.msra.mxu1 %v833_v34  ;;  %v1097_v32 = vld [vmem:[#allocation8 + $0xf70] sm:$0xff]  ;;  %v690_v33 = vld [vmem:[#allocation8 + $0x2b8] sm:$0xff] }
 0x18f   : > { %2342 = vmatpush.msrb.mxu2 %v928_v35  ;;  %2359 = vmatpush.msrb.mxu3 %v1080_v36  ;;  %v842_v34 = vld [vmem:[#allocation8 + $0x778] sm:$0xff]  ;;  %v937_v35 = vld [vmem:[#allocation8 + $0xa70] sm:$0xff] }
 0x190   : > { %2382 = vmatpush.msra.mxu0 %v673_v37  ;;  %2399 = vmatpush.msra.mxu1 %v825_v38  ;;  %v1089_v36 = vld [vmem:[#allocation8 + $0xf30] sm:$0xff]  ;;  %v682_v37 = vld [vmem:[#allocation8 + $0x278] sm:$0xff] }
 0x191   : > { %2343 = vmatpush.msrb.mxu2 %v920_v39  ;;  %2360 = vmatpush.msrb.mxu3 %v1072_v40  ;;  %v834_v38 = vld [vmem:[#allocation8 + $0x738] sm:$0xff]  ;;  %v929_v39 = vld [vmem:[#allocation8 + $0xa30] sm:$0xff] }
 0x192   : > { %2383 = vmatpush.msra.mxu0 %v665_v41  ;;  %2400 = vmatpush.msra.mxu1 %v817_v42  ;;  %v1081_v40 = vld [vmem:[#allocation8 + $0xef0] sm:$0xff]  ;;  %v674_v41 = vld [vmem:[#allocation8 + $0x238] sm:$0xff] }
 0x193   : > { %2344 = vmatpush.msrb.mxu2 %v912_v43  ;;  %2361 = vmatpush.msrb.mxu3 %v1064_v44  ;;  %v826_v42 = vld [vmem:[#allocation8 + $0x6f8] sm:$0xff]  ;;  %v921_v43 = vld [vmem:[#allocation8 + $0x9f0] sm:$0xff] }
 0x194   : > { %2384 = vmatpush.msra.mxu0 %v657_v45  ;;  %2401 = vmatpush.msra.mxu1 %v809_v46  ;;  %v1073_v44 = vld [vmem:[#allocation8 + $0xeb0] sm:$0xff]  ;;  %v666_v45 = vld [vmem:[#allocation8 + $0x1f8] sm:$0xff] }
 0x195   : > { %2345 = vmatpush.msrb.mxu2 %v904_v47  ;;  %2362 = vmatpush.msrb.mxu3 %v1056_v48  ;;  %v818_v46 = vld [vmem:[#allocation8 + $0x6b8] sm:$0xff]  ;;  %v913_v47 = vld [vmem:[#allocation8 + $0x9b0] sm:$0xff] }
 0x196   : > { %2385 = vmatpush.msra.mxu0 %v649_v50  ;;  %2402 = vmatpush.msra.mxu1 %v801_v51  ;;  %v1065_v48 = vld [vmem:[#allocation8 + $0xe70] sm:$0xff]  ;;  %v658_v50 = vld [vmem:[#allocation8 + $0x1b8] sm:$0xff] }
 0x197   : > { %2346 = vmatpush.msrb.mxu2 %v896_v52  ;;  %2363 = vmatpush.msrb.mxu3 %v1048_v53  ;;  %v810_v51 = vld [vmem:[#allocation8 + $0x678] sm:$0xff]  ;;  %v905_v52 = vld [vmem:[#allocation8 + $0x970] sm:$0xff] }
 0x198   : > { %2386 = vmatpush.msra.mxu0 %v641_v54  ;;  %2403 = vmatpush.msra.mxu1 %v793_v55  ;;  %v1057_v53 = vld [vmem:[#allocation8 + $0xe30] sm:$0xff]  ;;  %v650_v54 = vld [vmem:[#allocation8 + $0x178] sm:$0xff] }
 0x199   : > { %2347 = vmatpush.msrb.mxu2 %v888_v56  ;;  %2364 = vmatpush.msrb.mxu3 %v1040_v57  ;;  %v802_v55 = vld [vmem:[#allocation8 + $0x638] sm:$0xff]  ;;  %v897_v56 = vld [vmem:[#allocation8 + $0x930] sm:$0xff] }
 0x19a   : > { %2387 = vmatpush.msra.mxu0 %v633_v59  ;;  %2404 = vmatpush.msra.mxu1 %v785_v60  ;;  %v1049_v57 = vld [vmem:[#allocation8 + $0xdf0] sm:$0xff]  ;;  %v642_v59 = vld [vmem:[#allocation8 + $0x138] sm:$0xff] }
 0x19b   : > { %2348 = vmatpush.msrb.mxu2 %v880_v61  ;;  %2365 = vmatpush.msrb.mxu3 %v1032_v49  ;;  %v794_v60 = vld [vmem:[#allocation8 + $0x5f8] sm:$0xff]  ;;  %v889_v61 = vld [vmem:[#allocation8 + $0x8f0] sm:$0xff] }
 0x19c   : > { %2388 = vmatpush.msra.mxu0 %v625_v63  ;;  %2405 = vmatpush.msra.mxu1 %v777_v0  ;;  %v1041_v49 = vld [vmem:[#allocation8 + $0xdb0] sm:$0xff]  ;;  %v634_v63 = vld [vmem:[#allocation8 + $0xf8] sm:$0xff] }
 0x19d   : > { %2349 = vmatpush.msrb.mxu2 %v872_v1  ;;  %2366 = vmatpush.msrb.mxu3 %v1024_v2  ;;  %v786_v0 = vld [vmem:[#allocation8 + $0x5b8] sm:$0xff]  ;;  %v881_v1 = vld [vmem:[#allocation8 + $0x8b0] sm:$0xff] }
 0x19e   : > { %2389 = vmatpush.msra.mxu0 %v617_v4  ;;  %2406 = vmatpush.msra.mxu1 %v769_v5  ;;  %v1033_v2 = vld [vmem:[#allocation8 + $0xd70] sm:$0xff]  ;;  %v626_v4 = vld [vmem:[#allocation8 + $0xb8] sm:$0xff] }
 0x19f   : > { %2350 = vmatpush.msrb.mxu2 %v864_v6  ;;  %2367 = vmatpush.msrb.mxu3 %v1016_v7  ;;  %v778_v5 = vld [vmem:[#allocation8 + $0x578] sm:$0xff]  ;;  %v873_v6 = vld [vmem:[#allocation8 + $0x870] sm:$0xff] }
 0x1a0   : > { %2390 = vmatpush.msra.mxu0 %v609_v9  ;;  %2407 = vmatpush.msra.mxu1 %v761_v11  ;;  %v1025_v7 = vld [vmem:[#allocation8 + $0xd30] sm:$0xff]  ;;  %v618_v9 = vld [vmem:[#allocation8 + $0x78] sm:$0xff] }
 0x1a1   : > { %2351 = vmatmul.f32.vlgmr.msrb.gmra.mxu2 %v4244_v58  ;;  %2391 = vmatmul.f32.vlgmr.msra.gmra.mxu0 %v4234_v10  ;;  %v770_v11 = vld [vmem:[#allocation8 + $0x538] sm:$0xff] }
 0x1a2   : > { %2415 = vmatpush.msra.mxu2 %v985_v62  ;;  %2455 = vmatpush.msrb.mxu0 %v730_v12  ;;  %v865_v62 = vld [vmem:[#allocation8 + $0x830] sm:$0xff] }
 0x1a3   : > { %2368 = vmatpush.msrb.mxu3 %v1008_v13  ;;  %2408 = vmatpush.msra.mxu1 %v753_v14  ;;  %v1017_v12 = vld [vmem:[#allocation8 + $0xcf0] sm:$0xff]  ;;  %v610_v13 = vld [vmem:[#allocation8 + $0x38] sm:$0xff] }
 0x1a4   : > { %2416 = vmatpush.msra.mxu2 %v977_v15  ;;  %2456 = vmatpush.msrb.mxu0 %v722_v16  ;;  %v762_v14 = vld [vmem:[#allocation8 + $0x4f8] sm:$0xff]  ;;  %v1175_v16 = vld [vmem:[#allocation11 + $0x1e0] sm:$0xff] }
 0x1a5   : > { %2369 = vmatpush.msrb.mxu3 %v1000_v3  ;;  %2409 = vmatpush.msra.mxu1 %v745_v17  ;;  %v986_v15 = vld [vmem:[#allocation8 + $0xbf8] sm:$0xff]  ;;  %v1009_v3 = vld [vmem:[#allocation8 + $0xcb0] sm:$0xff] }
 0x1a6   : > { %2417 = vmatpush.msra.mxu2 %v969_v18  ;;  %2457 = vmatpush.msrb.mxu0 %v714_v19  ;;  %v754_v17 = vld [vmem:[#allocation8 + $0x4b8] sm:$0xff]  ;;  %v1171_v19 = vld [vmem:[#allocation11 + $0x1c0] sm:$0xff] }
 0x1a7   : > { %2370 = vmatpush.msrb.mxu3 %v992_v21  ;;  %2410 = vmatpush.msra.mxu1 %v737_v22  ;;  %v978_v18 = vld [vmem:[#allocation8 + $0xbb8] sm:$0xff]  ;;  %v1001_v21 = vld [vmem:[#allocation8 + $0xc70] sm:$0xff] }
 0x1a8   : > { %2371 = vmatmul.f32.vlgmr.msrb.gmra.mxu3 %v4248_v8  ;;  %2411 = vmatmul.f32.vlgmr.msra.gmra.mxu1 %v4237_v20  ;;  %v746_v22 = vld [vmem:[#allocation8 + $0x478] sm:$0xff] }
 0x1a9   : > { %2418 = vmatpush.msra.mxu2 %v961_v23  ;;  %2435 = vmatpush.msra.mxu3 %v1113_v24  ;;  %v970_v23 = vld [vmem:[#allocation8 + $0xb78] sm:$0xff]  ;;  %v1167_v24 = vld [vmem:[#allocation11 + $0x1a0] sm:$0xff] }
 0x1aa   : > { %2458 = vmatpush.msrb.mxu0 %v706_v25  ;;  %2475 = vmatpush.msrb.mxu1 %v858_v26  ;;  %v993_v25 = vld [vmem:[#allocation8 + $0xc30] sm:$0xff]  ;;  %v738_v26 = vld [vmem:[#allocation8 + $0x438] sm:$0xff] }
 0x1ab   : > { %2419 = vmatpush.msra.mxu2 %v953_v27  ;;  %2436 = vmatpush.msra.mxu3 %v1105_v28  ;;  %v962_v27 = vld [vmem:[#allocation8 + $0xb38] sm:$0xff]  ;;  %v1163_v28 = vld [vmem:[#allocation11 + $0x180] sm:$0xff] }
 0x1ac   : > { %2459 = vmatpush.msrb.mxu0 %v698_v29  ;;  %2476 = vmatpush.msrb.mxu1 %v850_v30  ;;  %v1239_v29 = vld [vmem:[#allocation11 + $0x3e0] sm:$0xff]  ;;  %v954_v30 = vld [vmem:[#allocation8 + $0xaf8] sm:$0xff] }
 0x1ad   : > { %2420 = vmatpush.msra.mxu2 %v945_v31  ;;  %2437 = vmatpush.msra.mxu3 %v1097_v32  ;;  %v1106_v31 = vld [vmem:[#allocation8 + $0xfb8] sm:$0xff]  ;;  %v4274_v32 = vld [vmem:[#allocation10] sm:$0xff] }
 0x1ae   : > { %2460 = vmatpush.msrb.mxu0 %v690_v33  ;;  %2477 = vmatpush.msrb.mxu1 %v842_v34  ;;  %v1159_v33 = vld [vmem:[#allocation11 + $0x160] sm:$0xff] }
 0x1af   : > { %2421 = vmatpush.msra.mxu2 %v937_v35  ;;  %2438 = vmatpush.msra.mxu3 %v1089_v36  ;;  %v1235_v34 = vld [vmem:[#allocation11 + $0x3c0] sm:$0xff]  ;;  %v946_v35 = vld [vmem:[#allocation8 + $0xab8] sm:$0xff] }
 0x1b0   : > { %2461 = vmatpush.msrb.mxu0 %v682_v37  ;;  %2478 = vmatpush.msrb.mxu1 %v834_v38  ;;  %v1098_v36 = vld [vmem:[#allocation8 + $0xf78] sm:$0xff]  ;;  %v1155_v37 = vld [vmem:[#allocation11 + $0x140] sm:$0xff] }
 0x1b1   : > { %2422 = vmatpush.msra.mxu2 %v929_v39  ;;  %2439 = vmatpush.msra.mxu3 %v1081_v40  ;;  %v1231_v38 = vld [vmem:[#allocation11 + $0x3a0] sm:$0xff]  ;;  %v1879_v39 = vperm.slane %v4274_v32, 0  ;;  %v1912_v40 = vpop.f32.mrf.mxu0 }
 0x1b2   : > { %2462 = vmatpush.msrb.mxu0 %v674_v41  ;;  %2479 = vmatpush.msrb.mxu1 %v826_v42  ;;  %v1090_v41 = vld [vmem:[#allocation8 + $0xf38] sm:$0xff]  ;;  %v1151_v42 = vld [vmem:[#allocation11 + $0x120] sm:$0xff] }
 0x1b3   : > { %2423 = vmatpush.msra.mxu2 %v921_v43  ;;  %2440 = vmatpush.msra.mxu3 %v1073_v44  ;;  %v1227_v43 = vld [vmem:[#allocation11 + $0x380] sm:$0xff]  ;;  %v1932_v44 = vpop.f32.mrf.mxu1 }
 0x1b4   : > { %2463 = vmatpush.msrb.mxu0 %v666_v45  ;;  %2480 = vmatpush.msrb.mxu1 %v818_v46  ;;  %v930_v45 = vld [vmem:[#allocation8 + $0xa38] sm:$0xff] }
 0x1b5   : > { %2424 = vmatpush.msra.mxu2 %v913_v47  ;;  %2441 = vmatpush.msra.mxu3 %v1065_v48  ;;  %v1082_v46 = vld [vmem:[#allocation8 + $0xef8] sm:$0xff]  ;;  %v1147_v47 = vld [vmem:[#allocation11 + $0x100] sm:$0xff] }
 0x1b6   : > { %2464 = vmatpush.msrb.mxu0 %v658_v50  ;;  %2481 = vmatpush.msrb.mxu1 %v810_v51  ;;  %v1223_v48 = vld [vmem:[#allocation11 + $0x360] sm:$0xff]  ;;  %v1913_v50 = vadd.f32 %v1912_v40, %v1879_v39  ;;  %v1952_v51 = vpop.f32.mrf.mxu2  ;;  %v1010_v39 = vld [vmem:[#allocation8 + $0xcb8] sm:$0xff] }
 0x1b7   : > { %2425 = vmatpush.msra.mxu2 %v905_v52  ;;  %2442 = vmatpush.msra.mxu3 %v1057_v53  ;;  %v922_v52 = vld [vmem:[#allocation8 + $0x9f8] sm:$0xff]  ;;  %v1187_v40 = vld [vmem:[#allocation11 + $0x240] sm:$0xff] }
 0x1b8   : > { %2465 = vmatpush.msrb.mxu0 %v650_v54  ;;  %2482 = vmatpush.msrb.mxu1 %v802_v55  ;;  %v1074_v53 = vld [vmem:[#allocation8 + $0xeb8] sm:$0xff]  ;;  %v1143_v54 = vld [vmem:[#allocation11 + $0xe0] sm:$0xff] }
 0x1b9   : > { %2426 = vmatpush.msra.mxu2 %v897_v56  ;;  %2443 = vmatpush.msra.mxu3 %v1049_v57  ;;  %v1219_v55 = vld [vmem:[#allocation11 + $0x340] sm:$0xff]  ;;  %v1972_v56 = vpop.f32.mrf.mxu3  ;;  %v914_v57 = vld [vmem:[#allocation8 + $0x9b8] sm:$0xff] }
 0x1ba   : > { %2466 = vmatpush.msrb.mxu0 %v642_v59  ;;  %2483 = vmatpush.msrb.mxu1 %v794_v60  ;;  %v1066_v59 = vld [vmem:[#allocation8 + $0xe78] sm:$0xff]  ;;  %v1880_v60 = vperm.slane %v4274_v32, 1 }
 0x1bb   : > { %2427 = vmatpush.msra.mxu2 %v889_v61  ;;  %2444 = vmatpush.msra.mxu3 %v1041_v49  ;;  %v1139_v61 = vld [vmem:[#allocation11 + $0xc0] sm:$0xff] }
 0x1bc   : > { %2467 = vmatpush.msrb.mxu0 %v634_v63  ;;  %2484 = vmatpush.msrb.mxu1 %v786_v0  ;;  %v1215_v49 = vld [vmem:[#allocation11 + $0x320] sm:$0xff]  ;;  %v1933_v63 = vadd.f32 %v1932_v44, %v1913_v50  ;;  %v906_v0 = vld [vmem:[#allocation8 + $0x978] sm:$0xff] }
 0x1bd   : > { %2428 = vmatpush.msra.mxu2 %v881_v1  ;;  %2445 = vmatpush.msra.mxu3 %v1033_v2  ;;  %v1058_v1 = vld [vmem:[#allocation8 + $0xe38] sm:$0xff]  ;;  %v1135_v2 = vld [vmem:[#allocation11 + $0xa0] sm:$0xff] }
 0x1be   : > { %2468 = vmatpush.msrb.mxu0 %v626_v4  ;;  %2485 = vmatpush.msrb.mxu1 %v778_v5  ;;  %v1211_v4 = vld [vmem:[#allocation11 + $0x300] sm:$0xff]  ;;  %v1992_v5 = vpop.f32.mrf.mxu0 }
 0x1bf   : > { %2429 = vmatpush.msra.mxu2 %v873_v6  ;;  %2446 = vmatpush.msra.mxu3 %v1025_v7  ;;  %v1953_v6 = vadd.f32 %v1952_v51, %v1933_v63  ;;  %v898_v7 = vld [vmem:[#allocation8 + $0x938] sm:$0xff]  ;;  %v1295_v44 = vld [vmem:[#allocation11 + $0x5a0] sm:$0xff] }
 0x1c0   : > { %2469 = vmatpush.msrb.mxu0 %v618_v9  ;;  %2486 = vmatpush.msrb.mxu1 %v770_v11  ;;  %v1050_v9 = vld [vmem:[#allocation8 + $0xdf8] sm:$0xff]  ;;  %v1993_v11 = vadd.f32 %v1992_v5, %v1880_v60  ;;  %v1419_v51 = vld [vmem:[#allocation11 + $0x980] sm:$0xff] }
 0x1c1   : > { %2430 = vmatpush.msra.mxu2 %v865_v62  ;;  %2447 = vmatpush.msra.mxu3 %v1017_v12  ;;  %v1131_v62 = vld [vmem:[#allocation11 + $0x80] sm:$0xff] }
 0x1c2   : > { %2470 = vmatpush.msrb.mxu0 %v610_v13  ;;  %2487 = vmatpush.msrb.mxu1 %v762_v14  ;;  %v1207_v12 = vld [vmem:[#allocation11 + $0x2e0] sm:$0xff]  ;;  %v2012_v13 = vpop.f32.mrf.mxu1  ;;  %v1973_v14 = vadd.f32 %v1972_v56, %v1953_v6 }
 0x1c3   : > { %2431 = vmatmul.f32.vlgmr.msra.gmra.mxu2 %v4244_v58  ;;  %2471 = vmatmul.f32.vlgmr.msrb.gmra.mxu0 %v4234_v10  ;;  %v1114_v10 = vld [vmem:[#allocation8 + $0xff8] sm:$0xff]  ;;  %v1491_v56 = vld [vmem:[#allocation11 + $0xbc0] sm:$0xff] }
 0x1c4   : > { %2495 = vmatpush.msrb.mxu2 %v986_v15  ;;  %2552 = vmatpush.msra.mxu0 %v1175_v16  ;;  %v890_v15 = vld [vmem:[#allocation8 + $0x8f8] sm:$0xff]  ;;  %3615 = vtanh.f32 %v1973_v14  ;;  %v1411_v60 = vld [vmem:[#allocation11 + $0x940] sm:$0xff] }
 0x1c5   : > { %2448 = vmatpush.msra.mxu3 %v1009_v3  ;;  %2488 = vmatpush.msrb.mxu1 %v754_v17  ;;  %v1042_v16 = vld [vmem:[#allocation8 + $0xdb8] sm:$0xff]  ;;  %v1127_v3 = vld [vmem:[#allocation11 + $0x60] sm:$0xff] }
 0x1c6   : > { %2496 = vmatpush.msrb.mxu2 %v978_v18  ;;  %2553 = vmatpush.msra.mxu0 %v1171_v19  ;;  %v1203_v17 = vld [vmem:[#allocation11 + $0x2c0] sm:$0xff]  ;;  %v2032_v18 = vpop.f32.mrf.mxu2  ;;  %v882_v19 = vld [vmem:[#allocation8 + $0x8b8] sm:$0xff] }
 0x1c7   : > { %2449 = vmatpush.msra.mxu3 %v1001_v21  ;;  %2489 = vmatpush.msrb.mxu1 %v746_v22  ;;  %v1034_v21 = vld [vmem:[#allocation8 + $0xd78] sm:$0xff]  ;;  %v2013_v22 = vadd.f32 %v2012_v13, %v1993_v11  ;;  %v1279_v63 = vld [vmem:[#allocation11 + $0x520] sm:$0xff] }
 0x1c8   : > { %2497 = vmatpush.msrb.mxu2 %v970_v23  ;;  %2554 = vmatpush.msra.mxu0 %v1167_v24  ;;  %v1123_v23 = vld [vmem:[#allocation11 + $0x40] sm:$0xff] }
 0x1c9   : > { %2450 = vmatpush.msra.mxu3 %v993_v25  ;;  %2490 = vmatpush.msrb.mxu1 %v738_v26  ;;  %v1199_v24 = vld [vmem:[#allocation11 + $0x2a0] sm:$0xff]  ;;  %v2052_v25 = vpop.f32.mrf.mxu3  ;;  %v874_v26 = vld [vmem:[#allocation8 + $0x878] sm:$0xff] }
 0x1ca   : > { %2451 = vmatmul.f32.vlgmr.msra.gmra.mxu3 %v4248_v8  ;;  %2491 = vmatmul.f32.vlgmr.msrb.gmra.mxu1 %v4237_v20  ;;  %v938_v20 = vld [vmem:[#allocation8 + $0xa78] sm:$0xff]  ;;  %v1275_v5 = vld [vmem:[#allocation11 + $0x500] sm:$0xff] }
 0x1cb   : > { %2498 = vmatpush.msrb.mxu2 %v962_v27  ;;  %2515 = vmatpush.msrb.mxu3 %v1114_v10  ;;  %v1026_v27 = vld [vmem:[#allocation8 + $0xd38] sm:$0xff]  ;;  %v2033_v10 = vadd.f32 %v2032_v18, %v2013_v22  ;;  %v1351_v6 = vld [vmem:[#allocation11 + $0x760] sm:$0xff] }
 0x1cc   : > { %2555 = vmatpush.msra.mxu0 %v1163_v28  ;;  %2572 = vmatpush.msra.mxu1 %v1239_v29  ;;  %v1119_v28 = vld [vmem:[#allocation11 + $0x20] sm:$0xff] }
 0x1cd   : > { %2499 = vmatpush.msrb.mxu2 %v954_v30  ;;  %2516 = vmatpush.msrb.mxu3 %v1106_v31  ;;  %v1195_v29 = vld [vmem:[#allocation11 + $0x280] sm:$0xff]  ;;  %v866_v30 = vld [vmem:[#allocation8 + $0x838] sm:$0xff] }
 0x1ce   : > { %2556 = vmatpush.msra.mxu0 %v1159_v33  ;;  %2573 = vmatpush.msra.mxu1 %v1235_v34  ;;  %v1018_v31 = vld [vmem:[#allocation8 + $0xcf8] sm:$0xff]  ;;  %v2053_v33 = vadd.f32 %v2052_v25, %v2033_v10  ;;  %v1115_v34 = vld [vmem:[#allocation11] sm:$0xff]  ;;  %v2112_v11 = vpop.f32.mrf.mxu2 }
 0x1cf   : > { %2500 = vmatpush.msrb.mxu2 %v946_v35  ;;  %2517 = vmatpush.msrb.mxu3 %v1098_v36  ;;  %v1191_v35 = vld [vmem:[#allocation11 + $0x260] sm:$0xff] }
 0x1d0   : > { %2557 = vmatpush.msra.mxu0 %v1155_v37  ;;  %2574 = vmatpush.msra.mxu1 %v1231_v38  ;;  %v1303_v36 = vld [vmem:[#allocation11 + $0x5e0] sm:$0xff]  ;;  %v4278_v38 = vpop.eup %3615  ;;  %3617 = vtanh.f32 %v2053_v33 }
 0x1d1   : > { %2501 = vmatpush.msrb.mxu2 %v938_v20  ;;  %2518 = vmatpush.msrb.mxu3 %v1090_v41  ;;  %v1431_v37 = vld [vmem:[#allocation11 + $0x9e0] sm:$0xff] }
 0x1d2   : > { %2558 = vmatpush.msra.mxu0 %v1151_v42  ;;  %2575 = vmatpush.msra.mxu1 %v1227_v43  ;;  %v1299_v20 = vld [vmem:[#allocation11 + $0x5c0] sm:$0xff]  ;;  %v1002_v42 = vld [vmem:[#allocation8 + $0xc78] sm:$0xff] }
 0x1d3   : > { %2502 = vmatpush.msrb.mxu2 %v930_v45  ;;  %2519 = vmatpush.msrb.mxu3 %v1082_v46  ;;  %v1427_v41 = vld [vmem:[#allocation11 + $0x9c0] sm:$0xff]  ;;  %v994_v46 = vld [vmem:[#allocation8 + $0xc38] sm:$0xff] }
 0x1d4   : > { %2559 = vmatpush.msra.mxu0 %v1147_v47  ;;  %2576 = vmatpush.msra.mxu1 %v1223_v48  ;;  %v1183_v43 = vld [vmem:[#allocation11 + $0x220] sm:$0xff] }
 0x1d5   : > { %2503 = vmatpush.msrb.mxu2 %v922_v52  ;;  %2520 = vmatpush.msrb.mxu3 %v1074_v53  ;;  %v1423_v45 = vld [vmem:[#allocation11 + $0x9a0] sm:$0xff] }
 0x1d6   : > { %2560 = vmatpush.msra.mxu0 %v1143_v54  ;;  %2577 = vmatpush.msra.mxu1 %v1219_v55  ;;  %v1179_v47 = vld [vmem:[#allocation11 + $0x200] sm:$0xff]  ;;  %v4282_v50 = vpop.eup %3617 }
 0x1d7   : > { %2504 = vmatpush.msrb.mxu2 %v914_v57  ;;  %2521 = vmatpush.msrb.mxu3 %v1066_v59  ;;  %v1367_v48 = vld [vmem:[#allocation11 + $0x7e0] sm:$0xff] }
 0x1d8   : > { %2561 = vmatpush.msra.mxu0 %v1139_v61  ;;  %2578 = vmatpush.msra.mxu1 %v1215_v49  ;;  %v1495_v52 = vld [vmem:[#allocation11 + $0xbe0] sm:$0xff]  ;;  %v2072_v49 = vpop.f32.mrf.mxu0 }
 0x1d9   : > { %2505 = vmatpush.msrb.mxu2 %v906_v0  ;;  %2522 = vmatpush.msrb.mxu3 %v1058_v1  ;;  %v1287_v53 = vld [vmem:[#allocation11 + $0x560] sm:$0xff]  ;;  %v1881_v0 = vperm.slane %v4274_v32, 2 }
 0x1da   : > { %2562 = vmatpush.msra.mxu0 %v1135_v2  ;;  %2579 = vmatpush.msra.mxu1 %v1211_v4  ;;  %v1363_v54 = vld [vmem:[#allocation11 + $0x7c0] sm:$0xff]  ;;  %v2092_v4 = vpop.f32.mrf.mxu1 }
 0x1db   : > { %2506 = vmatpush.msrb.mxu2 %v898_v7  ;;  %2523 = vmatpush.msrb.mxu3 %v1050_v9  ;;  %v1415_v55 = vld [vmem:[#allocation11 + $0x960] sm:$0xff]  ;;  %v2073_v13 = vadd.f32 %v2072_v49, %v1881_v0  ;;  %v1176_v49 = vld [vmem:[#allocation11 + $0x1e8] sm:$0xff] }
 0x1dc   : > { %2563 = vmatpush.msra.mxu0 %v1131_v62  ;;  %2580 = vmatpush.msra.mxu1 %v1207_v12  ;;  %v1283_v57 = vld [vmem:[#allocation11 + $0x540] sm:$0xff] }
 0x1dd   : > { %2507 = vmatpush.msrb.mxu2 %v890_v15  ;;  %2524 = vmatpush.msrb.mxu3 %v1042_v16  ;;  %v1359_v59 = vld [vmem:[#allocation11 + $0x7a0] sm:$0xff]  ;;  %v2132_v16 = vpop.f32.mrf.mxu3  ;;  %v2093_v18 = vadd.f32 %v2092_v4, %v2073_v13 }
 0x1de   : > { %2564 = vmatpush.msra.mxu0 %v1127_v3  ;;  %2581 = vmatpush.msra.mxu1 %v1203_v17  ;;  %v1487_v61 = vld [vmem:[#allocation11 + $0xba0] sm:$0xff] }
 0x1df   : > { %2508 = vmatpush.msrb.mxu2 %v882_v19  ;;  %2525 = vmatpush.msrb.mxu3 %v1034_v21  ;;  %v1407_v1 = vld [vmem:[#allocation11 + $0x920] sm:$0xff]  ;;  %v1882_v19 = vperm.slane %v4274_v32, 3 }
 0x1e0   : > { %2565 = vmatpush.msra.mxu0 %v1123_v23  ;;  %2582 = vmatpush.msra.mxu1 %v1199_v24  ;;  %v1483_v2 = vld [vmem:[#allocation11 + $0xb80] sm:$0xff]  ;;  %v2152_v23 = vpop.f32.mrf.mxu0 }
 0x1e1   : > { %2509 = vmatpush.msrb.mxu2 %v874_v26  ;;  %2526 = vmatpush.msrb.mxu3 %v1026_v27  ;;  %v1403_v7 = vld [vmem:[#allocation11 + $0x900] sm:$0xff]  ;;  %v2113_v26 = vadd.f32 %v2112_v11, %v2093_v18  ;;  %v1168_v11 = vld [vmem:[#allocation11 + $0x1a8] sm:$0xff] }
 0x1e2   : > { %2566 = vmatpush.msra.mxu0 %v1119_v28  ;;  %2583 = vmatpush.msra.mxu1 %v1195_v29  ;;  %v1479_v9 = vld [vmem:[#allocation11 + $0xb60] sm:$0xff]  ;;  %v2172_v28 = vpop.f32.mrf.mxu1 }
 0x1e3   : > { %2510 = vmatpush.msrb.mxu2 %v866_v30  ;;  %2527 = vmatpush.msrb.mxu3 %v1018_v31  ;;  %v1271_v62 = vld [vmem:[#allocation11 + $0x4e0] sm:$0xff]  ;;  %v2153_v31 = vadd.f32 %v2152_v23, %v1882_v19  ;;  %v2133_v33 = vadd.f32 %v2132_v16, %v2113_v26  ;;  %v1160_v19 = vld [vmem:[#allocation11 + $0x168] sm:$0xff] }
 0x1e4   : > { %2567 = vmatpush.msra.mxu0 %v1115_v34  ;;  %2584 = vmatpush.msra.mxu1 %v1191_v35  ;;  %v1347_v12 = vld [vmem:[#allocation11 + $0x740] sm:$0xff]  ;;  %v1156_v23 = vld [vmem:[#allocation11 + $0x148] sm:$0xff] }
 0x1e5   : > { %2511 = vmatmul.f32.vlgmr.msrb.gmra.mxu2 %v4244_v58  ;;  %2568 = vmatmul.f32.vlgmr.msra.gmra.mxu0 %v4278_v38  ;;  %v1291_v58 = vld [vmem:[#allocation11 + $0x580] sm:$0xff]  ;;  %3619 = vtanh.f32 %v2133_v33  ;;  %v1152_v26 = vld [vmem:[#allocation11 + $0x128] sm:$0xff] }
 0x1e6   : > { %2592 = vmatpush.msra.mxu2 %v1303_v36  ;;  %2632 = vmatpush.msrb.mxu0 %v1431_v37  ;;  %v1399_v14 = vld [vmem:[#allocation11 + $0x8e0] sm:$0xff]  ;;  %v2192_v36 = vpop.f32.mrf.mxu2  ;;  %v1144_v33 = vld [vmem:[#allocation11 + $0xe8] sm:$0xff] }
 0x1e7   : > { %2528 = vmatpush.msrb.mxu3 %v1010_v39  ;;  %2585 = vmatpush.msra.mxu1 %v1187_v40  ;;  %v1475_v15 = vld [vmem:[#allocation11 + $0xb40] sm:$0xff]  ;;  %v2173_v40 = vadd.f32 %v2172_v28, %v2153_v31 }
 0x1e8   : > { %2593 = vmatpush.msra.mxu2 %v1299_v20  ;;  %2633 = vmatpush.msrb.mxu0 %v1427_v41  ;;  %v1267_v3 = vld [vmem:[#allocation11 + $0x4c0] sm:$0xff] }
 0x1e9   : > { %2529 = vmatpush.msrb.mxu3 %v1002_v42  ;;  %2586 = vmatpush.msra.mxu1 %v1183_v43  ;;  %v1343_v17 = vld [vmem:[#allocation11 + $0x720] sm:$0xff]  ;;  %v2212_v42 = vpop.f32.mrf.mxu3 }
 0x1ea   : > { %2594 = vmatpush.msra.mxu2 %v1295_v44  ;;  %2634 = vmatpush.msrb.mxu0 %v1423_v45  ;;  %v1395_v21 = vld [vmem:[#allocation11 + $0x8c0] sm:$0xff]  ;;  %v2193_v45 = vadd.f32 %v2192_v36, %v2173_v40  ;;  %v1140_v36 = vld [vmem:[#allocation11 + $0xc8] sm:$0xff] }
 0x1eb   : > { %2530 = vmatpush.msrb.mxu3 %v994_v46  ;;  %2587 = vmatpush.msra.mxu1 %v1179_v47  ;;  %v1471_v22 = vld [vmem:[#allocation11 + $0xb20] sm:$0xff]  ;;  %v1136_v40 = vld [vmem:[#allocation11 + $0xa8] sm:$0xff] }
 0x1ec   : > { %2531 = vmatmul.f32.vlgmr.msrb.gmra.mxu3 %v4248_v8  ;;  %2588 = vmatmul.f32.vlgmr.msra.gmra.mxu1 %v4282_v50  ;;  %v1355_v8 = vld [vmem:[#allocation11 + $0x780] sm:$0xff] }
 0x1ed   : > { %2595 = vmatpush.msra.mxu2 %v1291_v58  ;;  %2612 = vmatpush.msra.mxu3 %v1367_v48  ;;  %v1263_v24 = vld [vmem:[#allocation11 + $0x4a0] sm:$0xff]  ;;  %v1883_v58 = vperm.slane %v4274_v32, 4 }
 0x1ee   : > { %2635 = vmatpush.msrb.mxu0 %v1419_v51  ;;  %2652 = vmatpush.msrb.mxu1 %v1495_v52  ;;  %v1339_v25 = vld [vmem:[#allocation11 + $0x700] sm:$0xff]  ;;  %v2232_v52 = vpop.f32.mrf.mxu0 }
 0x1ef   : > { %2596 = vmatpush.msra.mxu2 %v1287_v53  ;;  %2613 = vmatpush.msra.mxu3 %v1363_v54  ;;  %v1391_v27 = vld [vmem:[#allocation11 + $0x8a0] sm:$0xff]  ;;  %v2213_v53 = vadd.f32 %v2212_v42, %v2193_v45  ;;  %v1132_v42 = vld [vmem:[#allocation11 + $0x88] sm:$0xff] }
 0x1f0   : > { %2636 = vmatpush.msrb.mxu0 %v1415_v55  ;;  %2653 = vmatpush.msrb.mxu1 %v1491_v56  ;;  %v1467_v10 = vld [vmem:[#allocation11 + $0xb00] sm:$0xff]  ;;  %v1128_v45 = vld [vmem:[#allocation11 + $0x68] sm:$0xff] }
 0x1f1   : > { %2597 = vmatpush.msra.mxu2 %v1283_v57  ;;  %2614 = vmatpush.msra.mxu3 %v1359_v59  ;;  %v1259_v29 = vld [vmem:[#allocation11 + $0x480] sm:$0xff]  ;;  %v2252_v59 = vpop.f32.mrf.mxu1  ;;  %3621 = vtanh.f32 %v2213_v53 }
 0x1f2   : > { %2637 = vmatpush.msrb.mxu0 %v1411_v60  ;;  %2654 = vmatpush.msrb.mxu1 %v1487_v61  ;;  %v1335_v30 = vld [vmem:[#allocation11 + $0x6e0] sm:$0xff]  ;;  %v2233_v61 = vadd.f32 %v2232_v52, %v1883_v58 }
 0x1f3   : > { %2598 = vmatpush.msra.mxu2 %v1279_v63  ;;  %2615 = vmatpush.msra.mxu3 %v1355_v8  ;;  %v1387_v34 = vld [vmem:[#allocation11 + $0x880] sm:$0xff]  ;;  %v4289_v8 = vpop.eup %3619 }
 0x1f4   : > { %2638 = vmatpush.msrb.mxu0 %v1407_v1  ;;  %2655 = vmatpush.msrb.mxu1 %v1483_v2  ;;  %v1463_v35 = vld [vmem:[#allocation11 + $0xae0] sm:$0xff]  ;;  %v2253_v4 = vadd.f32 %v2252_v59, %v2233_v61  ;;  %v1884_v59 = vperm.slane %v4274_v32, 5  ;;  %v1196_v61 = vld [vmem:[#allocation11 + $0x288] sm:$0xff] }
 0x1f5   : > { %2599 = vmatpush.msra.mxu2 %v1275_v5  ;;  %2616 = vmatpush.msra.mxu3 %v1351_v6  ;;  %v1255_v37 = vld [vmem:[#allocation11 + $0x460] sm:$0xff]  ;;  %v1172_v5 = vld [vmem:[#allocation11 + $0x1c8] sm:$0xff] }
 0x1f6   : > { %2639 = vmatpush.msrb.mxu0 %v1403_v7  ;;  %2656 = vmatpush.msrb.mxu1 %v1479_v9  ;;  %v1331_v39 = vld [vmem:[#allocation11 + $0x6c0] sm:$0xff]  ;;  %v1428_v32 = vld [vmem:[#allocation11 + $0x9c8] sm:$0xff] }
 0x1f7   : > { %2600 = vmatpush.msra.mxu2 %v1271_v62  ;;  %2617 = vmatpush.msra.mxu3 %v1347_v12  ;;  %v1383_v20 = vld [vmem:[#allocation11 + $0x860] sm:$0xff] }
 0x1f8   : > { %2640 = vmatpush.msrb.mxu0 %v1399_v14  ;;  %2657 = vmatpush.msrb.mxu1 %v1475_v15  ;;  %v1459_v41 = vld [vmem:[#allocation11 + $0xac0] sm:$0xff]  ;;  %v1164_v15 = vld [vmem:[#allocation11 + $0x188] sm:$0xff] }
 0x1f9   : > { %2601 = vmatpush.msra.mxu2 %v1267_v3  ;;  %2618 = vmatpush.msra.mxu3 %v1343_v17  ;;  %v1251_v43 = vld [vmem:[#allocation11 + $0x440] sm:$0xff]  ;;  %v4292_v17 = vpop.eup %3621 }
 0x1fa   : > { %2641 = vmatpush.msrb.mxu0 %v1395_v21  ;;  %2658 = vmatpush.msrb.mxu1 %v1471_v22  ;;  %v1327_v44 = vld [vmem:[#allocation11 + $0x6a0] sm:$0xff]  ;;  %v1240_v21 = vld [vmem:[#allocation11 + $0x3e8] sm:$0xff] }
 0x1fb   : > { %2602 = vmatpush.msra.mxu2 %v1263_v24  ;;  %2619 = vmatpush.msra.mxu3 %v1339_v25  ;;  %v1379_v46 = vld [vmem:[#allocation11 + $0x840] sm:$0xff]  ;;  %v1236_v24 = vld [vmem:[#allocation11 + $0x3c8] sm:$0xff] }
 0x1fc   : > { %2642 = vmatpush.msrb.mxu0 %v1391_v27  ;;  %2659 = vmatpush.msrb.mxu1 %v1467_v10  ;;  %v1455_v47 = vld [vmem:[#allocation11 + $0xaa0] sm:$0xff]  ;;  %v1232_v27 = vld [vmem:[#allocation11 + $0x3a8] sm:$0xff] }
 0x1fd   : > { %2603 = vmatpush.msra.mxu2 %v1259_v29  ;;  %2620 = vmatpush.msra.mxu3 %v1335_v30  ;;  %v1247_v48 = vld [vmem:[#allocation11 + $0x420] sm:$0xff]  ;;  %v1148_v29 = vld [vmem:[#allocation11 + $0x108] sm:$0xff] }
 0x1fe   : > { %2643 = vmatpush.msrb.mxu0 %v1387_v34  ;;  %2660 = vmatpush.msrb.mxu1 %v1463_v35  ;;  %v1323_v51 = vld [vmem:[#allocation11 + $0x680] sm:$0xff]  ;;  %v1228_v30 = vld [vmem:[#allocation11 + $0x388] sm:$0xff] }
 0x1ff   : > { %2604 = vmatpush.msra.mxu2 %v1255_v37  ;;  %2621 = vmatpush.msra.mxu3 %v1331_v39  ;;  %v1375_v54 = vld [vmem:[#allocation11 + $0x820] sm:$0xff]  ;;  %v1224_v34 = vld [vmem:[#allocation11 + $0x368] sm:$0xff] }
 0x200   : > { %2644 = vmatpush.msrb.mxu0 %v1383_v20  ;;  %2661 = vmatpush.msrb.mxu1 %v1459_v41  ;;  %v1451_v55 = vld [vmem:[#allocation11 + $0xa80] sm:$0xff]  ;;  %v1220_v37 = vld [vmem:[#allocation11 + $0x348] sm:$0xff] }
 0x201   : > { %2605 = vmatpush.msra.mxu2 %v1251_v43  ;;  %2622 = vmatpush.msra.mxu3 %v1327_v44  ;;  %v1243_v56 = vld [vmem:[#allocation11 + $0x400] sm:$0xff]  ;;  %v1216_v20 = vld [vmem:[#allocation11 + $0x328] sm:$0xff] }
 0x202   : > { %2645 = vmatpush.msrb.mxu0 %v1379_v46  ;;  %v1319_v57 = vld [vmem:[#allocation11 + $0x660] sm:$0xff]  ;;  %2662 = vmatpush.msrb.mxu1 %v1455_v47  ;;  %v2272_v0 = vpop.f32.mrf.mxu2  ;;  %v1212_v43 = vld [vmem:[#allocation11 + $0x308] sm:$0xff] }
 0x203   : > { %2606 = vmatpush.msra.mxu2 %v1247_v48  ;;  %2623 = vmatpush.msra.mxu3 %v1323_v51  ;;  %v1371_v60 = vld [vmem:[#allocation11 + $0x800] sm:$0xff]  ;;  %v2273_v12 = vadd.f32 %v2272_v0, %v2253_v4  ;;  %v1208_v46 = vld [vmem:[#allocation11 + $0x2e8] sm:$0xff]  ;;  %v2332_v4 = vpop.f32.mrf.mxu1 }
 0x204   : > { %2646 = vmatpush.msrb.mxu0 %v1375_v54  ;;  %v1315_v63 = vld [vmem:[#allocation11 + $0x640] sm:$0xff]  ;;  %2663 = vmatpush.msrb.mxu1 %v1451_v55  ;;  %v1124_v48 = vld [vmem:[#allocation11 + $0x48] sm:$0xff] }
 0x205   : > { %2607 = vmatpush.msra.mxu2 %v1243_v56  ;;  %2624 = vmatpush.msra.mxu3 %v1319_v57  ;;  %v1447_v1 = vld [vmem:[#allocation11 + $0xa60] sm:$0xff]  ;;  %v1204_v51 = vld [vmem:[#allocation11 + $0x2c8] sm:$0xff] }
 0x206   : > { %v1559_v2 = vld [vmem:[#allocation11 + $0xde0] sm:$0xff]  ;;  %2647 = vmatpush.msrb.mxu0 %v1371_v60  ;;  %2608 = vmatmul.f32.vlgmr.msra.gmra.mxu2 %v4289_v8  ;;  %v1120_v54 = vld [vmem:[#allocation11 + $0x28] sm:$0xff] }
 0x207   : > { %v1311_v6 = vld [vmem:[#allocation11 + $0x620] sm:$0xff]  ;;  %2625 = vmatpush.msra.mxu3 %v1315_v63  ;;  %2664 = vmatpush.msrb.mxu1 %v1447_v1  ;;  %v1200_v55 = vld [vmem:[#allocation11 + $0x2a8] sm:$0xff] }
 0x208   : > { %2712 = vmatpush.msra.mxu0 %v1176_v49  ;;  %v1443_v7 = vld [vmem:[#allocation11 + $0xa40] sm:$0xff]  ;;  %2672 = vmatpush.msrb.mxu2 %v1559_v2  ;;  %v1116_v60 = vld [vmem:[#allocation11 + $0x8] sm:$0xff]  ;;  %v2312_v49 = vpop.f32.mrf.mxu0 }
 0x209   : > { %v1555_v9 = vld [vmem:[#allocation11 + $0xdc0] sm:$0xff]  ;;  %2626 = vmatpush.msra.mxu3 %v1311_v6  ;;  %v2292_v13 = vpop.f32.mrf.mxu3  ;;  %2665 = vmatpush.msrb.mxu1 %v1443_v7  ;;  %v1432_v1 = vld [vmem:[#allocation11 + $0x9e8] sm:$0xff]  ;;  %v2313_v7 = vadd.f32 %v2312_v49, %v1884_v59 }
 0x20a   : > { %v1307_v62 = vld [vmem:[#allocation11 + $0x600] sm:$0xff]  ;;  %2713 = vmatpush.msra.mxu0 %v1172_v5  ;;  %v2293_v16 = vadd.f32 %v2292_v13, %v2273_v12  ;;  %2673 = vmatpush.msrb.mxu2 %v1555_v9  ;;  %v1192_v2 = vld [vmem:[#allocation11 + $0x268] sm:$0xff] }
 0x20b   : > { %v1439_v14 = vld [vmem:[#allocation11 + $0xa20] sm:$0xff]  ;;  %2627 = vmatpush.msra.mxu3 %v1307_v62  ;;  %v1188_v9 = vld [vmem:[#allocation11 + $0x248] sm:$0xff]  ;;  %v2333_v13 = vadd.f32 %v2332_v4, %v2313_v7 }
 0x20c   : > { %v1551_v3 = vld [vmem:[#allocation11 + $0xda0] sm:$0xff]  ;;  %2714 = vmatpush.msra.mxu0 %v1168_v11  ;;  %2628 = vmatmul.f32.vlgmr.msra.gmra.mxu3 %v4292_v17  ;;  %3623 = vtanh.f32 %v2293_v16  ;;  %v1304_v62 = vld [vmem:[#allocation11 + $0x5e8] sm:$0xff] }
 0x20d   : > { %v1435_v18 = vld [vmem:[#allocation11 + $0xa00] sm:$0xff]  ;;  %2666 = vmatpush.msrb.mxu1 %v1439_v14  ;;  %2674 = vmatpush.msrb.mxu2 %v1551_v3  ;;  %v1424_v14 = vld [vmem:[#allocation11 + $0x9a8] sm:$0xff] }
 0x20e   : > { %2715 = vmatpush.msra.mxu0 %v1164_v15  ;;  %v1547_v22 = vld [vmem:[#allocation11 + $0xd80] sm:$0xff]  ;;  %v1184_v15 = vld [vmem:[#allocation11 + $0x228] sm:$0xff] }
 0x20f   : > { %2667 = vmatpush.msrb.mxu1 %v1435_v18  ;;  %v1543_v25 = vld [vmem:[#allocation11 + $0xd60] sm:$0xff]  ;;  %2675 = vmatpush.msrb.mxu2 %v1547_v22  ;;  %v1300_v16 = vld [vmem:[#allocation11 + $0x5c8] sm:$0xff] }
 0x210   : > { %2716 = vmatpush.msra.mxu0 %v1160_v19  ;;  %v1539_v10 = vld [vmem:[#allocation11 + $0xd40] sm:$0xff]  ;;  %v1420_v18 = vld [vmem:[#allocation11 + $0x988] sm:$0xff] }
 0x211   : > { %2732 = vmatpush.msra.mxu1 %v1240_v21  ;;  %2676 = vmatpush.msrb.mxu2 %v1543_v25  ;;  %v1535_v31 = vld [vmem:[#allocation11 + $0xd20] sm:$0xff]  ;;  %v1180_v21 = vld [vmem:[#allocation11 + $0x208] sm:$0xff] }
 0x212   : > { %2717 = vmatpush.msra.mxu0 %v1156_v23  ;;  %v4295_v28 = vpop.eup %3623  ;;  %v1531_v35 = vld [vmem:[#allocation11 + $0xd00] sm:$0xff]  ;;  %v1296_v23 = vld [vmem:[#allocation11 + $0x5a8] sm:$0xff] }
 0x213   : > { %2733 = vmatpush.msra.mxu1 %v1236_v24  ;;  %2648 = vmatmul.f32.vlgmr.msrb.gmra.mxu0 %v4295_v28  ;;  %v1527_v39 = vld [vmem:[#allocation11 + $0xce0] sm:$0xff]  ;;  %v1416_v25 = vld [vmem:[#allocation11 + $0x968] sm:$0xff] }
 0x214   : > { %2718 = vmatpush.msra.mxu0 %v1152_v26  ;;  %2677 = vmatpush.msrb.mxu2 %v1539_v10  ;;  %v1523_v41 = vld [vmem:[#allocation11 + $0xcc0] sm:$0xff]  ;;  %v1476_v59 = vld [vmem:[#allocation11 + $0xb48] sm:$0xff] }
 0x215   : > { %2734 = vmatpush.msra.mxu1 %v1232_v27  ;;  %v1519_v44 = vld [vmem:[#allocation11 + $0xca0] sm:$0xff]  ;;  %v1292_v27 = vld [vmem:[#allocation11 + $0x588] sm:$0xff] }
 0x216   : > { %2719 = vmatpush.msra.mxu0 %v1148_v29  ;;  %2678 = vmatpush.msrb.mxu2 %v1535_v31  ;;  %v1515_v47 = vld [vmem:[#allocation11 + $0xc80] sm:$0xff]  ;;  %v1412_v29 = vld [vmem:[#allocation11 + $0x948] sm:$0xff] }
 0x217   : > { %2735 = vmatpush.msra.mxu1 %v1228_v30  ;;  %v1623_v58 = vld [vmem:[#allocation11 + $0xfe0] sm:$0xff]  ;;  %v1288_v30 = vld [vmem:[#allocation11 + $0x568] sm:$0xff] }
 0x218   : > { %2720 = vmatpush.msra.mxu0 %v1144_v33  ;;  %2679 = vmatpush.msrb.mxu2 %v1531_v35  ;;  %v1511_v52 = vld [vmem:[#allocation11 + $0xc60] sm:$0xff]  ;;  %v1408_v33 = vld [vmem:[#allocation11 + $0x928] sm:$0xff] }
 0x219   : > { %2736 = vmatpush.msra.mxu1 %v1224_v34  ;;  %2692 = vmatpush.msrb.mxu3 %v1623_v58  ;;  %v1619_v53 = vld [vmem:[#allocation11 + $0xfc0] sm:$0xff]  ;;  %v1284_v34 = vld [vmem:[#allocation11 + $0x548] sm:$0xff] }
 0x21a   : > { %2721 = vmatpush.msra.mxu0 %v1140_v36  ;;  %2680 = vmatpush.msrb.mxu2 %v1527_v39  ;;  %v1507_v56 = vld [vmem:[#allocation11 + $0xc40] sm:$0xff]  ;;  %v1404_v36 = vld [vmem:[#allocation11 + $0x908] sm:$0xff] }
 0x21b   : > { %2737 = vmatpush.msra.mxu1 %v1220_v37  ;;  %2693 = vmatpush.msrb.mxu3 %v1619_v53  ;;  %v1615_v57 = vld [vmem:[#allocation11 + $0xfa0] sm:$0xff]  ;;  %v1496_v37 = vld [vmem:[#allocation11 + $0xbe8] sm:$0xff] }
 0x21c   : > { %2722 = vmatpush.msra.mxu0 %v1136_v40  ;;  %2681 = vmatpush.msrb.mxu2 %v1523_v41  ;;  %v1503_v63 = vld [vmem:[#allocation11 + $0xc20] sm:$0xff]  ;;  %v1280_v39 = vld [vmem:[#allocation11 + $0x528] sm:$0xff] }
 0x21d   : > { %2738 = vmatpush.msra.mxu1 %v1216_v20  ;;  %2694 = vmatpush.msrb.mxu3 %v1615_v57  ;;  %v1611_v0 = vld [vmem:[#allocation11 + $0xf80] sm:$0xff]  ;;  %v1400_v20 = vld [vmem:[#allocation11 + $0x8e8] sm:$0xff] }
 0x21e   : > { %2723 = vmatpush.msra.mxu0 %v1132_v42  ;;  %2682 = vmatpush.msrb.mxu2 %v1519_v44  ;;  %v1499_v5 = vld [vmem:[#allocation11 + $0xc00] sm:$0xff]  ;;  %v1492_v42 = vld [vmem:[#allocation11 + $0xbc8] sm:$0xff] }
 0x21f   : > { %2739 = vmatpush.msra.mxu1 %v1212_v43  ;;  %2695 = vmatpush.msrb.mxu3 %v1611_v0  ;;  %v1607_v6 = vld [vmem:[#allocation11 + $0xf60] sm:$0xff]  ;;  %v1276_v43 = vld [vmem:[#allocation11 + $0x508] sm:$0xff] }
 0x220   : > { %2724 = vmatpush.msra.mxu0 %v1128_v45  ;;  %2683 = vmatpush.msrb.mxu2 %v1515_v47  ;;  %v1603_v12 = vld [vmem:[#allocation11 + $0xf40] sm:$0xff]  ;;  %v1396_v44 = vld [vmem:[#allocation11 + $0x8c8] sm:$0xff] }
 0x221   : > { %2740 = vmatpush.msra.mxu1 %v1208_v46  ;;  %2696 = vmatpush.msrb.mxu3 %v1607_v6  ;;  %v1599_v3 = vld [vmem:[#allocation11 + $0xf20] sm:$0xff]  ;;  %v1488_v46 = vld [vmem:[#allocation11 + $0xba8] sm:$0xff] }
 0x222   : > { %2725 = vmatpush.msra.mxu0 %v1124_v48  ;;  %2684 = vmatpush.msrb.mxu2 %v1511_v52  ;;  %v1595_v24 = vld [vmem:[#allocation11 + $0xf00] sm:$0xff]  ;;  %v1272_v47 = vld [vmem:[#allocation11 + $0x4e8] sm:$0xff] }
 0x223   : > { %2741 = vmatpush.msra.mxu1 %v1204_v51  ;;  %2697 = vmatpush.msrb.mxu3 %v1603_v12  ;;  %v1591_v10 = vld [vmem:[#allocation11 + $0xee0] sm:$0xff]  ;;  %v1392_v58 = vld [vmem:[#allocation11 + $0x8a8] sm:$0xff] }
 0x224   : > { %2726 = vmatpush.msra.mxu0 %v1120_v54  ;;  %2685 = vmatpush.msrb.mxu2 %v1507_v56  ;;  %v2352_v11 = vpop.f32.mrf.mxu2  ;;  %v1587_v31 = vld [vmem:[#allocation11 + $0xec0] sm:$0xff]  ;;  %v1484_v51 = vld [vmem:[#allocation11 + $0xb88] sm:$0xff] }
 0x225   : > { %2742 = vmatpush.msra.mxu1 %v1200_v55  ;;  %v2353_v19 = vadd.f32 %v2352_v11, %v2333_v13  ;;  %2698 = vmatpush.msrb.mxu3 %v1599_v3  ;;  %v1583_v35 = vld [vmem:[#allocation11 + $0xea0] sm:$0xff]  ;;  %v1268_v52 = vld [vmem:[#allocation11 + $0x4c8] sm:$0xff]  ;;  %v2392_v13 = vpop.f32.mrf.mxu0 }
 0x226   : > { %2727 = vmatpush.msra.mxu0 %v1116_v60  ;;  %2686 = vmatpush.msrb.mxu2 %v1503_v63  ;;  %v1579_v41 = vld [vmem:[#allocation11 + $0xe80] sm:$0xff]  ;;  %v1388_v53 = vld [vmem:[#allocation11 + $0x888] sm:$0xff] }
 0x227   : > { %2743 = vmatpush.msra.mxu1 %v1196_v61  ;;  %2728 = vmatmul.f32.vlgmr.msra.gmra.mxu0 %v4278_v38  ;;  %v1575_v45 = vld [vmem:[#allocation11 + $0xe60] sm:$0xff]  ;;  %v1480_v54 = vld [vmem:[#allocation11 + $0xb68] sm:$0xff] }
 0x228   : > { %2792 = vmatpush.msrb.mxu0 %v1432_v1  ;;  %2687 = vmatpush.msrb.mxu2 %v1499_v5  ;;  %v1571_v48 = vld [vmem:[#allocation11 + $0xe40] sm:$0xff]  ;;  %v1264_v55 = vld [vmem:[#allocation11 + $0x4a8] sm:$0xff] }
 0x229   : > { %2744 = vmatpush.msra.mxu1 %v1192_v2  ;;  %2699 = vmatpush.msrb.mxu3 %v1595_v24  ;;  %v1384_v56 = vld [vmem:[#allocation11 + $0x868] sm:$0xff]  ;;  %v1567_v57 = vld [vmem:[#allocation11 + $0xe20] sm:$0xff] }
 0x22a   : > { %2793 = vmatpush.msrb.mxu0 %v1428_v32  ;;  %2752 = vmatpush.msra.mxu2 %v1304_v62  ;;  %v1260_v60 = vld [vmem:[#allocation11 + $0x488] sm:$0xff]  ;;  %v1563_v49 = vld [vmem:[#allocation11 + $0xe00] sm:$0xff]  ;;  %v1177_v62 = vld [vmem:[#allocation11 + $0x1f0] sm:$0xff] }
 0x22b   : > { %2745 = vmatpush.msra.mxu1 %v1188_v9  ;;  %v2372_v22 = vpop.f32.mrf.mxu3  ;;  %2700 = vmatpush.msrb.mxu3 %v1591_v10  ;;  %v1380_v61 = vld [vmem:[#allocation11 + $0x848] sm:$0xff]  ;;  %v4304_v9 = vld [vmem:[#allocation10] sm:$0xff]  ;;  %v1165_v10 = vld [vmem:[#allocation11 + $0x190] sm:$0xff] }
 0x22c   : > { %2794 = vmatpush.msrb.mxu0 %v1424_v14  ;;  %v2373_v26 = vadd.f32 %v2372_v22, %v2353_v19  ;;  %2753 = vmatpush.msra.mxu2 %v1300_v16  ;;  %v1472_v63 = vld [vmem:[#allocation11 + $0xb28] sm:$0xff]  ;;  %v1885_v11 = vperm.slane %v4304_v9, 6  ;;  %v1173_v16 = vld [vmem:[#allocation11 + $0x1d0] sm:$0xff] }
 0x22d   : > { %2746 = vmatpush.msra.mxu1 %v1184_v15  ;;  %2701 = vmatpush.msrb.mxu3 %v1587_v31  ;;  %v1256_v0 = vld [vmem:[#allocation11 + $0x468] sm:$0xff] }
 0x22e   : > { %2795 = vmatpush.msrb.mxu0 %v1420_v18  ;;  %3625 = vtanh.f32 %v2373_v26  ;;  %2754 = vmatpush.msra.mxu2 %v1296_v23  ;;  %v1376_v1 = vld [vmem:[#allocation11 + $0x828] sm:$0xff]  ;;  %v2412_v18 = vpop.f32.mrf.mxu1  ;;  %v2393_v22 = vadd.f32 %v2392_v13, %v1885_v11  ;;  %v1169_v23 = vld [vmem:[#allocation11 + $0x1b0] sm:$0xff] }
 0x22f   : > { %2747 = vmatpush.msra.mxu1 %v1180_v21  ;;  %2702 = vmatpush.msrb.mxu3 %v1583_v35  ;;  %v1368_v2 = vld [vmem:[#allocation11 + $0x7e8] sm:$0xff]  ;;  %v1217_v11 = vld [vmem:[#allocation11 + $0x330] sm:$0xff] }
 0x230   : > { %2796 = vmatpush.msrb.mxu0 %v1416_v25  ;;  %2755 = vmatpush.msra.mxu2 %v1292_v27  ;;  %v1468_v4 = vld [vmem:[#allocation11 + $0xb08] sm:$0xff]  ;;  %v2413_v27 = vadd.f32 %v2412_v18, %v2393_v22  ;;  %v1433_v18 = vld [vmem:[#allocation11 + $0x9f0] sm:$0xff]  ;;  %v1886_v22 = vperm.slane %v4304_v9, 7 }
 0x231   : > { %2703 = vmatpush.msrb.mxu3 %v1579_v41  ;;  %v1252_v5 = vld [vmem:[#allocation11 + $0x448] sm:$0xff]  ;;  %v1197_v9 = vld [vmem:[#allocation11 + $0x290] sm:$0xff] }
 0x232   : > { %2797 = vmatpush.msrb.mxu0 %v1412_v29  ;;  %2756 = vmatpush.msra.mxu2 %v1288_v30  ;;  %v1372_v6 = vld [vmem:[#allocation11 + $0x808] sm:$0xff] }
 0x233   : > { %2704 = vmatpush.msrb.mxu3 %v1575_v45  ;;  %v1364_v7 = vld [vmem:[#allocation11 + $0x7c8] sm:$0xff]  ;;  %v1149_v45 = vld [vmem:[#allocation11 + $0x110] sm:$0xff] }
 0x234   : > { %2798 = vmatpush.msrb.mxu0 %v1408_v33  ;;  %v4300_v40 = vpop.eup %3625  ;;  %2757 = vmatpush.msra.mxu2 %v1284_v34  ;;  %v1464_v32 = vld [vmem:[#allocation11 + $0xae8] sm:$0xff]  ;;  %v1161_v33 = vld [vmem:[#allocation11 + $0x170] sm:$0xff] }
 0x235   : > { %2668 = vmatmul.f32.vlgmr.msrb.gmra.mxu1 %v4300_v40  ;;  %2705 = vmatpush.msrb.mxu3 %v1571_v48  ;;  %v1248_v12 = vld [vmem:[#allocation11 + $0x428] sm:$0xff] }
 0x236   : > { %2799 = vmatpush.msrb.mxu0 %v1404_v36  ;;  %2812 = vmatpush.msrb.mxu1 %v1496_v37  ;;  %v1460_v14 = vld [vmem:[#allocation11 + $0xac8] sm:$0xff]  ;;  %v1157_v37 = vld [vmem:[#allocation11 + $0x150] sm:$0xff] }
 0x237   : > { %2758 = vmatpush.msra.mxu2 %v1280_v39  ;;  %2706 = vmatpush.msrb.mxu3 %v1567_v57  ;;  %v1360_v15 = vld [vmem:[#allocation11 + $0x7a8] sm:$0xff]  ;;  %v1137_v57 = vld [vmem:[#allocation11 + $0xb0] sm:$0xff] }
 0x238   : > { %2800 = vmatpush.msrb.mxu0 %v1400_v20  ;;  %2813 = vmatpush.msrb.mxu1 %v1492_v42  ;;  %v1244_v3 = vld [vmem:[#allocation11 + $0x408] sm:$0xff]  ;;  %v1153_v42 = vld [vmem:[#allocation11 + $0x130] sm:$0xff] }
 0x239   : > { %2759 = vmatpush.msra.mxu2 %v1276_v43  ;;  %2707 = vmatpush.msrb.mxu3 %v1563_v49  ;;  %v1456_v19 = vld [vmem:[#allocation11 + $0xaa8] sm:$0xff]  ;;  %v1133_v49 = vld [vmem:[#allocation11 + $0x90] sm:$0xff] }
 0x23a   : > { %2801 = vmatpush.msrb.mxu0 %v1396_v44  ;;  %2814 = vmatpush.msrb.mxu1 %v1488_v46  ;;  %v1356_v21 = vld [vmem:[#allocation11 + $0x788] sm:$0xff]  ;;  %v1241_v46 = vld [vmem:[#allocation11 + $0x3f0] sm:$0xff] }
 0x23b   : > { %2760 = vmatpush.msra.mxu2 %v1272_v47  ;;  %2772 = vmatpush.msra.mxu3 %v1368_v2  ;;  %v1452_v25 = vld [vmem:[#allocation11 + $0xa88] sm:$0xff]  ;;  %v1129_v2 = vld [vmem:[#allocation11 + $0x70] sm:$0xff] }
 0x23c   : > { %2802 = vmatpush.msrb.mxu0 %v1392_v58  ;;  %2815 = vmatpush.msrb.mxu1 %v1484_v51  ;;  %v1352_v26 = vld [vmem:[#allocation11 + $0x768] sm:$0xff]  ;;  %v1145_v58 = vld [vmem:[#allocation11 + $0xf0] sm:$0xff] }
 0x23d   : > { %2761 = vmatpush.msra.mxu2 %v1268_v52  ;;  %2748 = vmatmul.f32.vlgmr.msra.gmra.mxu1 %v4282_v50  ;;  %v1448_v29 = vld [vmem:[#allocation11 + $0xa68] sm:$0xff]  ;;  %v1237_v51 = vld [vmem:[#allocation11 + $0x3d0] sm:$0xff] }
 0x23e   : > { %2803 = vmatpush.msrb.mxu0 %v1388_v53  ;;  %2816 = vmatpush.msrb.mxu1 %v1480_v54  ;;  %v1348_v30 = vld [vmem:[#allocation11 + $0x748] sm:$0xff]  ;;  %v1141_v53 = vld [vmem:[#allocation11 + $0xd0] sm:$0xff] }
 0x23f   : > { %2762 = vmatpush.msra.mxu2 %v1264_v55  ;;  %2773 = vmatpush.msra.mxu3 %v1364_v7  ;;  %v1444_v35 = vld [vmem:[#allocation11 + $0xa48] sm:$0xff] }
 0x240   : > { %2804 = vmatpush.msrb.mxu0 %v1384_v56  ;;  %2817 = vmatpush.msrb.mxu1 %v1476_v59  ;;  %v1344_v36 = vld [vmem:[#allocation11 + $0x728] sm:$0xff]  ;;  %v1233_v56 = vld [vmem:[#allocation11 + $0x3b0] sm:$0xff] }
 0x241   : > { %2763 = vmatpush.msra.mxu2 %v1260_v60  ;;  %2774 = vmatpush.msra.mxu3 %v1360_v15  ;;  %v1440_v20 = vld [vmem:[#allocation11 + $0xa28] sm:$0xff]  ;;  %v1117_v15 = vld [vmem:[#allocation11 + $0x10] sm:$0xff] }
 0x242   : > { %2805 = vmatpush.msrb.mxu0 %v1380_v61  ;;  %2818 = vmatpush.msrb.mxu1 %v1472_v63  ;;  %v1340_v41 = vld [vmem:[#allocation11 + $0x708] sm:$0xff]  ;;  %v1229_v61 = vld [vmem:[#allocation11 + $0x390] sm:$0xff] }
 0x243   : > { %2764 = vmatpush.msra.mxu2 %v1256_v0  ;;  %2775 = vmatpush.msra.mxu3 %v1356_v21  ;;  %v1436_v43 = vld [vmem:[#allocation11 + $0xa08] sm:$0xff] }
 0x244   : > { %2806 = vmatpush.msrb.mxu0 %v1376_v1  ;;  %2819 = vmatpush.msrb.mxu1 %v1468_v4  ;;  %v1336_v44 = vld [vmem:[#allocation11 + $0x6e8] sm:$0xff]  ;;  %v1225_v1 = vld [vmem:[#allocation11 + $0x370] sm:$0xff] }
 0x245   : > { %2765 = vmatpush.msra.mxu2 %v1252_v5  ;;  %2776 = vmatpush.msra.mxu3 %v1352_v26  ;;  %v1332_v47 = vld [vmem:[#allocation11 + $0x6c8] sm:$0xff]  ;;  %v1221_v5 = vld [vmem:[#allocation11 + $0x350] sm:$0xff] }
 0x246   : > { %2807 = vmatpush.msrb.mxu0 %v1372_v6  ;;  %2820 = vmatpush.msrb.mxu1 %v1464_v32  ;;  %v2432_v24 = vpop.f32.mrf.mxu2  ;;  %v1560_v48 = vld [vmem:[#allocation11 + $0xde8] sm:$0xff]  ;;  %v1125_v6 = vld [vmem:[#allocation11 + $0x50] sm:$0xff] }
 0x247   : > { %2808 = vmatmul.f32.vlgmr.msrb.gmra.mxu0 %v4295_v28  ;;  %2766 = vmatpush.msra.mxu2 %v1248_v12  ;;  %v2433_v31 = vadd.f32 %v2432_v24, %v2413_v27  ;;  %v1328_v54 = vld [vmem:[#allocation11 + $0x6a8] sm:$0xff]  ;;  %v1205_v24 = vld [vmem:[#allocation11 + $0x2d0] sm:$0xff] }
 0x248   : > { %2872 = vmatpush.msra.mxu0 %v1177_v62  ;;  %2821 = vmatpush.msrb.mxu1 %v1460_v14  ;;  %v1556_v55 = vld [vmem:[#allocation11 + $0xdc8] sm:$0xff]  ;;  %v1121_v62 = vld [vmem:[#allocation11 + $0x30] sm:$0xff] }
 0x249   : > { %2767 = vmatpush.msra.mxu2 %v1244_v3  ;;  %2777 = vmatpush.msra.mxu3 %v1348_v30  ;;  %v1324_v59 = vld [vmem:[#allocation11 + $0x688] sm:$0xff]  ;;  %v1213_v14 = vld [vmem:[#allocation11 + $0x310] sm:$0xff] }
 0x24a   : > { %2873 = vmatpush.msra.mxu0 %v1173_v16  ;;  %2822 = vmatpush.msrb.mxu1 %v1456_v19  ;;  %v1552_v60 = vld [vmem:[#allocation11 + $0xda8] sm:$0xff]  ;;  %v1209_v19 = vld [vmem:[#allocation11 + $0x2f0] sm:$0xff] }
 0x24b   : > { %2778 = vmatpush.msra.mxu3 %v1344_v36  ;;  %v1320_v63 = vld [vmem:[#allocation11 + $0x668] sm:$0xff]  ;;  %v1425_v27 = vld [vmem:[#allocation11 + $0x9b0] sm:$0xff] }
 0x24c   : > { %2874 = vmatpush.msra.mxu0 %v1169_v23  ;;  %2823 = vmatpush.msrb.mxu1 %v1452_v25  ;;  %v1548_v0 = vld [vmem:[#allocation11 + $0xd88] sm:$0xff]  ;;  %v1429_v23 = vld [vmem:[#allocation11 + $0x9d0] sm:$0xff]  ;;  %v2472_v25 = vpop.f32.mrf.mxu0 }
 0x24d   : > { %v2452_v34 = vpop.f32.mrf.mxu3  ;;  %2779 = vmatpush.msra.mxu3 %v1340_v41  ;;  %v1544_v4 = vld [vmem:[#allocation11 + $0xd68] sm:$0xff] }
 0x24e   : > { %2875 = vmatpush.msra.mxu0 %v1165_v10  ;;  %v2453_v39 = vadd.f32 %v2452_v34, %v2433_v31  ;;  %2824 = vmatpush.msrb.mxu1 %v1448_v29  ;;  %v1316_v7 = vld [vmem:[#allocation11 + $0x648] sm:$0xff]  ;;  %v1201_v10 = vld [vmem:[#allocation11 + $0x2b0] sm:$0xff]  ;;  %v2492_v29 = vpop.f32.mrf.mxu1  ;;  %v2473_v31 = vadd.f32 %v2472_v25, %v1886_v22 }
 0x24f   : > { %2780 = vmatpush.msra.mxu3 %v1336_v44  ;;  %v1540_v32 = vld [vmem:[#allocation11 + $0xd48] sm:$0xff]  ;;  %v1281_v22 = vld [vmem:[#allocation11 + $0x530] sm:$0xff] }
 0x250   : > { %2876 = vmatpush.msra.mxu0 %v1161_v33  ;;  %3627 = vtanh.f32 %v2453_v39  ;;  %2825 = vmatpush.msrb.mxu1 %v1444_v35  ;;  %v1312_v12 = vld [vmem:[#allocation11 + $0x628] sm:$0xff]  ;;  %v1421_v33 = vld [vmem:[#allocation11 + $0x990] sm:$0xff]  ;;  %v2493_v36 = vadd.f32 %v2492_v29, %v2473_v31 }
 0x251   : > { %2781 = vmatpush.msra.mxu3 %v1332_v47  ;;  %v1536_v13 = vld [vmem:[#allocation11 + $0xd28] sm:$0xff]  ;;  %v1193_v39 = vld [vmem:[#allocation11 + $0x270] sm:$0xff] }
 0x252   : > { %2877 = vmatpush.msra.mxu0 %v1157_v37  ;;  %2826 = vmatpush.msrb.mxu1 %v1440_v20  ;;  %v1308_v16 = vld [vmem:[#allocation11 + $0x608] sm:$0xff]  ;;  %v1417_v37 = vld [vmem:[#allocation11 + $0x970] sm:$0xff] }
 0x253   : > { %2782 = vmatpush.msra.mxu3 %v1328_v54  ;;  %v1532_v3 = vld [vmem:[#allocation11 + $0xd08] sm:$0xff]  ;;  %v1473_v25 = vld [vmem:[#allocation11 + $0xb30] sm:$0xff] }
 0x254   : > { %2878 = vmatpush.msra.mxu0 %v1153_v42  ;;  %2827 = vmatpush.msrb.mxu1 %v1436_v43  ;;  %v1528_v21 = vld [vmem:[#allocation11 + $0xce8] sm:$0xff]  ;;  %v1413_v42 = vld [vmem:[#allocation11 + $0x950] sm:$0xff] }
 0x255   : > { %2828 = vmatmul.f32.vlgmr.msrb.gmra.mxu1 %v4300_v40  ;;  %2783 = vmatpush.msra.mxu3 %v1324_v59  ;;  %v1524_v26 = vld [vmem:[#allocation11 + $0xcc8] sm:$0xff]  ;;  %v1189_v43 = vld [vmem:[#allocation11 + $0x250] sm:$0xff] }
 0x256   : > { %2879 = vmatpush.msra.mxu0 %v1149_v45  ;;  %v4309_v52 = vpop.eup %3627  ;;  %2892 = vmatpush.msra.mxu1 %v1241_v46  ;;  %v1520_v30 = vld [vmem:[#allocation11 + $0xca8] sm:$0xff]  ;;  %v1409_v46 = vld [vmem:[#allocation11 + $0x930] sm:$0xff] }
 0x257   : > { %2688 = vmatmul.f32.vlgmr.msrb.gmra.mxu2 %v4309_v52  ;;  %2784 = vmatpush.msra.mxu3 %v1320_v63  ;;  %v1516_v35 = vld [vmem:[#allocation11 + $0xc88] sm:$0xff]  ;;  %v1397_v59 = vld [vmem:[#allocation11 + $0x8d0] sm:$0xff] }
 0x258   : > { %2880 = vmatpush.msra.mxu0 %v1145_v58  ;;  %2832 = vmatpush.msrb.mxu2 %v1560_v48  ;;  %v1512_v20 = vld [vmem:[#allocation11 + $0xc68] sm:$0xff]  ;;  %v1185_v58 = vld [vmem:[#allocation11 + $0x230] sm:$0xff] }
 0x259   : > { %2893 = vmatpush.msra.mxu1 %v1237_v51  ;;  %2785 = vmatpush.msra.mxu3 %v1316_v7  ;;  %v1508_v45 = vld [vmem:[#allocation11 + $0xc48] sm:$0xff]  ;;  %v1405_v51 = vld [vmem:[#allocation11 + $0x910] sm:$0xff] }
 0x25a   : > { %2881 = vmatpush.msra.mxu0 %v1141_v53  ;;  %2833 = vmatpush.msrb.mxu2 %v1556_v55  ;;  %v1504_v48 = vld [vmem:[#allocation11 + $0xc28] sm:$0xff]  ;;  %v1181_v53 = vld [vmem:[#allocation11 + $0x210] sm:$0xff] }
 0x25b   : > { %2894 = vmatpush.msra.mxu1 %v1233_v56  ;;  %2786 = vmatpush.msra.mxu3 %v1312_v12  ;;  %v1500_v54 = vld [vmem:[#allocation11 + $0xc08] sm:$0xff]  ;;  %v1401_v55 = vld [vmem:[#allocation11 + $0x8f0] sm:$0xff] }
 0x25c   : > { %2882 = vmatpush.msra.mxu0 %v1137_v57  ;;  %2834 = vmatpush.msrb.mxu2 %v1552_v60  ;;  %v1305_v56 = vld [vmem:[#allocation11 + $0x5f0] sm:$0xff]  ;;  %v1624_v60 = vld [vmem:[#allocation11 + $0xfe8] sm:$0xff] }
 0x25d   : > { %2895 = vmatpush.msra.mxu1 %v1229_v61  ;;  %2787 = vmatpush.msra.mxu3 %v1308_v16  ;;  %v1497_v57 = vld [vmem:[#allocation11 + $0xbf0] sm:$0xff] }
 0x25e   : > { %2883 = vmatpush.msra.mxu0 %v1133_v49  ;;  %2835 = vmatpush.msrb.mxu2 %v1548_v0  ;;  %v1301_v61 = vld [vmem:[#allocation11 + $0x5d0] sm:$0xff] }
 0x25f   : > { %2896 = vmatpush.msra.mxu1 %v1225_v1  ;;  %2768 = vmatmul.f32.vlgmr.msra.gmra.mxu2 %v4289_v8  ;;  %v1393_v63 = vld [vmem:[#allocation11 + $0x8b0] sm:$0xff]  ;;  %v1620_v1 = vld [vmem:[#allocation11 + $0xfc8] sm:$0xff] }
 0x260   : > { %2884 = vmatpush.msra.mxu0 %v1129_v2  ;;  %2836 = vmatpush.msrb.mxu2 %v1544_v4  ;;  %v1493_v0 = vld [vmem:[#allocation11 + $0xbd0] sm:$0xff] }
 0x261   : > { %2897 = vmatpush.msra.mxu1 %v1221_v5  ;;  %v1297_v2 = vld [vmem:[#allocation11 + $0x5b0] sm:$0xff] }
 0x262   : > { %2885 = vmatpush.msra.mxu0 %v1125_v6  ;;  %2837 = vmatpush.msrb.mxu2 %v1540_v32  ;;  %v1389_v4 = vld [vmem:[#allocation11 + $0x890] sm:$0xff]  ;;  %v1616_v6 = vld [vmem:[#allocation11 + $0xfa8] sm:$0xff] }
 0x263   : > { %2898 = vmatpush.msra.mxu1 %v1217_v11  ;;  %v1489_v5 = vld [vmem:[#allocation11 + $0xbb0] sm:$0xff] }
 0x264   : > { %2886 = vmatpush.msra.mxu0 %v1121_v62  ;;  %2838 = vmatpush.msrb.mxu2 %v1536_v13  ;;  %v1293_v7 = vld [vmem:[#allocation11 + $0x590] sm:$0xff]  ;;  %v1612_v62 = vld [vmem:[#allocation11 + $0xf88] sm:$0xff] }
 0x265   : > { %2899 = vmatpush.msra.mxu1 %v1213_v14  ;;  %v1385_v32 = vld [vmem:[#allocation11 + $0x870] sm:$0xff]  ;;  %v1608_v14 = vld [vmem:[#allocation11 + $0xf68] sm:$0xff] }
 0x266   : > { %2887 = vmatpush.msra.mxu0 %v1117_v15  ;;  %2839 = vmatpush.msrb.mxu2 %v1532_v3  ;;  %v1485_v11 = vld [vmem:[#allocation11 + $0xb90] sm:$0xff] }
 0x267   : > { %2888 = vmatmul.f32.vlgmr.msra.gmra.mxu0 %v4278_v38  ;;  %2900 = vmatpush.msra.mxu1 %v1209_v19  ;;  %v1289_v12 = vld [vmem:[#allocation11 + $0x570] sm:$0xff] }
 0x268   : > { %2952 = vmatpush.msrb.mxu0 %v1433_v18  ;;  %2840 = vmatpush.msrb.mxu2 %v1528_v21  ;;  %v2512_v34 = vpop.f32.mrf.mxu2  ;;  %v1381_v13 = vld [vmem:[#allocation11 + $0x850] sm:$0xff]  ;;  %v1604_v18 = vld [vmem:[#allocation11 + $0xf48] sm:$0xff] }
 0x269   : > { %2901 = vmatpush.msra.mxu1 %v1205_v24  ;;  %v2513_v41 = vadd.f32 %v2512_v34, %v2493_v36  ;;  %v1481_v15 = vld [vmem:[#allocation11 + $0xb70] sm:$0xff]  ;;  %v1178_v24 = vld [vmem:[#allocation11 + $0x1f8] sm:$0xff]  ;;  %v1588_v34 = vld [vmem:[#allocation11 + $0xec8] sm:$0xff] }
 0x26a   : > { %2953 = vmatpush.msrb.mxu0 %v1429_v23  ;;  %2841 = vmatpush.msrb.mxu2 %v1524_v26  ;;  %v1377_v16 = vld [vmem:[#allocation11 + $0x830] sm:$0xff]  ;;  %v1600_v23 = vld [vmem:[#allocation11 + $0xf28] sm:$0xff]  ;;  %v1166_v36 = vld [vmem:[#allocation11 + $0x198] sm:$0xff] }
 0x26b   : > { %2902 = vmatpush.msra.mxu1 %v1201_v10  ;;  %v1285_v3 = vld [vmem:[#allocation11 + $0x550] sm:$0xff]  ;;  %v1596_v26 = vld [vmem:[#allocation11 + $0xf08] sm:$0xff]  ;;  %v1174_v10 = vld [vmem:[#allocation11 + $0x1d8] sm:$0xff] }
 0x26c   : > { %2954 = vmatpush.msrb.mxu0 %v1425_v27  ;;  %2842 = vmatpush.msrb.mxu2 %v1520_v30  ;;  %v1477_v19 = vld [vmem:[#allocation11 + $0xb50] sm:$0xff]  ;;  %v1592_v30 = vld [vmem:[#allocation11 + $0xee8] sm:$0xff] }
 0x26d   : > { %2903 = vmatpush.msra.mxu1 %v1197_v9  ;;  %v1373_v21 = vld [vmem:[#allocation11 + $0x810] sm:$0xff] }
 0x26e   : > { %2955 = vmatpush.msrb.mxu0 %v1421_v33  ;;  %2843 = vmatpush.msrb.mxu2 %v1516_v35  ;;  %v1277_v27 = vld [vmem:[#allocation11 + $0x510] sm:$0xff]  ;;  %v1170_v33 = vld [vmem:[#allocation11 + $0x1b8] sm:$0xff] }
 0x26f   : > { %v2532_v44 = vpop.f32.mrf.mxu3  ;;  %2904 = vmatpush.msra.mxu1 %v1193_v39  ;;  %v1469_v29 = vld [vmem:[#allocation11 + $0xb10] sm:$0xff]  ;;  %v1584_v39 = vld [vmem:[#allocation11 + $0xea8] sm:$0xff] }
 0x270   : > { %2956 = vmatpush.msrb.mxu0 %v1417_v37  ;;  %v2533_v47 = vadd.f32 %v2532_v44, %v2513_v41  ;;  %2844 = vmatpush.msrb.mxu2 %v1512_v20  ;;  %v1273_v31 = vld [vmem:[#allocation11 + $0x4f0] sm:$0xff]  ;;  %v1162_v41 = vld [vmem:[#allocation11 + $0x178] sm:$0xff] }
 0x271   : > { %2905 = vmatpush.msra.mxu1 %v1189_v43  ;;  %v1465_v9 = vld [vmem:[#allocation11 + $0xaf0] sm:$0xff]  ;;  %v1580_v43 = vld [vmem:[#allocation11 + $0xe88] sm:$0xff] }
 0x272   : > { %2957 = vmatpush.msrb.mxu0 %v1413_v42  ;;  %3629 = vtanh.f32 %v2533_v47  ;;  %2845 = vmatpush.msrb.mxu2 %v1508_v45  ;;  %v1269_v35 = vld [vmem:[#allocation11 + $0x4d0] sm:$0xff]  ;;  %v1158_v45 = vld [vmem:[#allocation11 + $0x158] sm:$0xff]  ;;  %v1576_v47 = vld [vmem:[#allocation11 + $0xe68] sm:$0xff] }
 0x273   : > { %2906 = vmatpush.msra.mxu1 %v1185_v58  ;;  %v1461_v37 = vld [vmem:[#allocation11 + $0xad0] sm:$0xff] }
 0x274   : > { %2958 = vmatpush.msrb.mxu0 %v1409_v46  ;;  %2846 = vmatpush.msrb.mxu2 %v1504_v48  ;;  %v1265_v20 = vld [vmem:[#allocation11 + $0x4b0] sm:$0xff]  ;;  %v1154_v48 = vld [vmem:[#allocation11 + $0x138] sm:$0xff] }
 0x275   : > { %2907 = vmatpush.msra.mxu1 %v1181_v53  ;;  %v1457_v42 = vld [vmem:[#allocation11 + $0xab0] sm:$0xff]  ;;  %v1572_v53 = vld [vmem:[#allocation11 + $0xe48] sm:$0xff] }
 0x276   : > { %2959 = vmatpush.msrb.mxu0 %v1405_v51  ;;  %2847 = vmatpush.msrb.mxu2 %v1500_v54  ;;  %v1261_v44 = vld [vmem:[#allocation11 + $0x490] sm:$0xff] }
 0x277   : > { %2908 = vmatmul.f32.vlgmr.msra.gmra.mxu1 %v4282_v50  ;;  %2848 = vmatmul.f32.vlgmr.msrb.gmra.mxu2 %v4309_v52  ;;  %v1453_v46 = vld [vmem:[#allocation11 + $0xa90] sm:$0xff] }
 0x278   : > { %2960 = vmatpush.msrb.mxu0 %v1401_v55  ;;  %v4317_v49 = vpop.eup %3629  ;;  %2912 = vmatpush.msra.mxu2 %v1305_v56  ;;  %v1257_v58 = vld [vmem:[#allocation11 + $0x470] sm:$0xff]  ;;  %v1150_v55 = vld [vmem:[#allocation11 + $0x118] sm:$0xff] }
 0x279   : > { %2972 = vmatpush.msrb.mxu1 %v1497_v57  ;;  %2708 = vmatmul.f32.vlgmr.msrb.gmra.mxu3 %v4317_v49  ;;  %v1449_v51 = vld [vmem:[#allocation11 + $0xa70] sm:$0xff]  ;;  %v1568_v57 = vld [vmem:[#allocation11 + $0xe28] sm:$0xff] }
 0x27a   : > { %2961 = vmatpush.msrb.mxu0 %v1397_v59  ;;  %2852 = vmatpush.msrb.mxu3 %v1624_v60  ;;  %v1253_v54 = vld [vmem:[#allocation11 + $0x450] sm:$0xff]  ;;  %v1146_v60 = vld [vmem:[#allocation11 + $0xf8] sm:$0xff] }
 0x27b   : > { %2913 = vmatpush.msra.mxu2 %v1301_v61  ;;  %2973 = vmatpush.msrb.mxu1 %v1493_v0  ;;  %v1445_v56 = vld [vmem:[#allocation11 + $0xa50] sm:$0xff] }
 0x27c   : > { %2962 = vmatpush.msrb.mxu0 %v1393_v63  ;;  %2853 = vmatpush.msrb.mxu3 %v1620_v1  ;;  %v1249_v59 = vld [vmem:[#allocation11 + $0x430] sm:$0xff]  ;;  %v1564_v63 = vld [vmem:[#allocation11 + $0xe08] sm:$0xff]  ;;  %v1142_v1 = vld [vmem:[#allocation11 + $0xd8] sm:$0xff] }
 0x27d   : > { %2914 = vmatpush.msra.mxu2 %v1297_v2  ;;  %2974 = vmatpush.msrb.mxu1 %v1489_v5  ;;  %v1441_v61 = vld [vmem:[#allocation11 + $0xa30] sm:$0xff] }
 0x27e   : > { %2963 = vmatpush.msrb.mxu0 %v1389_v4  ;;  %2854 = vmatpush.msrb.mxu3 %v1616_v6  ;;  %v1245_v0 = vld [vmem:[#allocation11 + $0x410] sm:$0xff]  ;;  %v1138_v4 = vld [vmem:[#allocation11 + $0xb8] sm:$0xff] }
 0x27f   : > { %2915 = vmatpush.msra.mxu2 %v1293_v7  ;;  %2975 = vmatpush.msrb.mxu1 %v1485_v11  ;;  %v1437_v2 = vld [vmem:[#allocation11 + $0xa10] sm:$0xff]  ;;  %v1134_v7 = vld [vmem:[#allocation11 + $0x98] sm:$0xff] }
 0x280   : > { %2964 = vmatpush.msrb.mxu0 %v1385_v32  ;;  %2855 = vmatpush.msrb.mxu3 %v1612_v62  ;;  %v1369_v5 = vld [vmem:[#allocation11 + $0x7f0] sm:$0xff]  ;;  %v1242_v32 = vld [vmem:[#allocation11 + $0x3f8] sm:$0xff] }
 0x281   : > { %2916 = vmatpush.msra.mxu2 %v1289_v12  ;;  %2788 = vmatmul.f32.vlgmr.msra.gmra.mxu3 %v4292_v17  ;;  %v1561_v6 = vld [vmem:[#allocation11 + $0xdf0] sm:$0xff]  ;;  %v1130_v12 = vld [vmem:[#allocation11 + $0x78] sm:$0xff] }
 0x282   : > { %2965 = vmatpush.msrb.mxu0 %v1381_v13  ;;  %2856 = vmatpush.msrb.mxu3 %v1608_v14  ;;  %v1365_v11 = vld [vmem:[#allocation11 + $0x7d0] sm:$0xff]  ;;  %v1238_v13 = vld [vmem:[#allocation11 + $0x3d8] sm:$0xff] }
 0x283   : > { %2976 = vmatpush.msrb.mxu1 %v1481_v15  ;;  %2917 = vmatpush.msra.mxu2 %v1285_v3  ;;  %v1557_v62 = vld [vmem:[#allocation11 + $0xdd0] sm:$0xff]  ;;  %v1234_v3 = vld [vmem:[#allocation11 + $0x3b8] sm:$0xff] }
 0x284   : > { %2966 = vmatpush.msrb.mxu0 %v1377_v16  ;;  %2857 = vmatpush.msrb.mxu3 %v1604_v18  ;;  %v1361_v14 = vld [vmem:[#allocation11 + $0x7b0] sm:$0xff]  ;;  %v1126_v16 = vld [vmem:[#allocation11 + $0x58] sm:$0xff] }
 0x285   : > { %2977 = vmatpush.msrb.mxu1 %v1477_v19  ;;  %2918 = vmatpush.msra.mxu2 %v1281_v22  ;;  %v1553_v15 = vld [vmem:[#allocation11 + $0xdb0] sm:$0xff]  ;;  %v1230_v22 = vld [vmem:[#allocation11 + $0x398] sm:$0xff] }
 0x286   : > { %2967 = vmatpush.msrb.mxu0 %v1373_v21  ;;  %2858 = vmatpush.msrb.mxu3 %v1600_v23  ;;  %v1357_v18 = vld [vmem:[#allocation11 + $0x790] sm:$0xff]  ;;  %v1122_v21 = vld [vmem:[#allocation11 + $0x38] sm:$0xff] }
 0x287   : > { %2968 = vmatmul.f32.vlgmr.msrb.gmra.mxu0 %v4295_v28  ;;  %2978 = vmatpush.msrb.mxu1 %v1473_v25  ;;  %v1549_v19 = vld [vmem:[#allocation11 + $0xd90] sm:$0xff]  ;;  %v1118_v25 = vld [vmem:[#allocation11 + $0x18] sm:$0xff] }
 0x288   : > { %3032 = vmatpush.msra.mxu0 %v1178_v24  ;;  %2859 = vmatpush.msrb.mxu3 %v1596_v26  ;;  %v1353_v23 = vld [vmem:[#allocation11 + $0x770] sm:$0xff]  ;;  %v1226_v26 = vld [vmem:[#allocation11 + $0x378] sm:$0xff] }
 0x289   : > { %2919 = vmatpush.msra.mxu2 %v1277_v27  ;;  %2979 = vmatpush.msrb.mxu1 %v1469_v29  ;;  %v1545_v24 = vld [vmem:[#allocation11 + $0xd70] sm:$0xff] }
 0x28a   : > { %3033 = vmatpush.msra.mxu0 %v1174_v10  ;;  %2860 = vmatpush.msrb.mxu3 %v1592_v30  ;;  %v1349_v27 = vld [vmem:[#allocation11 + $0x750] sm:$0xff]  ;;  %v1434_v10 = vld [vmem:[#allocation11 + $0x9f8] sm:$0xff] }
 0x28b   : > { %2920 = vmatpush.msra.mxu2 %v1273_v31  ;;  %2980 = vmatpush.msrb.mxu1 %v1465_v9  ;;  %v1541_v29 = vld [vmem:[#allocation11 + $0xd50] sm:$0xff]  ;;  %v1222_v30 = vld [vmem:[#allocation11 + $0x358] sm:$0xff] }
 0x28c   : > { %3034 = vmatpush.msra.mxu0 %v1170_v33  ;;  %2861 = vmatpush.msrb.mxu3 %v1588_v34  ;;  %v1345_v31 = vld [vmem:[#allocation11 + $0x730] sm:$0xff]  ;;  %v1430_v33 = vld [vmem:[#allocation11 + $0x9d8] sm:$0xff] }
 0x28d   : > { %2921 = vmatpush.msra.mxu2 %v1269_v35  ;;  %2981 = vmatpush.msrb.mxu1 %v1461_v37  ;;  %v1537_v9 = vld [vmem:[#allocation11 + $0xd30] sm:$0xff]  ;;  %v1218_v34 = vld [vmem:[#allocation11 + $0x338] sm:$0xff] }
 0x28e   : > { %3035 = vmatpush.msra.mxu0 %v1166_v36  ;;  %2862 = vmatpush.msrb.mxu3 %v1584_v39  ;;  %v1341_v35 = vld [vmem:[#allocation11 + $0x710] sm:$0xff]  ;;  %v1426_v36 = vld [vmem:[#allocation11 + $0x9b8] sm:$0xff] }
 0x28f   : > { %2922 = vmatpush.msra.mxu2 %v1265_v20  ;;  %2982 = vmatpush.msrb.mxu1 %v1457_v42  ;;  %v1533_v37 = vld [vmem:[#allocation11 + $0xd10] sm:$0xff]  ;;  %v1214_v39 = vld [vmem:[#allocation11 + $0x318] sm:$0xff] }
 0x290   : > { %3036 = vmatpush.msra.mxu0 %v1162_v41  ;;  %2863 = vmatpush.msrb.mxu3 %v1580_v43  ;;  %v1337_v20 = vld [vmem:[#allocation11 + $0x6f0] sm:$0xff]  ;;  %v1422_v41 = vld [vmem:[#allocation11 + $0x998] sm:$0xff] }
 0x291   : > { %2923 = vmatpush.msra.mxu2 %v1261_v44  ;;  %2983 = vmatpush.msrb.mxu1 %v1453_v46  ;;  %v1529_v42 = vld [vmem:[#allocation11 + $0xcf0] sm:$0xff]  ;;  %v1418_v44 = vld [vmem:[#allocation11 + $0x978] sm:$0xff] }
 0x292   : > { %3037 = vmatpush.msra.mxu0 %v1158_v45  ;;  %2864 = vmatpush.msrb.mxu3 %v1576_v47  ;;  %v1333_v43 = vld [vmem:[#allocation11 + $0x6d0] sm:$0xff]  ;;  %v1206_v46 = vld [vmem:[#allocation11 + $0x2d8] sm:$0xff] }
 0x293   : > { %2924 = vmatpush.msra.mxu2 %v1257_v58  ;;  %2984 = vmatpush.msrb.mxu1 %v1449_v51  ;;  %v1525_v45 = vld [vmem:[#allocation11 + $0xcd0] sm:$0xff]  ;;  %v1414_v58 = vld [vmem:[#allocation11 + $0x958] sm:$0xff] }
 0x294   : > { %3038 = vmatpush.msra.mxu0 %v1154_v48  ;;  %2865 = vmatpush.msrb.mxu3 %v1572_v53  ;;  %v1329_v47 = vld [vmem:[#allocation11 + $0x6b0] sm:$0xff]  ;;  %v1202_v51 = vld [vmem:[#allocation11 + $0x2b8] sm:$0xff] }
 0x295   : > { %2925 = vmatpush.msra.mxu2 %v1253_v54  ;;  %2985 = vmatpush.msrb.mxu1 %v1445_v56  ;;  %v1521_v48 = vld [vmem:[#allocation11 + $0xcb0] sm:$0xff]  ;;  %v1410_v54 = vld [vmem:[#allocation11 + $0x938] sm:$0xff] }
 0x296   : > { %3039 = vmatpush.msra.mxu0 %v1150_v55  ;;  %2866 = vmatpush.msrb.mxu3 %v1568_v57  ;;  %v1325_v53 = vld [vmem:[#allocation11 + $0x690] sm:$0xff]  ;;  %v1198_v56 = vld [vmem:[#allocation11 + $0x298] sm:$0xff] }
 0x297   : > { %2926 = vmatpush.msra.mxu2 %v1249_v59  ;;  %2986 = vmatpush.msrb.mxu1 %v1441_v61  ;;  %v1517_v55 = vld [vmem:[#allocation11 + $0xc90] sm:$0xff]  ;;  %v1406_v59 = vld [vmem:[#allocation11 + $0x918] sm:$0xff] }
 0x298   : > { %3040 = vmatpush.msra.mxu0 %v1146_v60  ;;  %2867 = vmatpush.msrb.mxu3 %v1564_v63  ;;  %v1321_v57 = vld [vmem:[#allocation11 + $0x670] sm:$0xff]  ;;  %v1194_v61 = vld [vmem:[#allocation11 + $0x278] sm:$0xff] }
 0x299   : > { %2927 = vmatpush.msra.mxu2 %v1245_v0  ;;  %2987 = vmatpush.msrb.mxu1 %v1437_v2  ;;  %v1513_v60 = vld [vmem:[#allocation11 + $0xc70] sm:$0xff]  ;;  %v1402_v0 = vld [vmem:[#allocation11 + $0x8f8] sm:$0xff] }
 0x29a   : > { %3041 = vmatpush.msra.mxu0 %v1142_v1  ;;  %2868 = vmatmul.f32.vlgmr.msrb.gmra.mxu3 %v4317_v49  ;;  %v1317_v63 = vld [vmem:[#allocation11 + $0x650] sm:$0xff]  ;;  %v1190_v2 = vld [vmem:[#allocation11 + $0x258] sm:$0xff] }
 0x29b   : > { %2928 = vmatmul.f32.vlgmr.msra.gmra.mxu2 %v4289_v8  ;;  %2932 = vmatpush.msra.mxu3 %v1369_v5  ;;  %v1509_v1 = vld [vmem:[#allocation11 + $0xc50] sm:$0xff]  ;;  %v1398_v5 = vld [vmem:[#allocation11 + $0x8d8] sm:$0xff] }
 0x29c   : > { %3042 = vmatpush.msra.mxu0 %v1138_v4  ;;  %2988 = vmatmul.f32.vlgmr.msrb.gmra.mxu1 %v4300_v40  ;;  %v1313_v4 = vld [vmem:[#allocation11 + $0x630] sm:$0xff] }
 0x29d   : > { %2992 = vmatpush.msrb.mxu2 %v1561_v6  ;;  %3052 = vmatpush.msra.mxu1 %v1242_v32  ;;  %v1505_v6 = vld [vmem:[#allocation11 + $0xc30] sm:$0xff] }
 0x29e   : > { %3043 = vmatpush.msra.mxu0 %v1134_v7  ;;  %2933 = vmatpush.msra.mxu3 %v1365_v11  ;;  %v1186_v7 = vld [vmem:[#allocation11 + $0x238] sm:$0xff]  ;;  %v1309_v32 = vld [vmem:[#allocation11 + $0x610] sm:$0xff] }
 0x29f   : > { %2993 = vmatpush.msrb.mxu2 %v1557_v62  ;;  %3053 = vmatpush.msra.mxu1 %v1238_v13  ;;  %v1394_v11 = vld [vmem:[#allocation11 + $0x8b8] sm:$0xff]  ;;  %v1501_v62 = vld [vmem:[#allocation11 + $0xc10] sm:$0xff] }
 0x2a0   : > { %3044 = vmatpush.msra.mxu0 %v1130_v12  ;;  %2934 = vmatpush.msra.mxu3 %v1361_v14  ;;  %v1182_v12 = vld [vmem:[#allocation11 + $0x218] sm:$0xff]  ;;  %v1625_v14 = vld [vmem:[#allocation11 + $0xff0] sm:$0xff] }
 0x2a1   : > { %2994 = vmatpush.msrb.mxu2 %v1553_v15  ;;  %3054 = vmatpush.msra.mxu1 %v1234_v3  ;;  %v1390_v13 = vld [vmem:[#allocation11 + $0x898] sm:$0xff] }
 0x2a2   : > { %3045 = vmatpush.msra.mxu0 %v1126_v16  ;;  %2935 = vmatpush.msra.mxu3 %v1357_v18  ;;  %v1306_v15 = vld [vmem:[#allocation11 + $0x5f8] sm:$0xff]  ;;  %v1621_v18 = vld [vmem:[#allocation11 + $0xfd0] sm:$0xff] }
 0x2a3   : > { %2995 = vmatpush.msrb.mxu2 %v1549_v19  ;;  %3055 = vmatpush.msra.mxu1 %v1230_v22  ;;  %v1498_v16 = vld [vmem:[#allocation11 + $0xbf8] sm:$0xff] }
 0x2a4   : > { %3046 = vmatpush.msra.mxu0 %v1122_v21  ;;  %2936 = vmatpush.msra.mxu3 %v1353_v23  ;;  %v1386_v3 = vld [vmem:[#allocation11 + $0x878] sm:$0xff]  ;;  %v1617_v23 = vld [vmem:[#allocation11 + $0xfb0] sm:$0xff] }
 0x2a5   : > { %2996 = vmatpush.msrb.mxu2 %v1545_v24  ;;  %3056 = vmatpush.msra.mxu1 %v1226_v26  ;;  %v1302_v19 = vld [vmem:[#allocation11 + $0x5d8] sm:$0xff] }
 0x2a6   : > { %3047 = vmatpush.msra.mxu0 %v1118_v25  ;;  %2937 = vmatpush.msra.mxu3 %v1349_v27  ;;  %v1494_v21 = vld [vmem:[#allocation11 + $0xbd8] sm:$0xff]  ;;  %v1613_v27 = vld [vmem:[#allocation11 + $0xf90] sm:$0xff] }
 0x2a7   : > { %3048 = vmatmul.f32.vlgmr.msra.gmra.mxu0 %v4278_v38  ;;  %2997 = vmatpush.msrb.mxu2 %v1541_v29  ;;  %v1210_v38 = vld [vmem:[#allocation11 + $0x2f8] sm:$0xff] }
 0x2a8   : > { %3112 = vmatpush.msrb.mxu0 %v1434_v10  ;;  %3057 = vmatpush.msra.mxu1 %v1222_v30  ;;  %v1382_v22 = vld [vmem:[#allocation11 + $0x858] sm:$0xff]  ;;  %v1609_v30 = vld [vmem:[#allocation11 + $0xf70] sm:$0xff] }
 0x2a9   : > { %2938 = vmatpush.msra.mxu3 %v1345_v31  ;;  %2998 = vmatpush.msrb.mxu2 %v1537_v9  ;;  %v1298_v24 = vld [vmem:[#allocation11 + $0x5b8] sm:$0xff]  ;;  %v1605_v9 = vld [vmem:[#allocation11 + $0xf50] sm:$0xff] }
 0x2aa   : > { %3113 = vmatpush.msrb.mxu0 %v1430_v33  ;;  %3058 = vmatpush.msra.mxu1 %v1218_v34  ;;  %v1490_v25 = vld [vmem:[#allocation11 + $0xbb8] sm:$0xff] }
 0x2ab   : > { %2939 = vmatpush.msra.mxu3 %v1341_v35  ;;  %2999 = vmatpush.msrb.mxu2 %v1533_v37  ;;  %v1378_v26 = vld [vmem:[#allocation11 + $0x838] sm:$0xff] }
 0x2ac   : > { %3114 = vmatpush.msrb.mxu0 %v1426_v36  ;;  %3059 = vmatpush.msra.mxu1 %v1214_v39  ;;  %v1294_v10 = vld [vmem:[#allocation11 + $0x598] sm:$0xff]  ;;  %v1601_v36 = vld [vmem:[#allocation11 + $0xf30] sm:$0xff] }
 0x2ad   : > { %2940 = vmatpush.msra.mxu3 %v1337_v20  ;;  %3000 = vmatpush.msrb.mxu2 %v1529_v42  ;;  %v1486_v29 = vld [vmem:[#allocation11 + $0xb98] sm:$0xff]  ;;  %v1597_v20 = vld [vmem:[#allocation11 + $0xf10] sm:$0xff] }
 0x2ae   : > { %3115 = vmatpush.msrb.mxu0 %v1422_v41  ;;  %3060 = vmatpush.msra.mxu1 %v1210_v38  ;;  %v1290_v31 = vld [vmem:[#allocation11 + $0x578] sm:$0xff]  ;;  %v1593_v38 = vld [vmem:[#allocation11 + $0xef0] sm:$0xff] }
 0x2af   : > { %2941 = vmatpush.msra.mxu3 %v1333_v43  ;;  %3001 = vmatpush.msrb.mxu2 %v1525_v45  ;;  %v1482_v33 = vld [vmem:[#allocation11 + $0xb78] sm:$0xff]  ;;  %v1589_v45 = vld [vmem:[#allocation11 + $0xed0] sm:$0xff] }
 0x2b0   : > { %3116 = vmatpush.msrb.mxu0 %v1418_v44  ;;  %3061 = vmatpush.msra.mxu1 %v1206_v46  ;;  %v1286_v34 = vld [vmem:[#allocation11 + $0x558] sm:$0xff] }
 0x2b1   : > { %2942 = vmatpush.msra.mxu3 %v1329_v47  ;;  %3002 = vmatpush.msrb.mxu2 %v1521_v48  ;;  %v1478_v35 = vld [vmem:[#allocation11 + $0xb58] sm:$0xff]  ;;  %v1585_v48 = vld [vmem:[#allocation11 + $0xeb0] sm:$0xff] }
 0x2b2   : > { %3117 = vmatpush.msrb.mxu0 %v1414_v58  ;;  %3062 = vmatpush.msra.mxu1 %v1202_v51  ;;  %v1282_v37 = vld [vmem:[#allocation11 + $0x538] sm:$0xff] }
 0x2b3   : > { %2943 = vmatpush.msra.mxu3 %v1325_v53  ;;  %3003 = vmatpush.msrb.mxu2 %v1517_v55  ;;  %v1474_v39 = vld [vmem:[#allocation11 + $0xb38] sm:$0xff]  ;;  %v1640_v53 = vld [vmem:[#allocation14 + $0x68] sm:$0xff] }
 0x2b4   : > { %3118 = vmatpush.msrb.mxu0 %v1410_v54  ;;  %3063 = vmatpush.msra.mxu1 %v1198_v56  ;;  %v1278_v41 = vld [vmem:[#allocation11 + $0x518] sm:$0xff]  ;;  %v1581_v55 = vld [vmem:[#allocation11 + $0xe90] sm:$0xff] }
 0x2b5   : > { %2944 = vmatpush.msra.mxu3 %v1321_v57  ;;  %3004 = vmatpush.msrb.mxu2 %v1513_v60  ;;  %v1470_v42 = vld [vmem:[#allocation11 + $0xb18] sm:$0xff]  ;;  %v1639_v57 = vld [vmem:[#allocation14 + $0x60] sm:$0xff]  ;;  %v1577_v60 = vld [vmem:[#allocation11 + $0xe70] sm:$0xff] }
 0x2b6   : > { %3119 = vmatpush.msrb.mxu0 %v1406_v59  ;;  %3064 = vmatpush.msra.mxu1 %v1194_v61  ;;  %v1274_v43 = vld [vmem:[#allocation11 + $0x4f8] sm:$0xff] }
 0x2b7   : > { %2945 = vmatpush.msra.mxu3 %v1317_v63  ;;  %3005 = vmatpush.msrb.mxu2 %v1509_v1  ;;  %v1642_v44 = vld [vmem:[#allocation14 + $0x78] sm:$0xff]  ;;  %v1641_v47 = vld [vmem:[#allocation14 + $0x70] sm:$0xff] }
 0x2b8   : > { %3120 = vmatpush.msrb.mxu0 %v1402_v0  ;;  %3065 = vmatpush.msra.mxu1 %v1190_v2  ;;  %v1270_v46 = vld [vmem:[#allocation11 + $0x4d8] sm:$0xff]  ;;  %v1573_v1 = vld [vmem:[#allocation11 + $0xe50] sm:$0xff] }
 0x2b9   : > { %2946 = vmatpush.msra.mxu3 %v1313_v4  ;;  %3006 = vmatpush.msrb.mxu2 %v1505_v6  ;;  %v1462_v58 = vld [vmem:[#allocation11 + $0xad8] sm:$0xff]  ;;  %v1569_v6 = vld [vmem:[#allocation11 + $0xe30] sm:$0xff] }
 0x2ba   : > { %3121 = vmatpush.msrb.mxu0 %v1398_v5  ;;  %3066 = vmatpush.msra.mxu1 %v1186_v7  ;;  %v1266_v51 = vld [vmem:[#allocation11 + $0x4b8] sm:$0xff] }
 0x2bb   : > { %2947 = vmatpush.msra.mxu3 %v1309_v32  ;;  %3007 = vmatpush.msrb.mxu2 %v1501_v62  ;;  %v1458_v54 = vld [vmem:[#allocation11 + $0xab8] sm:$0xff]  ;;  %v1636_v32 = vld [vmem:[#allocation14 + $0x48] sm:$0xff] }
 0x2bc   : > { %3122 = vmatpush.msrb.mxu0 %v1394_v11  ;;  %3067 = vmatpush.msra.mxu1 %v1182_v12  ;;  %v1262_v56 = vld [vmem:[#allocation11 + $0x498] sm:$0xff]  ;;  %v1565_v62 = vld [vmem:[#allocation11 + $0xe10] sm:$0xff] }
 0x2bd   : > { %2948 = vmatmul.f32.vlgmr.msra.gmra.mxu3 %v4292_v17  ;;  %3008 = vmatmul.f32.vlgmr.msrb.gmra.mxu2 %v4309_v52  ;;  %v1454_v59 = vld [vmem:[#allocation11 + $0xa98] sm:$0xff] }
 0x2be   : > { %3123 = vmatpush.msrb.mxu0 %v1390_v13  ;;  %3012 = vmatpush.msrb.mxu3 %v1625_v14  ;;  %v1258_v61 = vld [vmem:[#allocation11 + $0x478] sm:$0xff]  ;;  %v1635_v13 = vld [vmem:[#allocation14 + $0x40] sm:$0xff] }
 0x2bf   : > { %3068 = vmatmul.f32.vlgmr.msra.gmra.mxu1 %v4282_v50  ;;  %3072 = vmatpush.msra.mxu2 %v1306_v15  ;;  %v1374_v50 = vld [vmem:[#allocation11 + $0x818] sm:$0xff] }
 0x2c0   : > { %3132 = vmatpush.msrb.mxu1 %v1498_v16  ;;  %3124 = vmatpush.msrb.mxu0 %v1386_v3  ;;  %v1638_v63 = vld [vmem:[#allocation14 + $0x58] sm:$0xff]  ;;  %v1637_v4 = vld [vmem:[#allocation14 + $0x50] sm:$0xff] }
 0x2c1   : > { %3013 = vmatpush.msrb.mxu3 %v1621_v18  ;;  %3073 = vmatpush.msra.mxu2 %v1302_v19  ;;  %v1450_v0 = vld [vmem:[#allocation11 + $0xa78] sm:$0xff] }
 0x2c2   : > { %3133 = vmatpush.msrb.mxu1 %v1494_v21  ;;  %3125 = vmatpush.msrb.mxu0 %v1382_v22  ;;  %v1254_v2 = vld [vmem:[#allocation11 + $0x458] sm:$0xff] }
 0x2c3   : > { %3014 = vmatpush.msrb.mxu3 %v1617_v23  ;;  %3074 = vmatpush.msra.mxu2 %v1298_v24  ;;  %v1446_v5 = vld [vmem:[#allocation11 + $0xa58] sm:$0xff]  ;;  %v1632_v24 = vld [vmem:[#allocation14 + $0x28] sm:$0xff] }
 0x2c4   : > { %3134 = vmatpush.msrb.mxu1 %v1490_v25  ;;  %3126 = vmatpush.msrb.mxu0 %v1378_v26  ;;  %v1250_v7 = vld [vmem:[#allocation11 + $0x438] sm:$0xff] }
 0x2c5   : > { %3015 = vmatpush.msrb.mxu3 %v1613_v27  ;;  %3075 = vmatpush.msra.mxu2 %v1294_v10  ;;  %v1442_v11 = vld [vmem:[#allocation11 + $0xa38] sm:$0xff]  ;;  %v1631_v27 = vld [vmem:[#allocation14 + $0x20] sm:$0xff] }
 0x2c6   : > { %3135 = vmatpush.msrb.mxu1 %v1486_v29  ;;  %3127 = vmatpush.msrb.mxu0 %v1374_v50  ;;  %v1246_v12 = vld [vmem:[#allocation11 + $0x418] sm:$0xff] }
 0x2c7   : > { %3016 = vmatpush.msrb.mxu3 %v1609_v30  ;;  %3076 = vmatpush.msra.mxu2 %v1290_v31  ;;  %v1438_v14 = vld [vmem:[#allocation11 + $0xa18] sm:$0xff]  ;;  %v4333_v31 = vld [vmem:[#allocation13] sm:$0xf] }
 0x2c8   : > { %3128 = vmatmul.f32.vlgmr.msrb.gmra.mxu0 %v4295_v28  ;;  %3136 = vmatpush.msrb.mxu1 %v1482_v33  ;;  %v1466_v28 = vld [vmem:[#allocation11 + $0xaf8] sm:$0xff] }
 0x2c9   : > { %3017 = vmatpush.msrb.mxu3 %v1605_v9  ;;  %3077 = vmatpush.msra.mxu2 %v1286_v34  ;;  %v1370_v15 = vld [vmem:[#allocation11 + $0x7f8] sm:$0xff]  ;;  %v1628_v34 = vld [vmem:[#allocation14 + $0x8] sm:$0xff] }
 0x2ca   : > { %3137 = vmatpush.msrb.mxu1 %v1478_v35  ;;  %3207 = vmatpush.msra.mxu0 %v1642_v44  ;;  %v1562_v16 = vld [vmem:[#allocation11 + $0xdf8] sm:$0xff]  ;;  %v2589_v44 = vpop.f32.mrf.mxu1 }
 0x2cb   : > { %3018 = vmatpush.msrb.mxu3 %v1601_v36  ;;  %3078 = vmatpush.msra.mxu2 %v1282_v37  ;;  %v1634_v3 = vld [vmem:[#allocation14 + $0x38] sm:$0xff]  ;;  %v1633_v21 = vld [vmem:[#allocation14 + $0x30] sm:$0xff]  ;;  %v2544_v36 = vperm.slane %v4333_v31, 0 }
 0x2cc   : > { %3138 = vmatpush.msrb.mxu1 %v1474_v39  ;;  %3208 = vmatpush.msra.mxu0 %v1641_v47  ;;  %v1366_v18 = vld [vmem:[#allocation11 + $0x7d8] sm:$0xff]  ;;  %v1627_v39 = vld [vmem:[#allocation14] sm:$0xff]  ;;  %v1656_v47 = vld [vmem:[#allocation14 + $0xe8] sm:$0xff] }
 0x2cd   : > { %3019 = vmatpush.msrb.mxu3 %v1597_v20  ;;  %3079 = vmatpush.msra.mxu2 %v1278_v41  ;;  %v1558_v19 = vld [vmem:[#allocation11 + $0xdd8] sm:$0xff]  ;;  %v2569_v41 = vpop.f32.mrf.mxu0 }
 0x2ce   : > { %3139 = vmatpush.msrb.mxu1 %v1470_v42  ;;  %3209 = vmatpush.msra.mxu0 %v1640_v53  ;;  %v1362_v22 = vld [vmem:[#allocation11 + $0x7b8] sm:$0xff] }
 0x2cf   : > { %3020 = vmatpush.msrb.mxu3 %v1593_v38  ;;  %3080 = vmatpush.msra.mxu2 %v1274_v43  ;;  %v1554_v23 = vld [vmem:[#allocation11 + $0xdb8] sm:$0xff] }
 0x2d0   : > { %3140 = vmatpush.msrb.mxu1 %v1466_v28  ;;  %3210 = vmatpush.msra.mxu0 %v1639_v57  ;;  %v1358_v25 = vld [vmem:[#allocation11 + $0x798] sm:$0xff] }
 0x2d1   : > { %3021 = vmatpush.msrb.mxu3 %v1589_v45  ;;  %3081 = vmatpush.msra.mxu2 %v1270_v46  ;;  %v1550_v26 = vld [vmem:[#allocation11 + $0xd98] sm:$0xff]  ;;  %v2570_v45 = vadd.f32 %v2569_v41, %v2544_v36  ;;  %v1643_v36 = vld [vmem:[#allocation14 + $0x80] sm:$0xff] }
 0x2d2   : > { %3141 = vmatpush.msrb.mxu1 %v1462_v58  ;;  %3211 = vmatpush.msra.mxu0 %v1638_v63  ;;  %v1546_v10 = vld [vmem:[#allocation11 + $0xd78] sm:$0xff]  ;;  %v2609_v58 = vpop.f32.mrf.mxu2 }
 0x2d3   : > { %3022 = vmatpush.msrb.mxu3 %v1585_v48  ;;  %3082 = vmatpush.msra.mxu2 %v1266_v51  ;;  %v1350_v29 = vld [vmem:[#allocation11 + $0x758] sm:$0xff]  ;;  %v2590_v51 = vadd.f32 %v2589_v44, %v2570_v45 }
 0x2d4   : > { %3142 = vmatpush.msrb.mxu1 %v1458_v54  ;;  %3212 = vmatpush.msra.mxu0 %v1637_v4  ;;  %v1542_v50 = vld [vmem:[#allocation11 + $0xd58] sm:$0xff]  ;;  %v1655_v54 = vld [vmem:[#allocation14 + $0xe0] sm:$0xff]  ;;  %v2669_v4 = vpop.f32.mrf.mxu1 }
 0x2d5   : > { %3023 = vmatpush.msrb.mxu3 %v1581_v55  ;;  %3083 = vmatpush.msra.mxu2 %v1262_v56  ;;  %v1629_v30 = vld [vmem:[#allocation14 + $0x10] sm:$0xff]  ;;  %v1658_v20 = vld [vmem:[#allocation14 + $0xf8] sm:$0xff]  ;;  %v2629_v55 = vpop.f32.mrf.mxu3  ;;  %v2610_v57 = vadd.f32 %v2609_v58, %v2590_v51 }
 0x2d6   : > { %3143 = vmatpush.msrb.mxu1 %v1454_v59  ;;  %3213 = vmatpush.msra.mxu0 %v1636_v32  ;;  %v1346_v33 = vld [vmem:[#allocation11 + $0x738] sm:$0xff]  ;;  %v1652_v32 = vld [vmem:[#allocation14 + $0xc8] sm:$0xff] }
 0x2d7   : > { %3024 = vmatpush.msrb.mxu3 %v1577_v60  ;;  %3084 = vmatpush.msra.mxu2 %v1258_v61  ;;  %v1538_v9 = vld [vmem:[#allocation11 + $0xd38] sm:$0xff]  ;;  %v2649_v61 = vpop.f32.mrf.mxu0 }
 0x2d8   : > { %3144 = vmatpush.msrb.mxu1 %v1450_v0  ;;  %3214 = vmatpush.msra.mxu0 %v1635_v13  ;;  %v1342_v35 = vld [vmem:[#allocation11 + $0x718] sm:$0xff]  ;;  %v2630_v0 = vadd.f32 %v2629_v55, %v2610_v57 }
 0x2d9   : > { %3025 = vmatpush.msrb.mxu3 %v1573_v1  ;;  %3085 = vmatpush.msra.mxu2 %v1254_v2  ;;  %v1534_v37 = vld [vmem:[#allocation11 + $0xd18] sm:$0xff] }
 0x2da   : > { %3145 = vmatpush.msrb.mxu1 %v1446_v5  ;;  %3215 = vmatpush.msra.mxu0 %v1634_v3  ;;  %v1338_v42 = vld [vmem:[#allocation11 + $0x6f8] sm:$0xff] }
 0x2db   : > { %3026 = vmatpush.msrb.mxu3 %v1569_v6  ;;  %3086 = vmatpush.msra.mxu2 %v1250_v7  ;;  %v1530_v38 = vld [vmem:[#allocation11 + $0xcf8] sm:$0xff]  ;;  %v2650_v6 = vadd.f32 %v2649_v61, %v2630_v0 }
 0x2dc   : > { %3146 = vmatpush.msrb.mxu1 %v1442_v11  ;;  %3216 = vmatpush.msra.mxu0 %v1633_v21  ;;  %v1657_v43 = vld [vmem:[#allocation14 + $0xf0] sm:$0xff]  ;;  %v1654_v60 = vld [vmem:[#allocation14 + $0xd8] sm:$0xff]  ;;  %v2689_v11 = vpop.f32.mrf.mxu2 }
 0x2dd   : > { %3027 = vmatpush.msrb.mxu3 %v1565_v62  ;;  %3087 = vmatpush.msra.mxu2 %v1246_v12  ;;  %v1334_v28 = vld [vmem:[#allocation11 + $0x6d8] sm:$0xff]  ;;  %v2670_v12 = vadd.f32 %v2669_v4, %v2650_v6  ;;  %v1672_v4 = vld [vmem:[#allocation14 + $0x168] sm:$0xff] }
 0x2de   : > { %3028 = vmatmul.f32.vlgmr.msrb.gmra.mxu3 %v4317_v49  ;;  %3147 = vmatpush.msrb.mxu1 %v1438_v14  ;;  %v1526_v46 = vld [vmem:[#allocation11 + $0xcd8] sm:$0xff]  ;;  %v1651_v14 = vld [vmem:[#allocation14 + $0xc0] sm:$0xff] }
 0x2df   : > { %3088 = vmatmul.f32.vlgmr.msra.gmra.mxu2 %v4289_v8  ;;  %3092 = vmatpush.msra.mxu3 %v1370_v15  ;;  %v1354_v8 = vld [vmem:[#allocation11 + $0x778] sm:$0xff] }
 0x2e0   : > { %3148 = vmatmul.f32.vlgmr.msrb.gmra.mxu1 %v4300_v40  ;;  %3152 = vmatpush.msrb.mxu2 %v1562_v16  ;;  %v1630_v40 = vld [vmem:[#allocation14 + $0x18] sm:$0xff]  ;;  %v1653_v2 = vld [vmem:[#allocation14 + $0xd0] sm:$0xff]  ;;  %v2690_v16 = vadd.f32 %v2689_v11, %v2670_v12  ;;  %v1667_v11 = vld [vmem:[#allocation14 + $0x140] sm:$0xff] }
 0x2e1   : > { %3093 = vmatpush.msra.mxu3 %v1366_v18  ;;  %3217 = vmatpush.msra.mxu0 %v1632_v24  ;;  %v1330_v48 = vld [vmem:[#allocation11 + $0x6b8] sm:$0xff]  ;;  %v1664_v12 = vld [vmem:[#allocation14 + $0x128] sm:$0xff] }
 0x2e2   : > { %3153 = vmatpush.msrb.mxu2 %v1558_v19  ;;  %3227 = vmatpush.msra.mxu1 %v1658_v20  ;;  %v1522_v53 = vld [vmem:[#allocation11 + $0xcb8] sm:$0xff] }
 0x2e3   : > { %3094 = vmatpush.msra.mxu3 %v1362_v22  ;;  %3218 = vmatpush.msra.mxu0 %v1631_v27  ;;  %v1326_v56 = vld [vmem:[#allocation11 + $0x698] sm:$0xff] }
 0x2e4   : > { %3154 = vmatpush.msrb.mxu2 %v1554_v23  ;;  %3228 = vmatpush.msra.mxu1 %v1657_v43  ;;  %v1518_v59 = vld [vmem:[#allocation11 + $0xc98] sm:$0xff]  ;;  %v2769_v20 = vpop.f32.mrf.mxu2 }
 0x2e5   : > { %3095 = vmatpush.msra.mxu3 %v1358_v25  ;;  %3219 = vmatpush.msra.mxu0 %v1630_v40  ;;  %v1322_v63 = vld [vmem:[#allocation11 + $0x678] sm:$0xff] }
 0x2e6   : > { %3155 = vmatpush.msrb.mxu2 %v1550_v26  ;;  %3229 = vmatpush.msra.mxu1 %v1656_v47  ;;  %v1514_v1 = vld [vmem:[#allocation11 + $0xc78] sm:$0xff]  ;;  %v1648_v26 = vld [vmem:[#allocation14 + $0xa8] sm:$0xff] }
 0x2e7   : > { %3096 = vmatpush.msra.mxu3 %v1354_v8  ;;  %3220 = vmatpush.msra.mxu0 %v1629_v30  ;;  %v1318_v5 = vld [vmem:[#allocation11 + $0x658] sm:$0xff] }
 0x2e8   : > { %3156 = vmatpush.msrb.mxu2 %v1546_v10  ;;  %3230 = vmatpush.msra.mxu1 %v1655_v54  ;;  %v1510_v7 = vld [vmem:[#allocation11 + $0xc58] sm:$0xff]  ;;  %v1647_v10 = vld [vmem:[#allocation14 + $0xa0] sm:$0xff] }
 0x2e9   : > { %3097 = vmatpush.msra.mxu3 %v1350_v29  ;;  %3221 = vmatpush.msra.mxu0 %v1628_v34  ;;  %v1314_v62 = vld [vmem:[#allocation11 + $0x638] sm:$0xff] }
 0x2ea   : > { %3157 = vmatpush.msrb.mxu2 %v1542_v50  ;;  %3231 = vmatpush.msra.mxu1 %v1654_v60  ;;  %v1506_v13 = vld [vmem:[#allocation11 + $0xc38] sm:$0xff] }
 0x2eb   : > { %3098 = vmatpush.msra.mxu3 %v1346_v33  ;;  %3222 = vmatpush.msra.mxu0 %v1627_v39  ;;  %v1310_v15 = vld [vmem:[#allocation11 + $0x618] sm:$0xff]  ;;  %v2729_v33 = vpop.f32.mrf.mxu0 }
 0x2ec   : > { %3158 = vmatpush.msrb.mxu2 %v1538_v9  ;;  %3232 = vmatpush.msra.mxu1 %v1653_v2  ;;  %v1502_v3 = vld [vmem:[#allocation11 + $0xc18] sm:$0xff]  ;;  %v1644_v9 = vld [vmem:[#allocation14 + $0x88] sm:$0xff] }
 0x2ed   : > { %3099 = vmatpush.msra.mxu3 %v1342_v35  ;;  %v1650_v18 = vld [vmem:[#allocation14 + $0xb8] sm:$0xff]  ;;  %v1649_v23 = vld [vmem:[#allocation14 + $0xb0] sm:$0xff]  ;;  %v2749_v35 = vpop.f32.mrf.mxu1 }
 0x2ee   : > { %3159 = vmatpush.msrb.mxu2 %v1534_v37  ;;  %3233 = vmatpush.msra.mxu1 %v1652_v32  ;;  %v1626_v19 = vld [vmem:[#allocation11 + $0xff8] sm:$0xff]  ;;  %v1668_v32 = vld [vmem:[#allocation14 + $0x148] sm:$0xff] }
 0x2ef   : > { %3100 = vmatpush.msra.mxu3 %v1338_v42  ;;  %v1622_v24 = vld [vmem:[#allocation11 + $0xfd8] sm:$0xff] }
 0x2f0   : > { %3160 = vmatpush.msrb.mxu2 %v1530_v38  ;;  %3234 = vmatpush.msra.mxu1 %v1651_v14  ;;  %v1618_v27 = vld [vmem:[#allocation11 + $0xfb8] sm:$0xff] }
 0x2f1   : > { %3101 = vmatpush.msra.mxu3 %v1334_v28  ;;  %v1614_v40 = vld [vmem:[#allocation11 + $0xf98] sm:$0xff] }
 0x2f2   : > { %3161 = vmatpush.msrb.mxu2 %v1526_v46  ;;  %3235 = vmatpush.msra.mxu1 %v1650_v18  ;;  %v1646_v29 = vld [vmem:[#allocation14 + $0x98] sm:$0xff]  ;;  %v1673_v2 = vld [vmem:[#allocation14 + $0x170] sm:$0xff]  ;;  %v2546_v18 = vperm.slane %v4333_v31, 2 }
 0x2f3   : > { %3102 = vmatpush.msra.mxu3 %v1330_v48  ;;  %v1610_v50 = vld [vmem:[#allocation11 + $0xf78] sm:$0xff]  ;;  %v2809_v47 = vpop.f32.mrf.mxu0 }
 0x2f4   : > { %3162 = vmatpush.msrb.mxu2 %v1522_v53  ;;  %3236 = vmatpush.msra.mxu1 %v1649_v23  ;;  %v1606_v30 = vld [vmem:[#allocation11 + $0xf58] sm:$0xff] }
 0x2f5   : > { %3103 = vmatpush.msra.mxu3 %v1326_v56  ;;  %v1602_v34 = vld [vmem:[#allocation11 + $0xf38] sm:$0xff]  ;;  %v2829_v53 = vpop.f32.mrf.mxu1 }
 0x2f6   : > { %3163 = vmatpush.msrb.mxu2 %v1518_v59  ;;  %3237 = vmatpush.msra.mxu1 %v1648_v26  ;;  %v1598_v39 = vld [vmem:[#allocation11 + $0xf18] sm:$0xff] }
 0x2f7   : > { %3104 = vmatpush.msra.mxu3 %v1322_v63  ;;  %v1594_v42 = vld [vmem:[#allocation11 + $0xef8] sm:$0xff] }
 0x2f8   : > { %3164 = vmatpush.msrb.mxu2 %v1514_v1  ;;  %3238 = vmatpush.msra.mxu1 %v1647_v10  ;;  %v1590_v44 = vld [vmem:[#allocation11 + $0xed8] sm:$0xff] }
 0x2f9   : > { %3105 = vmatpush.msra.mxu3 %v1318_v5  ;;  %v1586_v45 = vld [vmem:[#allocation11 + $0xeb8] sm:$0xff]  ;;  %v1671_v5 = vld [vmem:[#allocation14 + $0x160] sm:$0xff] }
 0x2fa   : > { %3165 = vmatpush.msrb.mxu2 %v1510_v7  ;;  %3239 = vmatpush.msra.mxu1 %v1646_v29  ;;  %v1582_v46 = vld [vmem:[#allocation11 + $0xe98] sm:$0xff]  ;;  %v2849_v57 = vpop.f32.mrf.mxu2 }
 0x2fb   : > { %3106 = vmatpush.msra.mxu3 %v1314_v62  ;;  %v1578_v48 = vld [vmem:[#allocation11 + $0xe78] sm:$0xff] }
 0x2fc   : > { %3166 = vmatpush.msrb.mxu2 %v1506_v13  ;;  %v2709_v21 = vpop.f32.mrf.mxu3  ;;  %v1574_v51 = vld [vmem:[#allocation11 + $0xe58] sm:$0xff]  ;;  %v1663_v13 = vld [vmem:[#allocation14 + $0x120] sm:$0xff] }
 0x2fd   : > { %3107 = vmatpush.msra.mxu3 %v1310_v15  ;;  %v2710_v22 = vadd.f32 %v2709_v21, %v2690_v16  ;;  %v1570_v54 = vld [vmem:[#allocation11 + $0xe38] sm:$0xff]  ;;  %v1660_v16 = vld [vmem:[#allocation14 + $0x108] sm:$0xff]  ;;  %v2909_v21 = vpop.f32.mrf.mxu1 }
 0x2fe   : > { %3167 = vmatpush.msrb.mxu2 %v1502_v3  ;;  %3108 = vmatmul.f32.vlgmr.msra.gmra.mxu3 %v4292_v17  ;;  %v1645_v17 = vld [vmem:[#allocation14 + $0x90] sm:$0xff]  ;;  %v1674_v1 = vld [vmem:[#allocation14 + $0x178] sm:$0xff]  ;;  %v1659_v3 = vld [vmem:[#allocation14 + $0x100] sm:$0xff] }
 0x2ff   : > { %3168 = vmatmul.f32.vlgmr.msrb.gmra.mxu2 %v4309_v52  ;;  %3172 = vmatpush.msrb.mxu3 %v1626_v19  ;;  %vm3192_vm4 = vcmp.ge.f32.partialorder %v2710_v22, 0.0  ;;  %v3196_v25 = vmul.f32 0.01, %v2710_v22  ;;  %v2545_v52 = vperm.slane %v4333_v31, 1  ;;  %v1566_v56 = vld [vmem:[#allocation11 + $0xe18] sm:$0xff]  ;;  %v2889_v19 = vpop.f32.mrf.mxu0 }
 0x300   : > { %3240 = vmatpush.msra.mxu1 %v1645_v17  ;;  %3247 = vmatpush.msra.mxu2 %v1674_v1  ;;  %v1670_v6 = vld [vmem:[#allocation14 + $0x158] sm:$0xff]  ;;  %v1669_v7 = vld [vmem:[#allocation14 + $0x150] sm:$0xff] }
 0x301   : > { %3173 = vmatpush.msrb.mxu3 %v1622_v24  ;;  %v3200_v8 = vsel %vm3192_vm4, %v2710_v22, %v3196_v25  ;;  %v2730_v37 = vadd.f32 %v2729_v33, %v2545_v52  ;;  %v1665_v62 = vld [vmem:[#allocation14 + $0x130] sm:$0xff]  ;;  %v1662_v14 = vld [vmem:[#allocation14 + $0x118] sm:$0xff]  ;;  %v2890_v22 = vadd.f32 %v2889_v19, %v2546_v18 }
 0x302   : > { %3223 = vmatmul.f32.vlgmr.msra.gmra.mxu0 %v3200_v8  ;;  %3241 = vmatpush.msra.mxu1 %v1644_v9  ;;  %v1661_v15 = vld [vmem:[#allocation14 + $0x110] sm:$0xff] }
 0x303   : > { %3174 = vmatpush.msrb.mxu3 %v1618_v27  ;;  %v2750_v41 = vadd.f32 %v2749_v35, %v2730_v37  ;;  %3248 = vmatpush.msra.mxu2 %v1673_v2  ;;  %v2910_v24 = vadd.f32 %v2909_v21, %v2890_v22  ;;  %v1689_v35 = vld [vmem:[#allocation14 + $0x1f0] sm:$0xff]  ;;  %v1687_v37 = vld [vmem:[#allocation14 + $0x1e0] sm:$0xff] }
 0x304   : > { %3242 = vmatpush.msra.mxu1 %v1643_v36  ;;  %v2789_v38 = vpop.f32.mrf.mxu3  ;;  %v1688_v36 = vld [vmem:[#allocation14 + $0x1e8] sm:$0xff] }
 0x305   : > { %3175 = vmatpush.msrb.mxu3 %v1614_v40  ;;  %v2770_v43 = vadd.f32 %v2769_v20, %v2750_v41  ;;  %3249 = vmatpush.msra.mxu2 %v1672_v4  ;;  %v1685_v20 = vld [vmem:[#allocation14 + $0x1d0] sm:$0xff]  ;;  %v1684_v41 = vld [vmem:[#allocation14 + $0x1c8] sm:$0xff] }
 0x307   : > { %3176 = vmatpush.msrb.mxu3 %v1610_v50  ;;  %v2790_v28 = vadd.f32 %v2789_v38, %v2770_v43  ;;  %3250 = vmatpush.msra.mxu2 %v1671_v5  ;;  %v2969_v8 = vpop.f32.mrf.mxu0  ;;  %v1682_v38 = vld [vmem:[#allocation14 + $0x1b8] sm:$0xff]  ;;  %v1681_v43 = vld [vmem:[#allocation14 + $0x1b0] sm:$0xff] }
 0x309   : > { %3177 = vmatpush.msrb.mxu3 %v1606_v30  ;;  %v2810_v58 = vadd.f32 %v2809_v47, %v2790_v28  ;;  %3251 = vmatpush.msra.mxu2 %v1670_v6  ;;  %v1679_v28 = vld [vmem:[#allocation14 + $0x1a0] sm:$0xff]  ;;  %v1676_v47 = vld [vmem:[#allocation14 + $0x188] sm:$0xff] }
 0x30b   : > { %3178 = vmatpush.msrb.mxu3 %v1602_v34  ;;  %v2830_v55 = vadd.f32 %v2829_v53, %v2810_v58  ;;  %3252 = vmatpush.msra.mxu2 %v1669_v7  ;;  %v1690_v34 = vld [vmem:[#allocation14 + $0x1f8] sm:$0xff]  ;;  %v1675_v58 = vld [vmem:[#allocation14 + $0x180] sm:$0xff] }
 0x30d   : > { %3179 = vmatpush.msrb.mxu3 %v1598_v39  ;;  %v2850_v59 = vadd.f32 %v2849_v57, %v2830_v55  ;;  %3253 = vmatpush.msra.mxu2 %v1668_v32  ;;  %v1686_v39 = vld [vmem:[#allocation14 + $0x1d8] sm:$0xff]  ;;  %v3614_v32 = vld [vmem:[#allocation16] ss:$0 sm:$0xff] }
 0x30f   : > { %3180 = vmatpush.msrb.mxu3 %v1594_v42  ;;  %3254 = vmatpush.msra.mxu2 %v1667_v11  ;;  %v1683_v42 = vld [vmem:[#allocation14 + $0x1c0] sm:$0xff] }
 0x311   : > { %3181 = vmatpush.msrb.mxu3 %v1590_v44  ;;  %v1680_v44 = vld [vmem:[#allocation14 + $0x1a8] sm:$0xff] }
 0x313   : > { %3182 = vmatpush.msrb.mxu3 %v1586_v45  ;;  %v1678_v45 = vld [vmem:[#allocation14 + $0x198] sm:$0xff] }
 0x315   : > { %3183 = vmatpush.msrb.mxu3 %v1582_v46  ;;  %v1677_v46 = vld [vmem:[#allocation14 + $0x190] sm:$0xff] }
 0x317   : > { %3184 = vmatpush.msrb.mxu3 %v1578_v48  ;;  %v2547_v48 = vperm.slane %v4333_v31, 3 }
 0x319   : > { %3185 = vmatpush.msrb.mxu3 %v1574_v51  ;;  %v2989_v40 = vpop.f32.mrf.mxu1 }
 0x31b   : > { %3186 = vmatpush.msrb.mxu3 %v1570_v54 }
 0x31d   : > { %3187 = vmatpush.msrb.mxu3 %v1566_v56  ;;  %v2869_v60 = vpop.f32.mrf.mxu3 }
 0x31e   : > { %3188 = vmatmul.f32.vlgmr.msrb.gmra.mxu3 %v4317_v49  ;;  %v2870_v61 = vadd.f32 %v2869_v60, %v2850_v59  ;;  %v1666_v49 = vld [vmem:[#allocation14 + $0x138] sm:$0xff]  ;;  %v2929_v23 = vpop.f32.mrf.mxu2 }
 0x31f   : > { %3255 = vmatpush.msra.mxu2 %v1666_v49  ;;  %v2930_v26 = vadd.f32 %v2929_v23, %v2910_v24  ;;  %3267 = vmatpush.msra.mxu3 %v1690_v34 }
 0x320   : > { %vm3193_vm5 = vcmp.ge.f32.partialorder %v2870_v61, 0.0  ;;  %v3197_v63 = vmul.f32 0.01, %v2870_v61 }
 0x321   : > { %3256 = vmatpush.msra.mxu2 %v1665_v62  ;;  %3268 = vmatpush.msra.mxu3 %v1689_v35 }
 0x322   : > { %v3201_v0 = vsel %vm3193_vm5, %v2870_v61, %v3197_v63 }
 0x323   : > { %3243 = vmatmul.f32.vlgmr.msra.gmra.mxu1 %v3201_v0  ;;  %3257 = vmatpush.msra.mxu2 %v1664_v12 }
 0x324   : > { %3269 = vmatpush.msra.mxu3 %v1688_v36  ;;  %v3049_v51 = vpop.f32.mrf.mxu0 }
 0x325   : > { %3258 = vmatpush.msra.mxu2 %v1663_v13  ;;  %v3050_v54 = vadd.f32 %v3049_v51, %v2547_v48 }
 0x326   : > { %3270 = vmatpush.msra.mxu3 %v1687_v37 }
 0x327   : > { %3259 = vmatpush.msra.mxu2 %v1662_v14 }
 0x328   : > { %3271 = vmatpush.msra.mxu3 %v1686_v39 }
 0x329   : > { %3260 = vmatpush.msra.mxu2 %v1661_v15 }
 0x32a   : > { %3272 = vmatpush.msra.mxu3 %v1685_v20 }
 0x32b   : > { %3261 = vmatpush.msra.mxu2 %v1660_v16 }
 0x32c   : > { %3273 = vmatpush.msra.mxu3 %v1684_v41 }
 0x32d   : > { %3262 = vmatpush.msra.mxu2 %v1659_v3 }
 0x32e   : > { %3274 = vmatpush.msra.mxu3 %v1683_v42 }
 0x330   : > { %3275 = vmatpush.msra.mxu3 %v1682_v38 }
 0x332   : > { %3276 = vmatpush.msra.mxu3 %v1681_v43 }
 0x334   : > { %3277 = vmatpush.msra.mxu3 %v1680_v44 }
 0x336   : > { %3278 = vmatpush.msra.mxu3 %v1679_v28 }
 0x338   : > { %3279 = vmatpush.msra.mxu3 %v1678_v45 }
 0x33a   : > { %3280 = vmatpush.msra.mxu3 %v1677_v46 }
 0x33c   : > { %3281 = vmatpush.msra.mxu3 %v1676_v47  ;;  %v3069_v53 = vpop.f32.mrf.mxu1 }
 0x33d   : > { %v3070_v56 = vadd.f32 %v3069_v53, %v3050_v54 }
 0x33e   : > { %3282 = vmatpush.msra.mxu3 %v1675_v58 }
 0x340   : > { %v2949_v25 = vpop.f32.mrf.mxu3  ;;  %v3009_v50 = vpop.f32.mrf.mxu2 }
 0x341   : > { %v2950_v27 = vadd.f32 %v2949_v25, %v2930_v26 }
 0x343   : > { %v2970_v10 = vadd.f32 %v2969_v8, %v2950_v27 }
 0x345   : > { %v2990_v29 = vadd.f32 %v2989_v40, %v2970_v10  ;;  %v3129_v61 = vpop.f32.mrf.mxu0 }
 0x347   : > { %v3010_v17 = vadd.f32 %v3009_v50, %v2990_v29 }
 0x35d   : > { %v3149_v0 = vpop.f32.mrf.mxu1 }
 0x361   : > { %v3029_v52 = vpop.f32.mrf.mxu3 }
 0x362   : > { %v3030_v30 = vadd.f32 %v3029_v52, %v3010_v17  ;;  %v3089_v55 = vpop.f32.mrf.mxu2 }
 0x363   : > { %v3090_v59 = vadd.f32 %v3089_v55, %v3070_v56 }
 0x364   : > { %vm3194_vm6 = vcmp.ge.f32.partialorder %v3030_v30, 0.0  ;;  %v3198_v33 = vmul.f32 0.01, %v3030_v30 }
 0x366   : > { %v3202_v9 = vsel %vm3194_vm6, %v3030_v30, %v3198_v33 }
 0x367   : > { %3263 = vmatmul.f32.vlgmr.msra.gmra.mxu2 %v3202_v9 }
 0x37f   : > { %v3224_v11 = vpop.f32.mrf.mxu0 }
 0x380   : > { %v3225_v62 = vadd.f32 %v3614_v32, %v3224_v11 }
 0x381   : > { %v3109_v57 = vpop.f32.mrf.mxu3 }
 0x382   : > { %v3110_v60 = vadd.f32 %v3109_v57, %v3090_v59  ;;  %v3169_v2 = vpop.f32.mrf.mxu2 }
 0x384   : > { %v3130_v63 = vadd.f32 %v3129_v61, %v3110_v60 }
 0x386   : > { %v3150_v1 = vadd.f32 %v3149_v0, %v3130_v63 }
 0x388   : > { %v3170_v4 = vadd.f32 %v3169_v2, %v3150_v1 }
 0x3a0   : > { %v3244_v49 = vpop.f32.mrf.mxu1 }
 0x3a1   : > { %v3189_v5 = vpop.f32.mrf.mxu3  ;;  %v3245_v13 = vadd.f32 %v3244_v49, %v3225_v62 }
 0x3a2   : > { %v3190_v6 = vadd.f32 %v3189_v5, %v3170_v4 }
 0x3a4   : > { %vm3195_vm7 = vcmp.ge.f32.partialorder %v3190_v6, 0.0  ;;  %v3199_v31 = vmul.f32 0.01, %v3190_v6 }
 0x3a6   : > { %v3203_v7 = vsel %vm3195_vm7, %v3190_v6, %v3199_v31 }
 0x3a7   : > { %3283 = vmatmul.f32.vlgmr.msra.gmra.mxu3 %v3203_v7 }
 0x3ea   : > { %v3264_v12 = vpop.f32.mrf.mxu2 }
 0x3eb   : > { %v3265_v14 = vadd.f32 %v3264_v12, %v3245_v13 }
 0x42a   : > { %v3284_v15 = vpop.f32.mrf.mxu3 }
 0x42b   : > { %v3285_v16 = vadd.f32 %v3284_v15, %v3265_v14 }
 0x42d   : > { %3631 = vtanh.f32 %v3285_v16 }
 0x433   : > { %v3632_v3 = vpop.eup %3631 }
 0x434   : > { %3288 = vst [vmem:[%s474_s26] sm:$0xff] %v3632_v3 }
 0x435   : > { %3931 = shalt.err (!%p3928_p9)
}
 0x436   : > { %3515 = dma.vmem_to_hbm [thread:$0]  (%p4159_p4), %s3303_s1, 128, %s3305_s27, %s3290_s22  }
 0x437 PF: > { %s3316_s21 = sand.u32 1, %s3974_s30   ;;  %p4401_p10 = scmp.ge.s32.totalorder %s3986_s12, 2 }
 0x438   : > { %s3317_s2 = scalar_lea.sflag [#allocation4], %s3316_s21 }
 0x439   : > { %p3547_p13 = pnand %p4401_p10, %p4163_p6 }
 0x43b   : > { %p3548_p11 = pneg %p3547_p13 }
 0x43d   : > { %3969 = dma.done.wait (%p3548_p11), %s3317_s2, 128  }
 0x43e   : > { %3971 = vsyncadd (%p3548_p11), %s3317_s2, 4294967168  ;;  %p26_p0 = scmp.ge.s32.totalorder %s4133_s20, 4   ;;  %s4402_s30 = smov %s3978_s10 }
 0x43f   : > { %s4403_s10 = smov %s3982_s11  ;;  %s4404_s11 = smov %s4144_s18 }
 0x440   : > { %s4405_s12 = smov %s4133_s20  ;;  %28 = sbr.rel (!%p26_p0) target bundleno = 14 (0xe), region = 133 }
 0x445   :  { %3323 = vsyncpa [#allocation3], 1 }
 0x446   :  { %3325 = vsyncpa [#allocation3 + $0x1], 1 }
 0x447   :  { %3326 = vsyncpa [#allocation6], 1 }
 0x448   :  { %3327 = vsyncpa [#allocation9], 1 }
 0x449   :  { %3328 = vsyncpa [#allocation12], 1 }
 0x44a   :  { %3329 = vsyncpa [#allocation15], 1 }
 0x44b   :  { %3330 = vsyncpa [#allocation4], 1 }
 0x44c   :  { %3332 = vsyncpa [#allocation4 + $0x1], 1 }

</bundles_post_ra>
